<compile_context>
chip_gen: v6e
topology: v6e:2x2x1
jax: 0.10.0
libtpu: 0.0.40
codegen_flags: <defaults>
</compile_context>

<pallas_src>
import jax
import jax.numpy as jnp
from jax import lax
from jax.experimental import pallas as pl
from jax.experimental.pallas import tpu as pltpu


def _upsample_conv3x3_kernel(w_ref, b_ref, x_ref, o_ref):
    """Fused nearest-2x upsample + 3x3 conv (stride 1, pad 1), one batch element.

    w_ref: SMEM (2*2*2*2*Cout*Cin,)  effective weights, index order (a,b,u,v,co,ci)
    b_ref: SMEM (Cout,)
    x_ref: VMEM (1, Cin, H+2, W+2)   zero-padded low-res input block
    o_ref: VMEM (1, Cout, 2H, 2W)
    """
    cin = x_ref.shape[1]
    h = x_ref.shape[2] - 2
    w = x_ref.shape[3] - 2
    cout = o_ref.shape[1]

    # 0/1 parity-placement matrices (built once per grid step from 2-D iotas):
    #   R[a] (2H, H): R[a][r, i] = 1  iff  r == 2*i + a
    #   S[b] (W, 2W): S[b][j, c] = 1  iff  c == 2*j + b
    rr = lax.broadcasted_iota(jnp.int32, (2 * h, h), 0)
    ri = lax.broadcasted_iota(jnp.int32, (2 * h, h), 1)
    R = [(rr == 2 * ri + a).astype(jnp.float32) for a in range(2)]
    sj = lax.broadcasted_iota(jnp.int32, (w, 2 * w), 0)
    sc = lax.broadcasted_iota(jnp.int32, (w, 2 * w), 1)
    S = [(sc == 2 * sj + b).astype(jnp.float32) for b in range(2)]

    # f32 parity-plane accumulators, initialized with the bias.
    acc = {}
    for co in range(cout):
        bias_co = b_ref[co]
        for a in range(2):
            for b in range(2):
                acc[(a, b, co)] = jnp.full((h, w), bias_co, dtype=jnp.float32)

    # Parities `a` that use a low-res tap at row offset rh (rh == a + u, u in {0,1}).
    users = {0: (0,), 1: (0, 1), 2: (1,)}

    # MAC loop: taps hoisted (9*Cin window slices total), Cout innermost.
    # Scalar-broadcast VPU MACs are fine at these channel counts; see header
    # note for the MXU im2col path at production channel counts.
    for ci in range(cin):
        for rh in range(3):
            for rc in range(3):
                tap = x_ref[0, ci, rh:rh + h, rc:rc + w].astype(jnp.float32)
                for a in users[rh]:
                    u = rh - a
                    for b in users[rc]:
                        v = rc - b
                        base = ((((a * 2 + b) * 2 + u) * 2 + v) * cout) * cin
                        for co in range(cout):
                            acc[(a, b, co)] = (
                                acc[(a, b, co)] + w_ref[base + co * cin + ci] * tap)

    # Interleave the four parity planes into the (2H, 2W) tile with 0/1
    # placement matmuls:  full[2i+a, 2j+b] = acc[(a, b)][i, j].
    for co in range(cout):
        row0 = (jnp.dot(acc[(0, 0, co)], S[0], preferred_element_type=jnp.float32)
                + jnp.dot(acc[(0, 1, co)], S[1], preferred_element_type=jnp.float32))
        row1 = (jnp.dot(acc[(1, 0, co)], S[0], preferred_element_type=jnp.float32)
                + jnp.dot(acc[(1, 1, co)], S[1], preferred_element_type=jnp.float32))
        full = (jnp.dot(R[0], row0, preferred_element_type=jnp.float32)
                + jnp.dot(R[1], row1, preferred_element_type=jnp.float32))
        o_ref[0, co, :, :] = full.astype(o_ref.dtype)


def _effective_weights(weight):
    """Fold the nearest-2x upsample into the 3x3 conv weights.

    Returns w_eff flattened 1-D with index order (a, b, u, v, co, ci) such that
      conv3x3(upsample2x(x))[co, 2i+a, 2j+b]
        = sum_{ci,u,v} w_eff[a,b,u,v,co,ci] * x_pad[ci, i+a+u, j+b+v]
    where x_pad is x zero-padded by 1 pixel on each spatial side.
    """
    cout, cin = weight.shape[0], weight.shape[1]
    wf = weight.astype(jnp.float32)
    w_eff = jnp.zeros((2, 2, 2, 2, cout, cin), jnp.float32)
    for a in range(2):
        for b in range(2):
            for kh in range(3):
                u = (a + kh - 1) // 2 + 1 - a          # in {0, 1}
                for kw in range(3):
                    v = (b + kw - 1) // 2 + 1 - b      # in {0, 1}
                    w_eff = w_eff.at[a, b, u, v].add(wf[:, :, kh, kw])
    return w_eff.reshape(-1)


def upsample_forward(x, weight=None, bias=None, *, use_conv=True):
    """Forward pass of Upsample (dims=2): nearest 2x upsample + optional 3x3 conv."""
    n, c, h, w = x.shape
    if not use_conv:
        # Pure data duplication (no compute); leave to XLA.
        return jnp.repeat(jnp.repeat(x, 2, axis=2), 2, axis=3)
    # TODO(synk): dims=1/3 variants of the module (fold the extra spatial dim into N).

    cout = weight.shape[0]
    ho, wo = 2 * h, 2 * w

    # Only remaining glue: 1-px zero halo on the LOW-RES input; the upsampled /
    # upsampled+padded tensors are never materialized in HBM.
    x_pad = jnp.pad(x, ((0, 0), (0, 0), (1, 1), (1, 1)))
    w_eff = _effective_weights(weight)
    b = bias.astype(jnp.float32)

    return pl.pallas_call(
        _upsample_conv3x3_kernel,
        out_shape=jax.ShapeDtypeStruct((n, cout, ho, wo), x.dtype),
        grid=(n,),
        in_specs=[
            pl.BlockSpec(memory_space=pltpu.MemorySpace.SMEM),   # effective weights
            pl.BlockSpec(memory_space=pltpu.MemorySpace.SMEM),   # bias
            pl.BlockSpec((1, c, h + 2, w + 2), lambda i: (i, 0, 0, 0)),
        ],
        out_specs=pl.BlockSpec((1, cout, ho, wo), lambda i: (i, 0, 0, 0)),
        compiler_params=pltpu.CompilerParams(
            dimension_semantics=("parallel",)),
    )(w_eff, b, x_pad)


def _reference(x, weight, bias):
    x_up = jnp.repeat(jnp.repeat(x, 2, axis=2), 2, axis=3)
    out = lax.conv_general_dilated(
        x_up, weight, window_strides=(1, 1), padding=((1, 1), (1, 1)),
        dimension_numbers=("NCHW", "OIHW", "NCHW"),
        precision=lax.Precision.HIGHEST)
    return out + bias[None, :, None, None]


if __name__ == "__main__":
    key = jax.random.PRNGKey(0)
    k1, k2, k3 = jax.random.split(key, 3)

    # Small shapes consistent with the module: channels=4, use_conv=True, dims=2.
    N, C, H, W = 2, 4, 16, 16
    Cout = C  # out_channels defaults to channels

    x = jax.random.normal(k1, (N, C, H, W), dtype=jnp.float32)
    weight = jax.random.normal(k2, (Cout, C, 3, 3), dtype=jnp.float32) * 0.1
    bias = jax.random.normal(k3, (Cout,), dtype=jnp.float32) * 0.01

    out = upsample_forward(x, weight, bias, use_conv=True)
    out = jax.block_until_ready(out)

    assert out.shape == (N, Cout, 2 * H, 2 * W), out.shape
    ref = _reference(x, weight, bias)
    max_err = float(jnp.max(jnp.abs(out - ref)))
    # MACs accumulate in exact f32 on the VPU; the only reduced-precision step
    # is the 0/1 parity-placement matmul (each output element = value * 1.0),
    # bounded by a single bf16 rounding if the MXU runs a 1-pass f32 matmul.
    assert max_err < 1e-2, f"max_err={max_err}"

    print("KERNEL_OK")
</pallas_src>

<mosaic_0001>
module attributes {stable_mosaic.version = 11 : i64} {
  func.func @_upsample_conv3x3_kernel(%arg0: i32, %arg1: memref<256xf32, #tpu.memory_space<smem>>, %arg2: memref<4xf32, #tpu.memory_space<smem>>, %arg3: memref<1x4x18x18xf32, #tpu.memory_space<vmem>>, %arg4: memref<1x4x32x32xf32, #tpu.memory_space<vmem>>) attributes {dimension_semantics = [#tpu.dimension_semantics<parallel>], iteration_bounds = array<i64: 2>, scalar_prefetch = 0 : i64, scratch_operands = 0 : i64, tpu.core_type = #tpu.core_type<tc>, window_params = [{transform_indices = @transform_0, window_bounds = array<i64: 256>}, {transform_indices = @transform_1, window_bounds = array<i64: 4>}, {transform_indices = @transform_2, window_bounds = array<i64: 1, 4, 18, 18>}, {transform_indices = @transform_3, window_bounds = array<i64: 1, 4, 32, 32>}]} {
    %0 = tpu.iota {dimensions = array<i32: 0>} : vector<32x16xi32>
    %1 = tpu.iota {dimensions = array<i32: 1>} : vector<32x16xi32>
    %c2_i32 = arith.constant 2 : i32
    %2 = vector.broadcast %c2_i32 : i32 to vector<32x16xi32>
    %3 = arith.muli %2, %1 : vector<32x16xi32>
    %c0_i32 = arith.constant 0 : i32
    %4 = vector.broadcast %c0_i32 : i32 to vector<32x16xi32>
    %5 = arith.addi %3, %4 : vector<32x16xi32>
    %6 = arith.cmpi eq, %0, %5 : vector<32x16xi32>
    %7 = arith.extui %6 : vector<32x16xi1> to vector<32x16xi32>
    %8 = arith.sitofp %7 : vector<32x16xi32> to vector<32x16xf32>
    %c2_i32_0 = arith.constant 2 : i32
    %9 = vector.broadcast %c2_i32_0 : i32 to vector<32x16xi32>
    %10 = arith.muli %9, %1 : vector<32x16xi32>
    %c1_i32 = arith.constant 1 : i32
    %11 = vector.broadcast %c1_i32 : i32 to vector<32x16xi32>
    %12 = arith.addi %10, %11 : vector<32x16xi32>
    %13 = arith.cmpi eq, %0, %12 : vector<32x16xi32>
    %14 = arith.extui %13 : vector<32x16xi1> to vector<32x16xi32>
    %15 = arith.sitofp %14 : vector<32x16xi32> to vector<32x16xf32>
    %16 = tpu.iota {dimensions = array<i32: 0>} : vector<16x32xi32>
    %17 = tpu.iota {dimensions = array<i32: 1>} : vector<16x32xi32>
    %c2_i32_1 = arith.constant 2 : i32
    %18 = vector.broadcast %c2_i32_1 : i32 to vector<16x32xi32>
    %19 = arith.muli %18, %16 : vector<16x32xi32>
    %c0_i32_2 = arith.constant 0 : i32
    %20 = vector.broadcast %c0_i32_2 : i32 to vector<16x32xi32>
    %21 = arith.addi %19, %20 : vector<16x32xi32>
    %22 = arith.cmpi eq, %17, %21 : vector<16x32xi32>
    %23 = arith.extui %22 : vector<16x32xi1> to vector<16x32xi32>
    %24 = arith.sitofp %23 : vector<16x32xi32> to vector<16x32xf32>
    %c2_i32_3 = arith.constant 2 : i32
    %25 = vector.broadcast %c2_i32_3 : i32 to vector<16x32xi32>
    %26 = arith.muli %25, %16 : vector<16x32xi32>
    %c1_i32_4 = arith.constant 1 : i32
    %27 = vector.broadcast %c1_i32_4 : i32 to vector<16x32xi32>
    %28 = arith.addi %26, %27 : vector<16x32xi32>
    %29 = arith.cmpi eq, %17, %28 : vector<16x32xi32>
    %30 = arith.extui %29 : vector<16x32xi1> to vector<16x32xi32>
    %31 = arith.sitofp %30 : vector<16x32xi32> to vector<16x32xf32>
    %c0 = arith.constant 0 : index
    %32 = memref.load %arg2[%c0] : memref<4xf32, #tpu.memory_space<smem>>
    %33 = vector.broadcast %32 : f32 to vector<16x16xf32>
    %34 = vector.broadcast %32 : f32 to vector<16x16xf32>
    %35 = vector.broadcast %32 : f32 to vector<16x16xf32>
    %36 = vector.broadcast %32 : f32 to vector<16x16xf32>
    %c1 = arith.constant 1 : index
    %37 = memref.load %arg2[%c1] : memref<4xf32, #tpu.memory_space<smem>>
    %38 = vector.broadcast %37 : f32 to vector<16x16xf32>
    %39 = vector.broadcast %37 : f32 to vector<16x16xf32>
    %40 = vector.broadcast %37 : f32 to vector<16x16xf32>
    %41 = vector.broadcast %37 : f32 to vector<16x16xf32>
    %c2 = arith.constant 2 : index
    %42 = memref.load %arg2[%c2] : memref<4xf32, #tpu.memory_space<smem>>
    %43 = vector.broadcast %42 : f32 to vector<16x16xf32>
    %44 = vector.broadcast %42 : f32 to vector<16x16xf32>
    %45 = vector.broadcast %42 : f32 to vector<16x16xf32>
    %46 = vector.broadcast %42 : f32 to vector<16x16xf32>
    %c3 = arith.constant 3 : index
    %47 = memref.load %arg2[%c3] : memref<4xf32, #tpu.memory_space<smem>>
    %48 = vector.broadcast %47 : f32 to vector<16x16xf32>
    %49 = vector.broadcast %47 : f32 to vector<16x16xf32>
    %50 = vector.broadcast %47 : f32 to vector<16x16xf32>
    %51 = vector.broadcast %47 : f32 to vector<16x16xf32>
    %c0_5 = arith.constant 0 : index
    %c0_6 = arith.constant 0 : index
    %c0_7 = arith.constant 0 : index
    %c0_8 = arith.constant 0 : index
    %52 = vector.load %arg3[%c0_5, %c0_6, %c0_7, %c0_8] : memref<1x4x18x18xf32, #tpu.memory_space<vmem>>, vector<1x1x16x16xf32>
    %53 = vector.shape_cast %52 : vector<1x1x16x16xf32> to vector<16x16xf32>
    %c0_9 = arith.constant 0 : index
    %54 = memref.load %arg1[%c0_9] : memref<256xf32, #tpu.memory_space<smem>>
    %55 = vector.broadcast %54 : f32 to vector<16x16xf32>
    %56 = arith.mulf %55, %53 : vector<16x16xf32>
    %57 = arith.addf %33, %56 : vector<16x16xf32>
    %c4 = arith.constant 4 : index
    %58 = memref.load %arg1[%c4] : memref<256xf32, #tpu.memory_space<smem>>
    %59 = vector.broadcast %58 : f32 to vector<16x16xf32>
    %60 = arith.mulf %59, %53 : vector<16x16xf32>
    %61 = arith.addf %38, %60 : vector<16x16xf32>
    %c8 = arith.constant 8 : index
    %62 = memref.load %arg1[%c8] : memref<256xf32, #tpu.memory_space<smem>>
    %63 = vector.broadcast %62 : f32 to vector<16x16xf32>
    %64 = arith.mulf %63, %53 : vector<16x16xf32>
    %65 = arith.addf %43, %64 : vector<16x16xf32>
    %c12 = arith.constant 12 : index
    %66 = memref.load %arg1[%c12] : memref<256xf32, #tpu.memory_space<smem>>
    %67 = vector.broadcast %66 : f32 to vector<16x16xf32>
    %68 = arith.mulf %67, %53 : vector<16x16xf32>
    %69 = arith.addf %48, %68 : vector<16x16xf32>
    %c0_10 = arith.constant 0 : index
    %c0_11 = arith.constant 0 : index
    %c0_12 = arith.constant 0 : index
    %c1_13 = arith.constant 1 : index
    %70 = vector.load %arg3[%c0_10, %c0_11, %c0_12, %c1_13] : memref<1x4x18x18xf32, #tpu.memory_space<vmem>>, vector<1x1x16x16xf32>
    %71 = vector.shape_cast %70 : vector<1x1x16x16xf32> to vector<16x16xf32>
    %c16 = arith.constant 16 : index
    %72 = memref.load %arg1[%c16] : memref<256xf32, #tpu.memory_space<smem>>
    %73 = vector.broadcast %72 : f32 to vector<16x16xf32>
    %74 = arith.mulf %73, %71 : vector<16x16xf32>
    %75 = arith.addf %57, %74 : vector<16x16xf32>
    %c20 = arith.constant 20 : index
    %76 = memref.load %arg1[%c20] : memref<256xf32, #tpu.memory_space<smem>>
    %77 = vector.broadcast %76 : f32 to vector<16x16xf32>
    %78 = arith.mulf %77, %71 : vector<16x16xf32>
    %79 = arith.addf %61, %78 : vector<16x16xf32>
    %c24 = arith.constant 24 : index
    %80 = memref.load %arg1[%c24] : memref<256xf32, #tpu.memory_space<smem>>
    %81 = vector.broadcast %80 : f32 to vector<16x16xf32>
    %82 = arith.mulf %81, %71 : vector<16x16xf32>
    %83 = arith.addf %65, %82 : vector<16x16xf32>
    %c28 = arith.constant 28 : index
    %84 = memref.load %arg1[%c28] : memref<256xf32, #tpu.memory_space<smem>>
    %85 = vector.broadcast %84 : f32 to vector<16x16xf32>
    %86 = arith.mulf %85, %71 : vector<16x16xf32>
    %87 = arith.addf %69, %86 : vector<16x16xf32>
    %c64 = arith.constant 64 : index
    %88 = memref.load %arg1[%c64] : memref<256xf32, #tpu.memory_space<smem>>
    %89 = vector.broadcast %88 : f32 to vector<16x16xf32>
    %90 = arith.mulf %89, %71 : vector<16x16xf32>
    %91 = arith.addf %34, %90 : vector<16x16xf32>
    %c68 = arith.constant 68 : index
    %92 = memref.load %arg1[%c68] : memref<256xf32, #tpu.memory_space<smem>>
    %93 = vector.broadcast %92 : f32 to vector<16x16xf32>
    %94 = arith.mulf %93, %71 : vector<16x16xf32>
    %95 = arith.addf %39, %94 : vector<16x16xf32>
    %c72 = arith.constant 72 : index
    %96 = memref.load %arg1[%c72] : memref<256xf32, #tpu.memory_space<smem>>
    %97 = vector.broadcast %96 : f32 to vector<16x16xf32>
    %98 = arith.mulf %97, %71 : vector<16x16xf32>
    %99 = arith.addf %44, %98 : vector<16x16xf32>
    %c76 = arith.constant 76 : index
    %100 = memref.load %arg1[%c76] : memref<256xf32, #tpu.memory_space<smem>>
    %101 = vector.broadcast %100 : f32 to vector<16x16xf32>
    %102 = arith.mulf %101, %71 : vector<16x16xf32>
    %103 = arith.addf %49, %102 : vector<16x16xf32>
    %c0_14 = arith.constant 0 : index
    %c0_15 = arith.constant 0 : index
    %c0_16 = arith.constant 0 : index
    %c2_17 = arith.constant 2 : index
    %104 = vector.load %arg3[%c0_14, %c0_15, %c0_16, %c2_17] : memref<1x4x18x18xf32, #tpu.memory_space<vmem>>, vector<1x1x16x16xf32>
    %105 = vector.shape_cast %104 : vector<1x1x16x16xf32> to vector<16x16xf32>
    %c80 = arith.constant 80 : index
    %106 = memref.load %arg1[%c80] : memref<256xf32, #tpu.memory_space<smem>>
    %107 = vector.broadcast %106 : f32 to vector<16x16xf32>
    %108 = arith.mulf %107, %105 : vector<16x16xf32>
    %109 = arith.addf %91, %108 : vector<16x16xf32>
    %c84 = arith.constant 84 : index
    %110 = memref.load %arg1[%c84] : memref<256xf32, #tpu.memory_space<smem>>
    %111 = vector.broadcast %110 : f32 to vector<16x16xf32>
    %112 = arith.mulf %111, %105 : vector<16x16xf32>
    %113 = arith.addf %95, %112 : vector<16x16xf32>
    %c88 = arith.constant 88 : index
    %114 = memref.load %arg1[%c88] : memref<256xf32, #tpu.memory_space<smem>>
    %115 = vector.broadcast %114 : f32 to vector<16x16xf32>
    %116 = arith.mulf %115, %105 : vector<16x16xf32>
    %117 = arith.addf %99, %116 : vector<16x16xf32>
    %c92 = arith.constant 92 : index
    %118 = memref.load %arg1[%c92] : memref<256xf32, #tpu.memory_space<smem>>
    %119 = vector.broadcast %118 : f32 to vector<16x16xf32>
    %120 = arith.mulf %119, %105 : vector<16x16xf32>
    %121 = arith.addf %103, %120 : vector<16x16xf32>
    %c0_18 = arith.constant 0 : index
    %c0_19 = arith.constant 0 : index
    %c1_20 = arith.constant 1 : index
    %c0_21 = arith.constant 0 : index
    %122 = vector.load %arg3[%c0_18, %c0_19, %c1_20, %c0_21] : memref<1x4x18x18xf32, #tpu.memory_space<vmem>>, vector<1x1x16x16xf32>
    %123 = vector.shape_cast %122 : vector<1x1x16x16xf32> to vector<16x16xf32>
    %c32 = arith.constant 32 : index
    %124 = memref.load %arg1[%c32] : memref<256xf32, #tpu.memory_space<smem>>
    %125 = vector.broadcast %124 : f32 to vector<16x16xf32>
    %126 = arith.mulf %125, %123 : vector<16x16xf32>
    %127 = arith.addf %75, %126 : vector<16x16xf32>
    %c36 = arith.constant 36 : index
    %128 = memref.load %arg1[%c36] : memref<256xf32, #tpu.memory_space<smem>>
    %129 = vector.broadcast %128 : f32 to vector<16x16xf32>
    %130 = arith.mulf %129, %123 : vector<16x16xf32>
    %131 = arith.addf %79, %130 : vector<16x16xf32>
    %c40 = arith.constant 40 : index
    %132 = memref.load %arg1[%c40] : memref<256xf32, #tpu.memory_space<smem>>
    %133 = vector.broadcast %132 : f32 to vector<16x16xf32>
    %134 = arith.mulf %133, %123 : vector<16x16xf32>
    %135 = arith.addf %83, %134 : vector<16x16xf32>
    %c44 = arith.constant 44 : index
    %136 = memref.load %arg1[%c44] : memref<256xf32, #tpu.memory_space<smem>>
    %137 = vector.broadcast %136 : f32 to vector<16x16xf32>
    %138 = arith.mulf %137, %123 : vector<16x16xf32>
    %139 = arith.addf %87, %138 : vector<16x16xf32>
    %c128 = arith.constant 128 : index
    %140 = memref.load %arg1[%c128] : memref<256xf32, #tpu.memory_space<smem>>
    %141 = vector.broadcast %140 : f32 to vector<16x16xf32>
    %142 = arith.mulf %141, %123 : vector<16x16xf32>
    %143 = arith.addf %35, %142 : vector<16x16xf32>
    %c132 = arith.constant 132 : index
    %144 = memref.load %arg1[%c132] : memref<256xf32, #tpu.memory_space<smem>>
    %145 = vector.broadcast %144 : f32 to vector<16x16xf32>
    %146 = arith.mulf %145, %123 : vector<16x16xf32>
    %147 = arith.addf %40, %146 : vector<16x16xf32>
    %c136 = arith.constant 136 : index
    %148 = memref.load %arg1[%c136] : memref<256xf32, #tpu.memory_space<smem>>
    %149 = vector.broadcast %148 : f32 to vector<16x16xf32>
    %150 = arith.mulf %149, %123 : vector<16x16xf32>
    %151 = arith.addf %45, %150 : vector<16x16xf32>
    %c140 = arith.constant 140 : index
    %152 = memref.load %arg1[%c140] : memref<256xf32, #tpu.memory_space<smem>>
    %153 = vector.broadcast %152 : f32 to vector<16x16xf32>
    %154 = arith.mulf %153, %123 : vector<16x16xf32>
    %155 = arith.addf %50, %154 : vector<16x16xf32>
    %c0_22 = arith.constant 0 : index
    %c0_23 = arith.constant 0 : index
    %c1_24 = arith.constant 1 : index
    %c1_25 = arith.constant 1 : index
    %156 = vector.load %arg3[%c0_22, %c0_23, %c1_24, %c1_25] : memref<1x4x18x18xf32, #tpu.memory_space<vmem>>, vector<1x1x16x16xf32>
    %157 = vector.shape_cast %156 : vector<1x1x16x16xf32> to vector<16x16xf32>
    %c48 = arith.constant 48 : index
    %158 = memref.load %arg1[%c48] : memref<256xf32, #tpu.memory_space<smem>>
    %159 = vector.broadcast %158 : f32 to vector<16x16xf32>
    %160 = arith.mulf %159, %157 : vector<16x16xf32>
    %161 = arith.addf %127, %160 : vector<16x16xf32>
    %c52 = arith.constant 52 : index
    %162 = memref.load %arg1[%c52] : memref<256xf32, #tpu.memory_space<smem>>
    %163 = vector.broadcast %162 : f32 to vector<16x16xf32>
    %164 = arith.mulf %163, %157 : vector<16x16xf32>
    %165 = arith.addf %131, %164 : vector<16x16xf32>
    %c56 = arith.constant 56 : index
    %166 = memref.load %arg1[%c56] : memref<256xf32, #tpu.memory_space<smem>>
    %167 = vector.broadcast %166 : f32 to vector<16x16xf32>
    %168 = arith.mulf %167, %157 : vector<16x16xf32>
    %169 = arith.addf %135, %168 : vector<16x16xf32>
    %c60 = arith.constant 60 : index
    %170 = memref.load %arg1[%c60] : memref<256xf32, #tpu.memory_space<smem>>
    %171 = vector.broadcast %170 : f32 to vector<16x16xf32>
    %172 = arith.mulf %171, %157 : vector<16x16xf32>
    %173 = arith.addf %139, %172 : vector<16x16xf32>
    %c96 = arith.constant 96 : index
    %174 = memref.load %arg1[%c96] : memref<256xf32, #tpu.memory_space<smem>>
    %175 = vector.broadcast %174 : f32 to vector<16x16xf32>
    %176 = arith.mulf %175, %157 : vector<16x16xf32>
    %177 = arith.addf %109, %176 : vector<16x16xf32>
    %c100 = arith.constant 100 : index
    %178 = memref.load %arg1[%c100] : memref<256xf32, #tpu.memory_space<smem>>
    %179 = vector.broadcast %178 : f32 to vector<16x16xf32>
    %180 = arith.mulf %179, %157 : vector<16x16xf32>
    %181 = arith.addf %113, %180 : vector<16x16xf32>
    %c104 = arith.constant 104 : index
    %182 = memref.load %arg1[%c104] : memref<256xf32, #tpu.memory_space<smem>>
    %183 = vector.broadcast %182 : f32 to vector<16x16xf32>
    %184 = arith.mulf %183, %157 : vector<16x16xf32>
    %185 = arith.addf %117, %184 : vector<16x16xf32>
    %c108 = arith.constant 108 : index
    %186 = memref.load %arg1[%c108] : memref<256xf32, #tpu.memory_space<smem>>
    %187 = vector.broadcast %186 : f32 to vector<16x16xf32>
    %188 = arith.mulf %187, %157 : vector<16x16xf32>
    %189 = arith.addf %121, %188 : vector<16x16xf32>
    %c144 = arith.constant 144 : index
    %190 = memref.load %arg1[%c144] : memref<256xf32, #tpu.memory_space<smem>>
    %191 = vector.broadcast %190 : f32 to vector<16x16xf32>
    %192 = arith.mulf %191, %157 : vector<16x16xf32>
    %193 = arith.addf %143, %192 : vector<16x16xf32>
    %c148 = arith.constant 148 : index
    %194 = memref.load %arg1[%c148] : memref<256xf32, #tpu.memory_space<smem>>
    %195 = vector.broadcast %194 : f32 to vector<16x16xf32>
    %196 = arith.mulf %195, %157 : vector<16x16xf32>
    %197 = arith.addf %147, %196 : vector<16x16xf32>
    %c152 = arith.constant 152 : index
    %198 = memref.load %arg1[%c152] : memref<256xf32, #tpu.memory_space<smem>>
    %199 = vector.broadcast %198 : f32 to vector<16x16xf32>
    %200 = arith.mulf %199, %157 : vector<16x16xf32>
    %201 = arith.addf %151, %200 : vector<16x16xf32>
    %c156 = arith.constant 156 : index
    %202 = memref.load %arg1[%c156] : memref<256xf32, #tpu.memory_space<smem>>
    %203 = vector.broadcast %202 : f32 to vector<16x16xf32>
    %204 = arith.mulf %203, %157 : vector<16x16xf32>
    %205 = arith.addf %155, %204 : vector<16x16xf32>
    %c192 = arith.constant 192 : index
    %206 = memref.load %arg1[%c192] : memref<256xf32, #tpu.memory_space<smem>>
    %207 = vector.broadcast %206 : f32 to vector<16x16xf32>
    %208 = arith.mulf %207, %157 : vector<16x16xf32>
    %209 = arith.addf %36, %208 : vector<16x16xf32>
    %c196 = arith.constant 196 : index
    %210 = memref.load %arg1[%c196] : memref<256xf32, #tpu.memory_space<smem>>
    %211 = vector.broadcast %210 : f32 to vector<16x16xf32>
    %212 = arith.mulf %211, %157 : vector<16x16xf32>
    %213 = arith.addf %41, %212 : vector<16x16xf32>
    %c200 = arith.constant 200 : index
    %214 = memref.load %arg1[%c200] : memref<256xf32, #tpu.memory_space<smem>>
    %215 = vector.broadcast %214 : f32 to vector<16x16xf32>
    %216 = arith.mulf %215, %157 : vector<16x16xf32>
    %217 = arith.addf %46, %216 : vector<16x16xf32>
    %c204 = arith.constant 204 : index
    %218 = memref.load %arg1[%c204] : memref<256xf32, #tpu.memory_space<smem>>
    %219 = vector.broadcast %218 : f32 to vector<16x16xf32>
    %220 = arith.mulf %219, %157 : vector<16x16xf32>
    %221 = arith.addf %51, %220 : vector<16x16xf32>
    %c0_26 = arith.constant 0 : index
    %c0_27 = arith.constant 0 : index
    %c1_28 = arith.constant 1 : index
    %c2_29 = arith.constant 2 : index
    %222 = vector.load %arg3[%c0_26, %c0_27, %c1_28, %c2_29] : memref<1x4x18x18xf32, #tpu.memory_space<vmem>>, vector<1x1x16x16xf32>
    %223 = vector.shape_cast %222 : vector<1x1x16x16xf32> to vector<16x16xf32>
    %c112 = arith.constant 112 : index
    %224 = memref.load %arg1[%c112] : memref<256xf32, #tpu.memory_space<smem>>
    %225 = vector.broadcast %224 : f32 to vector<16x16xf32>
    %226 = arith.mulf %225, %223 : vector<16x16xf32>
    %227 = arith.addf %177, %226 : vector<16x16xf32>
    %c116 = arith.constant 116 : index
    %228 = memref.load %arg1[%c116] : memref<256xf32, #tpu.memory_space<smem>>
    %229 = vector.broadcast %228 : f32 to vector<16x16xf32>
    %230 = arith.mulf %229, %223 : vector<16x16xf32>
    %231 = arith.addf %181, %230 : vector<16x16xf32>
    %c120 = arith.constant 120 : index
    %232 = memref.load %arg1[%c120] : memref<256xf32, #tpu.memory_space<smem>>
    %233 = vector.broadcast %232 : f32 to vector<16x16xf32>
    %234 = arith.mulf %233, %223 : vector<16x16xf32>
    %235 = arith.addf %185, %234 : vector<16x16xf32>
    %c124 = arith.constant 124 : index
    %236 = memref.load %arg1[%c124] : memref<256xf32, #tpu.memory_space<smem>>
    %237 = vector.broadcast %236 : f32 to vector<16x16xf32>
    %238 = arith.mulf %237, %223 : vector<16x16xf32>
    %239 = arith.addf %189, %238 : vector<16x16xf32>
    %c208 = arith.constant 208 : index
    %240 = memref.load %arg1[%c208] : memref<256xf32, #tpu.memory_space<smem>>
    %241 = vector.broadcast %240 : f32 to vector<16x16xf32>
    %242 = arith.mulf %241, %223 : vector<16x16xf32>
    %243 = arith.addf %209, %242 : vector<16x16xf32>
    %c212 = arith.constant 212 : index
    %244 = memref.load %arg1[%c212] : memref<256xf32, #tpu.memory_space<smem>>
    %245 = vector.broadcast %244 : f32 to vector<16x16xf32>
    %246 = arith.mulf %245, %223 : vector<16x16xf32>
    %247 = arith.addf %213, %246 : vector<16x16xf32>
    %c216 = arith.constant 216 : index
    %248 = memref.load %arg1[%c216] : memref<256xf32, #tpu.memory_space<smem>>
    %249 = vector.broadcast %248 : f32 to vector<16x16xf32>
    %250 = arith.mulf %249, %223 : vector<16x16xf32>
    %251 = arith.addf %217, %250 : vector<16x16xf32>
    %c220 = arith.constant 220 : index
    %252 = memref.load %arg1[%c220] : memref<256xf32, #tpu.memory_space<smem>>
    %253 = vector.broadcast %252 : f32 to vector<16x16xf32>
    %254 = arith.mulf %253, %223 : vector<16x16xf32>
    %255 = arith.addf %221, %254 : vector<16x16xf32>
    %c0_30 = arith.constant 0 : index
    %c0_31 = arith.constant 0 : index
    %c2_32 = arith.constant 2 : index
    %c0_33 = arith.constant 0 : index
    %256 = vector.load %arg3[%c0_30, %c0_31, %c2_32, %c0_33] : memref<1x4x18x18xf32, #tpu.memory_space<vmem>>, vector<1x1x16x16xf32>
    %257 = vector.shape_cast %256 : vector<1x1x16x16xf32> to vector<16x16xf32>
    %c160 = arith.constant 160 : index
    %258 = memref.load %arg1[%c160] : memref<256xf32, #tpu.memory_space<smem>>
    %259 = vector.broadcast %258 : f32 to vector<16x16xf32>
    %260 = arith.mulf %259, %257 : vector<16x16xf32>
    %261 = arith.addf %193, %260 : vector<16x16xf32>
    %c164 = arith.constant 164 : index
    %262 = memref.load %arg1[%c164] : memref<256xf32, #tpu.memory_space<smem>>
    %263 = vector.broadcast %262 : f32 to vector<16x16xf32>
    %264 = arith.mulf %263, %257 : vector<16x16xf32>
    %265 = arith.addf %197, %264 : vector<16x16xf32>
    %c168 = arith.constant 168 : index
    %266 = memref.load %arg1[%c168] : memref<256xf32, #tpu.memory_space<smem>>
    %267 = vector.broadcast %266 : f32 to vector<16x16xf32>
    %268 = arith.mulf %267, %257 : vector<16x16xf32>
    %269 = arith.addf %201, %268 : vector<16x16xf32>
    %c172 = arith.constant 172 : index
    %270 = memref.load %arg1[%c172] : memref<256xf32, #tpu.memory_space<smem>>
    %271 = vector.broadcast %270 : f32 to vector<16x16xf32>
    %272 = arith.mulf %271, %257 : vector<16x16xf32>
    %273 = arith.addf %205, %272 : vector<16x16xf32>
    %c0_34 = arith.constant 0 : index
    %c0_35 = arith.constant 0 : index
    %c2_36 = arith.constant 2 : index
    %c1_37 = arith.constant 1 : index
    %274 = vector.load %arg3[%c0_34, %c0_35, %c2_36, %c1_37] : memref<1x4x18x18xf32, #tpu.memory_space<vmem>>, vector<1x1x16x16xf32>
    %275 = vector.shape_cast %274 : vector<1x1x16x16xf32> to vector<16x16xf32>
    %c176 = arith.constant 176 : index
    %276 = memref.load %arg1[%c176] : memref<256xf32, #tpu.memory_space<smem>>
    %277 = vector.broadcast %276 : f32 to vector<16x16xf32>
    %278 = arith.mulf %277, %275 : vector<16x16xf32>
    %279 = arith.addf %261, %278 : vector<16x16xf32>
    %c180 = arith.constant 180 : index
    %280 = memref.load %arg1[%c180] : memref<256xf32, #tpu.memory_space<smem>>
    %281 = vector.broadcast %280 : f32 to vector<16x16xf32>
    %282 = arith.mulf %281, %275 : vector<16x16xf32>
    %283 = arith.addf %265, %282 : vector<16x16xf32>
    %c184 = arith.constant 184 : index
    %284 = memref.load %arg1[%c184] : memref<256xf32, #tpu.memory_space<smem>>
    %285 = vector.broadcast %284 : f32 to vector<16x16xf32>
    %286 = arith.mulf %285, %275 : vector<16x16xf32>
    %287 = arith.addf %269, %286 : vector<16x16xf32>
    %c188 = arith.constant 188 : index
    %288 = memref.load %arg1[%c188] : memref<256xf32, #tpu.memory_space<smem>>
    %289 = vector.broadcast %288 : f32 to vector<16x16xf32>
    %290 = arith.mulf %289, %275 : vector<16x16xf32>
    %291 = arith.addf %273, %290 : vector<16x16xf32>
    %c224 = arith.constant 224 : index
    %292 = memref.load %arg1[%c224] : memref<256xf32, #tpu.memory_space<smem>>
    %293 = vector.broadcast %292 : f32 to vector<16x16xf32>
    %294 = arith.mulf %293, %275 : vector<16x16xf32>
    %295 = arith.addf %243, %294 : vector<16x16xf32>
    %c228 = arith.constant 228 : index
    %296 = memref.load %arg1[%c228] : memref<256xf32, #tpu.memory_space<smem>>
    %297 = vector.broadcast %296 : f32 to vector<16x16xf32>
    %298 = arith.mulf %297, %275 : vector<16x16xf32>
    %299 = arith.addf %247, %298 : vector<16x16xf32>
    %c232 = arith.constant 232 : index
    %300 = memref.load %arg1[%c232] : memref<256xf32, #tpu.memory_space<smem>>
    %301 = vector.broadcast %300 : f32 to vector<16x16xf32>
    %302 = arith.mulf %301, %275 : vector<16x16xf32>
    %303 = arith.addf %251, %302 : vector<16x16xf32>
    %c236 = arith.constant 236 : index
    %304 = memref.load %arg1[%c236] : memref<256xf32, #tpu.memory_space<smem>>
    %305 = vector.broadcast %304 : f32 to vector<16x16xf32>
    %306 = arith.mulf %305, %275 : vector<16x16xf32>
    %307 = arith.addf %255, %306 : vector<16x16xf32>
    %c0_38 = arith.constant 0 : index
    %c0_39 = arith.constant 0 : index
    %c2_40 = arith.constant 2 : index
    %c2_41 = arith.constant 2 : index
    %308 = vector.load %arg3[%c0_38, %c0_39, %c2_40, %c2_41] : memref<1x4x18x18xf32, #tpu.memory_space<vmem>>, vector<1x1x16x16xf32>
    %309 = vector.shape_cast %308 : vector<1x1x16x16xf32> to vector<16x16xf32>
    %c240 = arith.constant 240 : index
    %310 = memref.load %arg1[%c240] : memref<256xf32, #tpu.memory_space<smem>>
    %311 = vector.broadcast %310 : f32 to vector<16x16xf32>
    %312 = arith.mulf %311, %309 : vector<16x16xf32>
    %313 = arith.addf %295, %312 : vector<16x16xf32>
    %c244 = arith.constant 244 : index
    %314 = memref.load %arg1[%c244] : memref<256xf32, #tpu.memory_space<smem>>
    %315 = vector.broadcast %314 : f32 to vector<16x16xf32>
    %316 = arith.mulf %315, %309 : vector<16x16xf32>
    %317 = arith.addf %299, %316 : vector<16x16xf32>
    %c248 = arith.constant 248 : index
    %318 = memref.load %arg1[%c248] : memref<256xf32, #tpu.memory_space<smem>>
    %319 = vector.broadcast %318 : f32 to vector<16x16xf32>
    %320 = arith.mulf %319, %309 : vector<16x16xf32>
    %321 = arith.addf %303, %320 : vector<16x16xf32>
    %c252 = arith.constant 252 : index
    %322 = memref.load %arg1[%c252] : memref<256xf32, #tpu.memory_space<smem>>
    %323 = vector.broadcast %322 : f32 to vector<16x16xf32>
    %324 = arith.mulf %323, %309 : vector<16x16xf32>
    %325 = arith.addf %307, %324 : vector<16x16xf32>
    %c0_42 = arith.constant 0 : index
    %c1_43 = arith.constant 1 : index
    %c0_44 = arith.constant 0 : index
    %c0_45 = arith.constant 0 : index
    %326 = vector.load %arg3[%c0_42, %c1_43, %c0_44, %c0_45] : memref<1x4x18x18xf32, #tpu.memory_space<vmem>>, vector<1x1x16x16xf32>
    %327 = vector.shape_cast %326 : vector<1x1x16x16xf32> to vector<16x16xf32>
    %c1_46 = arith.constant 1 : index
    %328 = memref.load %arg1[%c1_46] : memref<256xf32, #tpu.memory_space<smem>>
    %329 = vector.broadcast %328 : f32 to vector<16x16xf32>
    %330 = arith.mulf %329, %327 : vector<16x16xf32>
    %331 = arith.addf %161, %330 : vector<16x16xf32>
    %c5 = arith.constant 5 : index
    %332 = memref.load %arg1[%c5] : memref<256xf32, #tpu.memory_space<smem>>
    %333 = vector.broadcast %332 : f32 to vector<16x16xf32>
    %334 = arith.mulf %333, %327 : vector<16x16xf32>
    %335 = arith.addf %165, %334 : vector<16x16xf32>
    %c9 = arith.constant 9 : index
    %336 = memref.load %arg1[%c9] : memref<256xf32, #tpu.memory_space<smem>>
    %337 = vector.broadcast %336 : f32 to vector<16x16xf32>
    %338 = arith.mulf %337, %327 : vector<16x16xf32>
    %339 = arith.addf %169, %338 : vector<16x16xf32>
    %c13 = arith.constant 13 : index
    %340 = memref.load %arg1[%c13] : memref<256xf32, #tpu.memory_space<smem>>
    %341 = vector.broadcast %340 : f32 to vector<16x16xf32>
    %342 = arith.mulf %341, %327 : vector<16x16xf32>
    %343 = arith.addf %173, %342 : vector<16x16xf32>
    %c0_47 = arith.constant 0 : index
    %c1_48 = arith.constant 1 : index
    %c0_49 = arith.constant 0 : index
    %c1_50 = arith.constant 1 : index
    %344 = vector.load %arg3[%c0_47, %c1_48, %c0_49, %c1_50] : memref<1x4x18x18xf32, #tpu.memory_space<vmem>>, vector<1x1x16x16xf32>
    %345 = vector.shape_cast %344 : vector<1x1x16x16xf32> to vector<16x16xf32>
    %c17 = arith.constant 17 : index
    %346 = memref.load %arg1[%c17] : memref<256xf32, #tpu.memory_space<smem>>
    %347 = vector.broadcast %346 : f32 to vector<16x16xf32>
    %348 = arith.mulf %347, %345 : vector<16x16xf32>
    %349 = arith.addf %331, %348 : vector<16x16xf32>
    %c21 = arith.constant 21 : index
    %350 = memref.load %arg1[%c21] : memref<256xf32, #tpu.memory_space<smem>>
    %351 = vector.broadcast %350 : f32 to vector<16x16xf32>
    %352 = arith.mulf %351, %345 : vector<16x16xf32>
    %353 = arith.addf %335, %352 : vector<16x16xf32>
    %c25 = arith.constant 25 : index
    %354 = memref.load %arg1[%c25] : memref<256xf32, #tpu.memory_space<smem>>
    %355 = vector.broadcast %354 : f32 to vector<16x16xf32>
    %356 = arith.mulf %355, %345 : vector<16x16xf32>
    %357 = arith.addf %339, %356 : vector<16x16xf32>
    %c29 = arith.constant 29 : index
    %358 = memref.load %arg1[%c29] : memref<256xf32, #tpu.memory_space<smem>>
    %359 = vector.broadcast %358 : f32 to vector<16x16xf32>
    %360 = arith.mulf %359, %345 : vector<16x16xf32>
    %361 = arith.addf %343, %360 : vector<16x16xf32>
    %c65 = arith.constant 65 : index
    %362 = memref.load %arg1[%c65] : memref<256xf32, #tpu.memory_space<smem>>
    %363 = vector.broadcast %362 : f32 to vector<16x16xf32>
    %364 = arith.mulf %363, %345 : vector<16x16xf32>
    %365 = arith.addf %227, %364 : vector<16x16xf32>
    %c69 = arith.constant 69 : index
    %366 = memref.load %arg1[%c69] : memref<256xf32, #tpu.memory_space<smem>>
    %367 = vector.broadcast %366 : f32 to vector<16x16xf32>
    %368 = arith.mulf %367, %345 : vector<16x16xf32>
    %369 = arith.addf %231, %368 : vector<16x16xf32>
    %c73 = arith.constant 73 : index
    %370 = memref.load %arg1[%c73] : memref<256xf32, #tpu.memory_space<smem>>
    %371 = vector.broadcast %370 : f32 to vector<16x16xf32>
    %372 = arith.mulf %371, %345 : vector<16x16xf32>
    %373 = arith.addf %235, %372 : vector<16x16xf32>
    %c77 = arith.constant 77 : index
    %374 = memref.load %arg1[%c77] : memref<256xf32, #tpu.memory_space<smem>>
    %375 = vector.broadcast %374 : f32 to vector<16x16xf32>
    %376 = arith.mulf %375, %345 : vector<16x16xf32>
    %377 = arith.addf %239, %376 : vector<16x16xf32>
    %c0_51 = arith.constant 0 : index
    %c1_52 = arith.constant 1 : index
    %c0_53 = arith.constant 0 : index
    %c2_54 = arith.constant 2 : index
    %378 = vector.load %arg3[%c0_51, %c1_52, %c0_53, %c2_54] : memref<1x4x18x18xf32, #tpu.memory_space<vmem>>, vector<1x1x16x16xf32>
    %379 = vector.shape_cast %378 : vector<1x1x16x16xf32> to vector<16x16xf32>
    %c81 = arith.constant 81 : index
    %380 = memref.load %arg1[%c81] : memref<256xf32, #tpu.memory_space<smem>>
    %381 = vector.broadcast %380 : f32 to vector<16x16xf32>
    %382 = arith.mulf %381, %379 : vector<16x16xf32>
    %383 = arith.addf %365, %382 : vector<16x16xf32>
    %c85 = arith.constant 85 : index
    %384 = memref.load %arg1[%c85] : memref<256xf32, #tpu.memory_space<smem>>
    %385 = vector.broadcast %384 : f32 to vector<16x16xf32>
    %386 = arith.mulf %385, %379 : vector<16x16xf32>
    %387 = arith.addf %369, %386 : vector<16x16xf32>
    %c89 = arith.constant 89 : index
    %388 = memref.load %arg1[%c89] : memref<256xf32, #tpu.memory_space<smem>>
    %389 = vector.broadcast %388 : f32 to vector<16x16xf32>
    %390 = arith.mulf %389, %379 : vector<16x16xf32>
    %391 = arith.addf %373, %390 : vector<16x16xf32>
    %c93 = arith.constant 93 : index
    %392 = memref.load %arg1[%c93] : memref<256xf32, #tpu.memory_space<smem>>
    %393 = vector.broadcast %392 : f32 to vector<16x16xf32>
    %394 = arith.mulf %393, %379 : vector<16x16xf32>
    %395 = arith.addf %377, %394 : vector<16x16xf32>
    %c0_55 = arith.constant 0 : index
    %c1_56 = arith.constant 1 : index
    %c1_57 = arith.constant 1 : index
    %c0_58 = arith.constant 0 : index
    %396 = vector.load %arg3[%c0_55, %c1_56, %c1_57, %c0_58] : memref<1x4x18x18xf32, #tpu.memory_space<vmem>>, vector<1x1x16x16xf32>
    %397 = vector.shape_cast %396 : vector<1x1x16x16xf32> to vector<16x16xf32>
    %c33 = arith.constant 33 : index
    %398 = memref.load %arg1[%c33] : memref<256xf32, #tpu.memory_space<smem>>
    %399 = vector.broadcast %398 : f32 to vector<16x16xf32>
    %400 = arith.mulf %399, %397 : vector<16x16xf32>
    %401 = arith.addf %349, %400 : vector<16x16xf32>
    %c37 = arith.constant 37 : index
    %402 = memref.load %arg1[%c37] : memref<256xf32, #tpu.memory_space<smem>>
    %403 = vector.broadcast %402 : f32 to vector<16x16xf32>
    %404 = arith.mulf %403, %397 : vector<16x16xf32>
    %405 = arith.addf %353, %404 : vector<16x16xf32>
    %c41 = arith.constant 41 : index
    %406 = memref.load %arg1[%c41] : memref<256xf32, #tpu.memory_space<smem>>
    %407 = vector.broadcast %406 : f32 to vector<16x16xf32>
    %408 = arith.mulf %407, %397 : vector<16x16xf32>
    %409 = arith.addf %357, %408 : vector<16x16xf32>
    %c45 = arith.constant 45 : index
    %410 = memref.load %arg1[%c45] : memref<256xf32, #tpu.memory_space<smem>>
    %411 = vector.broadcast %410 : f32 to vector<16x16xf32>
    %412 = arith.mulf %411, %397 : vector<16x16xf32>
    %413 = arith.addf %361, %412 : vector<16x16xf32>
    %c129 = arith.constant 129 : index
    %414 = memref.load %arg1[%c129] : memref<256xf32, #tpu.memory_space<smem>>
    %415 = vector.broadcast %414 : f32 to vector<16x16xf32>
    %416 = arith.mulf %415, %397 : vector<16x16xf32>
    %417 = arith.addf %279, %416 : vector<16x16xf32>
    %c133 = arith.constant 133 : index
    %418 = memref.load %arg1[%c133] : memref<256xf32, #tpu.memory_space<smem>>
    %419 = vector.broadcast %418 : f32 to vector<16x16xf32>
    %420 = arith.mulf %419, %397 : vector<16x16xf32>
    %421 = arith.addf %283, %420 : vector<16x16xf32>
    %c137 = arith.constant 137 : index
    %422 = memref.load %arg1[%c137] : memref<256xf32, #tpu.memory_space<smem>>
    %423 = vector.broadcast %422 : f32 to vector<16x16xf32>
    %424 = arith.mulf %423, %397 : vector<16x16xf32>
    %425 = arith.addf %287, %424 : vector<16x16xf32>
    %c141 = arith.constant 141 : index
    %426 = memref.load %arg1[%c141] : memref<256xf32, #tpu.memory_space<smem>>
    %427 = vector.broadcast %426 : f32 to vector<16x16xf32>
    %428 = arith.mulf %427, %397 : vector<16x16xf32>
    %429 = arith.addf %291, %428 : vector<16x16xf32>
    %c0_59 = arith.constant 0 : index
    %c1_60 = arith.constant 1 : index
    %c1_61 = arith.constant 1 : index
    %c1_62 = arith.constant 1 : index
    %430 = vector.load %arg3[%c0_59, %c1_60, %c1_61, %c1_62] : memref<1x4x18x18xf32, #tpu.memory_space<vmem>>, vector<1x1x16x16xf32>
    %431 = vector.shape_cast %430 : vector<1x1x16x16xf32> to vector<16x16xf32>
    %c49 = arith.constant 49 : index
    %432 = memref.load %arg1[%c49] : memref<256xf32, #tpu.memory_space<smem>>
    %433 = vector.broadcast %432 : f32 to vector<16x16xf32>
    %434 = arith.mulf %433, %431 : vector<16x16xf32>
    %435 = arith.addf %401, %434 : vector<16x16xf32>
    %c53 = arith.constant 53 : index
    %436 = memref.load %arg1[%c53] : memref<256xf32, #tpu.memory_space<smem>>
    %437 = vector.broadcast %436 : f32 to vector<16x16xf32>
    %438 = arith.mulf %437, %431 : vector<16x16xf32>
    %439 = arith.addf %405, %438 : vector<16x16xf32>
    %c57 = arith.constant 57 : index
    %440 = memref.load %arg1[%c57] : memref<256xf32, #tpu.memory_space<smem>>
    %441 = vector.broadcast %440 : f32 to vector<16x16xf32>
    %442 = arith.mulf %441, %431 : vector<16x16xf32>
    %443 = arith.addf %409, %442 : vector<16x16xf32>
    %c61 = arith.constant 61 : index
    %444 = memref.load %arg1[%c61] : memref<256xf32, #tpu.memory_space<smem>>
    %445 = vector.broadcast %444 : f32 to vector<16x16xf32>
    %446 = arith.mulf %445, %431 : vector<16x16xf32>
    %447 = arith.addf %413, %446 : vector<16x16xf32>
    %c97 = arith.constant 97 : index
    %448 = memref.load %arg1[%c97] : memref<256xf32, #tpu.memory_space<smem>>
    %449 = vector.broadcast %448 : f32 to vector<16x16xf32>
    %450 = arith.mulf %449, %431 : vector<16x16xf32>
    %451 = arith.addf %383, %450 : vector<16x16xf32>
    %c101 = arith.constant 101 : index
    %452 = memref.load %arg1[%c101] : memref<256xf32, #tpu.memory_space<smem>>
    %453 = vector.broadcast %452 : f32 to vector<16x16xf32>
    %454 = arith.mulf %453, %431 : vector<16x16xf32>
    %455 = arith.addf %387, %454 : vector<16x16xf32>
    %c105 = arith.constant 105 : index
    %456 = memref.load %arg1[%c105] : memref<256xf32, #tpu.memory_space<smem>>
    %457 = vector.broadcast %456 : f32 to vector<16x16xf32>
    %458 = arith.mulf %457, %431 : vector<16x16xf32>
    %459 = arith.addf %391, %458 : vector<16x16xf32>
    %c109 = arith.constant 109 : index
    %460 = memref.load %arg1[%c109] : memref<256xf32, #tpu.memory_space<smem>>
    %461 = vector.broadcast %460 : f32 to vector<16x16xf32>
    %462 = arith.mulf %461, %431 : vector<16x16xf32>
    %463 = arith.addf %395, %462 : vector<16x16xf32>
    %c145 = arith.constant 145 : index
    %464 = memref.load %arg1[%c145] : memref<256xf32, #tpu.memory_space<smem>>
    %465 = vector.broadcast %464 : f32 to vector<16x16xf32>
    %466 = arith.mulf %465, %431 : vector<16x16xf32>
    %467 = arith.addf %417, %466 : vector<16x16xf32>
    %c149 = arith.constant 149 : index
    %468 = memref.load %arg1[%c149] : memref<256xf32, #tpu.memory_space<smem>>
    %469 = vector.broadcast %468 : f32 to vector<16x16xf32>
    %470 = arith.mulf %469, %431 : vector<16x16xf32>
    %471 = arith.addf %421, %470 : vector<16x16xf32>
    %c153 = arith.constant 153 : index
    %472 = memref.load %arg1[%c153] : memref<256xf32, #tpu.memory_space<smem>>
    %473 = vector.broadcast %472 : f32 to vector<16x16xf32>
    %474 = arith.mulf %473, %431 : vector<16x16xf32>
    %475 = arith.addf %425, %474 : vector<16x16xf32>
    %c157 = arith.constant 157 : index
    %476 = memref.load %arg1[%c157] : memref<256xf32, #tpu.memory_space<smem>>
    %477 = vector.broadcast %476 : f32 to vector<16x16xf32>
    %478 = arith.mulf %477, %431 : vector<16x16xf32>
    %479 = arith.addf %429, %478 : vector<16x16xf32>
    %c193 = arith.constant 193 : index
    %480 = memref.load %arg1[%c193] : memref<256xf32, #tpu.memory_space<smem>>
    %481 = vector.broadcast %480 : f32 to vector<16x16xf32>
    %482 = arith.mulf %481, %431 : vector<16x16xf32>
    %483 = arith.addf %313, %482 : vector<16x16xf32>
    %c197 = arith.constant 197 : index
    %484 = memref.load %arg1[%c197] : memref<256xf32, #tpu.memory_space<smem>>
    %485 = vector.broadcast %484 : f32 to vector<16x16xf32>
    %486 = arith.mulf %485, %431 : vector<16x16xf32>
    %487 = arith.addf %317, %486 : vector<16x16xf32>
    %c201 = arith.constant 201 : index
    %488 = memref.load %arg1[%c201] : memref<256xf32, #tpu.memory_space<smem>>
    %489 = vector.broadcast %488 : f32 to vector<16x16xf32>
    %490 = arith.mulf %489, %431 : vector<16x16xf32>
    %491 = arith.addf %321, %490 : vector<16x16xf32>
    %c205 = arith.constant 205 : index
    %492 = memref.load %arg1[%c205] : memref<256xf32, #tpu.memory_space<smem>>
    %493 = vector.broadcast %492 : f32 to vector<16x16xf32>
    %494 = arith.mulf %493, %431 : vector<16x16xf32>
    %495 = arith.addf %325, %494 : vector<16x16xf32>
    %c0_63 = arith.constant 0 : index
    %c1_64 = arith.constant 1 : index
    %c1_65 = arith.constant 1 : index
    %c2_66 = arith.constant 2 : index
    %496 = vector.load %arg3[%c0_63, %c1_64, %c1_65, %c2_66] : memref<1x4x18x18xf32, #tpu.memory_space<vmem>>, vector<1x1x16x16xf32>
    %497 = vector.shape_cast %496 : vector<1x1x16x16xf32> to vector<16x16xf32>
    %c113 = arith.constant 113 : index
    %498 = memref.load %arg1[%c113] : memref<256xf32, #tpu.memory_space<smem>>
    %499 = vector.broadcast %498 : f32 to vector<16x16xf32>
    %500 = arith.mulf %499, %497 : vector<16x16xf32>
    %501 = arith.addf %451, %500 : vector<16x16xf32>
    %c117 = arith.constant 117 : index
    %502 = memref.load %arg1[%c117] : memref<256xf32, #tpu.memory_space<smem>>
    %503 = vector.broadcast %502 : f32 to vector<16x16xf32>
    %504 = arith.mulf %503, %497 : vector<16x16xf32>
    %505 = arith.addf %455, %504 : vector<16x16xf32>
    %c121 = arith.constant 121 : index
    %506 = memref.load %arg1[%c121] : memref<256xf32, #tpu.memory_space<smem>>
    %507 = vector.broadcast %506 : f32 to vector<16x16xf32>
    %508 = arith.mulf %507, %497 : vector<16x16xf32>
    %509 = arith.addf %459, %508 : vector<16x16xf32>
    %c125 = arith.constant 125 : index
    %510 = memref.load %arg1[%c125] : memref<256xf32, #tpu.memory_space<smem>>
    %511 = vector.broadcast %510 : f32 to vector<16x16xf32>
    %512 = arith.mulf %511, %497 : vector<16x16xf32>
    %513 = arith.addf %463, %512 : vector<16x16xf32>
    %c209 = arith.constant 209 : index
    %514 = memref.load %arg1[%c209] : memref<256xf32, #tpu.memory_space<smem>>
    %515 = vector.broadcast %514 : f32 to vector<16x16xf32>
    %516 = arith.mulf %515, %497 : vector<16x16xf32>
    %517 = arith.addf %483, %516 : vector<16x16xf32>
    %c213 = arith.constant 213 : index
    %518 = memref.load %arg1[%c213] : memref<256xf32, #tpu.memory_space<smem>>
    %519 = vector.broadcast %518 : f32 to vector<16x16xf32>
    %520 = arith.mulf %519, %497 : vector<16x16xf32>
    %521 = arith.addf %487, %520 : vector<16x16xf32>
    %c217 = arith.constant 217 : index
    %522 = memref.load %arg1[%c217] : memref<256xf32, #tpu.memory_space<smem>>
    %523 = vector.broadcast %522 : f32 to vector<16x16xf32>
    %524 = arith.mulf %523, %497 : vector<16x16xf32>
    %525 = arith.addf %491, %524 : vector<16x16xf32>
    %c221 = arith.constant 221 : index
    %526 = memref.load %arg1[%c221] : memref<256xf32, #tpu.memory_space<smem>>
    %527 = vector.broadcast %526 : f32 to vector<16x16xf32>
    %528 = arith.mulf %527, %497 : vector<16x16xf32>
    %529 = arith.addf %495, %528 : vector<16x16xf32>
    %c0_67 = arith.constant 0 : index
    %c1_68 = arith.constant 1 : index
    %c2_69 = arith.constant 2 : index
    %c0_70 = arith.constant 0 : index
    %530 = vector.load %arg3[%c0_67, %c1_68, %c2_69, %c0_70] : memref<1x4x18x18xf32, #tpu.memory_space<vmem>>, vector<1x1x16x16xf32>
    %531 = vector.shape_cast %530 : vector<1x1x16x16xf32> to vector<16x16xf32>
    %c161 = arith.constant 161 : index
    %532 = memref.load %arg1[%c161] : memref<256xf32, #tpu.memory_space<smem>>
    %533 = vector.broadcast %532 : f32 to vector<16x16xf32>
    %534 = arith.mulf %533, %531 : vector<16x16xf32>
    %535 = arith.addf %467, %534 : vector<16x16xf32>
    %c165 = arith.constant 165 : index
    %536 = memref.load %arg1[%c165] : memref<256xf32, #tpu.memory_space<smem>>
    %537 = vector.broadcast %536 : f32 to vector<16x16xf32>
    %538 = arith.mulf %537, %531 : vector<16x16xf32>
    %539 = arith.addf %471, %538 : vector<16x16xf32>
    %c169 = arith.constant 169 : index
    %540 = memref.load %arg1[%c169] : memref<256xf32, #tpu.memory_space<smem>>
    %541 = vector.broadcast %540 : f32 to vector<16x16xf32>
    %542 = arith.mulf %541, %531 : vector<16x16xf32>
    %543 = arith.addf %475, %542 : vector<16x16xf32>
    %c173 = arith.constant 173 : index
    %544 = memref.load %arg1[%c173] : memref<256xf32, #tpu.memory_space<smem>>
    %545 = vector.broadcast %544 : f32 to vector<16x16xf32>
    %546 = arith.mulf %545, %531 : vector<16x16xf32>
    %547 = arith.addf %479, %546 : vector<16x16xf32>
    %c0_71 = arith.constant 0 : index
    %c1_72 = arith.constant 1 : index
    %c2_73 = arith.constant 2 : index
    %c1_74 = arith.constant 1 : index
    %548 = vector.load %arg3[%c0_71, %c1_72, %c2_73, %c1_74] : memref<1x4x18x18xf32, #tpu.memory_space<vmem>>, vector<1x1x16x16xf32>
    %549 = vector.shape_cast %548 : vector<1x1x16x16xf32> to vector<16x16xf32>
    %c177 = arith.constant 177 : index
    %550 = memref.load %arg1[%c177] : memref<256xf32, #tpu.memory_space<smem>>
    %551 = vector.broadcast %550 : f32 to vector<16x16xf32>
    %552 = arith.mulf %551, %549 : vector<16x16xf32>
    %553 = arith.addf %535, %552 : vector<16x16xf32>
    %c181 = arith.constant 181 : index
    %554 = memref.load %arg1[%c181] : memref<256xf32, #tpu.memory_space<smem>>
    %555 = vector.broadcast %554 : f32 to vector<16x16xf32>
    %556 = arith.mulf %555, %549 : vector<16x16xf32>
    %557 = arith.addf %539, %556 : vector<16x16xf32>
    %c185 = arith.constant 185 : index
    %558 = memref.load %arg1[%c185] : memref<256xf32, #tpu.memory_space<smem>>
    %559 = vector.broadcast %558 : f32 to vector<16x16xf32>
    %560 = arith.mulf %559, %549 : vector<16x16xf32>
    %561 = arith.addf %543, %560 : vector<16x16xf32>
    %c189 = arith.constant 189 : index
    %562 = memref.load %arg1[%c189] : memref<256xf32, #tpu.memory_space<smem>>
    %563 = vector.broadcast %562 : f32 to vector<16x16xf32>
    %564 = arith.mulf %563, %549 : vector<16x16xf32>
    %565 = arith.addf %547, %564 : vector<16x16xf32>
    %c225 = arith.constant 225 : index
    %566 = memref.load %arg1[%c225] : memref<256xf32, #tpu.memory_space<smem>>
    %567 = vector.broadcast %566 : f32 to vector<16x16xf32>
    %568 = arith.mulf %567, %549 : vector<16x16xf32>
    %569 = arith.addf %517, %568 : vector<16x16xf32>
    %c229 = arith.constant 229 : index
    %570 = memref.load %arg1[%c229] : memref<256xf32, #tpu.memory_space<smem>>
    %571 = vector.broadcast %570 : f32 to vector<16x16xf32>
    %572 = arith.mulf %571, %549 : vector<16x16xf32>
    %573 = arith.addf %521, %572 : vector<16x16xf32>
    %c233 = arith.constant 233 : index
    %574 = memref.load %arg1[%c233] : memref<256xf32, #tpu.memory_space<smem>>
    %575 = vector.broadcast %574 : f32 to vector<16x16xf32>
    %576 = arith.mulf %575, %549 : vector<16x16xf32>
    %577 = arith.addf %525, %576 : vector<16x16xf32>
    %c237 = arith.constant 237 : index
    %578 = memref.load %arg1[%c237] : memref<256xf32, #tpu.memory_space<smem>>
    %579 = vector.broadcast %578 : f32 to vector<16x16xf32>
    %580 = arith.mulf %579, %549 : vector<16x16xf32>
    %581 = arith.addf %529, %580 : vector<16x16xf32>
    %c0_75 = arith.constant 0 : index
    %c1_76 = arith.constant 1 : index
    %c2_77 = arith.constant 2 : index
    %c2_78 = arith.constant 2 : index
    %582 = vector.load %arg3[%c0_75, %c1_76, %c2_77, %c2_78] : memref<1x4x18x18xf32, #tpu.memory_space<vmem>>, vector<1x1x16x16xf32>
    %583 = vector.shape_cast %582 : vector<1x1x16x16xf32> to vector<16x16xf32>
    %c241 = arith.constant 241 : index
    %584 = memref.load %arg1[%c241] : memref<256xf32, #tpu.memory_space<smem>>
    %585 = vector.broadcast %584 : f32 to vector<16x16xf32>
    %586 = arith.mulf %585, %583 : vector<16x16xf32>
    %587 = arith.addf %569, %586 : vector<16x16xf32>
    %c245 = arith.constant 245 : index
    %588 = memref.load %arg1[%c245] : memref<256xf32, #tpu.memory_space<smem>>
    %589 = vector.broadcast %588 : f32 to vector<16x16xf32>
    %590 = arith.mulf %589, %583 : vector<16x16xf32>
    %591 = arith.addf %573, %590 : vector<16x16xf32>
    %c249 = arith.constant 249 : index
    %592 = memref.load %arg1[%c249] : memref<256xf32, #tpu.memory_space<smem>>
    %593 = vector.broadcast %592 : f32 to vector<16x16xf32>
    %594 = arith.mulf %593, %583 : vector<16x16xf32>
    %595 = arith.addf %577, %594 : vector<16x16xf32>
    %c253 = arith.constant 253 : index
    %596 = memref.load %arg1[%c253] : memref<256xf32, #tpu.memory_space<smem>>
    %597 = vector.broadcast %596 : f32 to vector<16x16xf32>
    %598 = arith.mulf %597, %583 : vector<16x16xf32>
    %599 = arith.addf %581, %598 : vector<16x16xf32>
    %c0_79 = arith.constant 0 : index
    %c2_80 = arith.constant 2 : index
    %c0_81 = arith.constant 0 : index
    %c0_82 = arith.constant 0 : index
    %600 = vector.load %arg3[%c0_79, %c2_80, %c0_81, %c0_82] : memref<1x4x18x18xf32, #tpu.memory_space<vmem>>, vector<1x1x16x16xf32>
    %601 = vector.shape_cast %600 : vector<1x1x16x16xf32> to vector<16x16xf32>
    %c2_83 = arith.constant 2 : index
    %602 = memref.load %arg1[%c2_83] : memref<256xf32, #tpu.memory_space<smem>>
    %603 = vector.broadcast %602 : f32 to vector<16x16xf32>
    %604 = arith.mulf %603, %601 : vector<16x16xf32>
    %605 = arith.addf %435, %604 : vector<16x16xf32>
    %c6 = arith.constant 6 : index
    %606 = memref.load %arg1[%c6] : memref<256xf32, #tpu.memory_space<smem>>
    %607 = vector.broadcast %606 : f32 to vector<16x16xf32>
    %608 = arith.mulf %607, %601 : vector<16x16xf32>
    %609 = arith.addf %439, %608 : vector<16x16xf32>
    %c10 = arith.constant 10 : index
    %610 = memref.load %arg1[%c10] : memref<256xf32, #tpu.memory_space<smem>>
    %611 = vector.broadcast %610 : f32 to vector<16x16xf32>
    %612 = arith.mulf %611, %601 : vector<16x16xf32>
    %613 = arith.addf %443, %612 : vector<16x16xf32>
    %c14 = arith.constant 14 : index
    %614 = memref.load %arg1[%c14] : memref<256xf32, #tpu.memory_space<smem>>
    %615 = vector.broadcast %614 : f32 to vector<16x16xf32>
    %616 = arith.mulf %615, %601 : vector<16x16xf32>
    %617 = arith.addf %447, %616 : vector<16x16xf32>
    %c0_84 = arith.constant 0 : index
    %c2_85 = arith.constant 2 : index
    %c0_86 = arith.constant 0 : index
    %c1_87 = arith.constant 1 : index
    %618 = vector.load %arg3[%c0_84, %c2_85, %c0_86, %c1_87] : memref<1x4x18x18xf32, #tpu.memory_space<vmem>>, vector<1x1x16x16xf32>
    %619 = vector.shape_cast %618 : vector<1x1x16x16xf32> to vector<16x16xf32>
    %c18 = arith.constant 18 : index
    %620 = memref.load %arg1[%c18] : memref<256xf32, #tpu.memory_space<smem>>
    %621 = vector.broadcast %620 : f32 to vector<16x16xf32>
    %622 = arith.mulf %621, %619 : vector<16x16xf32>
    %623 = arith.addf %605, %622 : vector<16x16xf32>
    %c22 = arith.constant 22 : index
    %624 = memref.load %arg1[%c22] : memref<256xf32, #tpu.memory_space<smem>>
    %625 = vector.broadcast %624 : f32 to vector<16x16xf32>
    %626 = arith.mulf %625, %619 : vector<16x16xf32>
    %627 = arith.addf %609, %626 : vector<16x16xf32>
    %c26 = arith.constant 26 : index
    %628 = memref.load %arg1[%c26] : memref<256xf32, #tpu.memory_space<smem>>
    %629 = vector.broadcast %628 : f32 to vector<16x16xf32>
    %630 = arith.mulf %629, %619 : vector<16x16xf32>
    %631 = arith.addf %613, %630 : vector<16x16xf32>
    %c30 = arith.constant 30 : index
    %632 = memref.load %arg1[%c30] : memref<256xf32, #tpu.memory_space<smem>>
    %633 = vector.broadcast %632 : f32 to vector<16x16xf32>
    %634 = arith.mulf %633, %619 : vector<16x16xf32>
    %635 = arith.addf %617, %634 : vector<16x16xf32>
    %c66 = arith.constant 66 : index
    %636 = memref.load %arg1[%c66] : memref<256xf32, #tpu.memory_space<smem>>
    %637 = vector.broadcast %636 : f32 to vector<16x16xf32>
    %638 = arith.mulf %637, %619 : vector<16x16xf32>
    %639 = arith.addf %501, %638 : vector<16x16xf32>
    %c70 = arith.constant 70 : index
    %640 = memref.load %arg1[%c70] : memref<256xf32, #tpu.memory_space<smem>>
    %641 = vector.broadcast %640 : f32 to vector<16x16xf32>
    %642 = arith.mulf %641, %619 : vector<16x16xf32>
    %643 = arith.addf %505, %642 : vector<16x16xf32>
    %c74 = arith.constant 74 : index
    %644 = memref.load %arg1[%c74] : memref<256xf32, #tpu.memory_space<smem>>
    %645 = vector.broadcast %644 : f32 to vector<16x16xf32>
    %646 = arith.mulf %645, %619 : vector<16x16xf32>
    %647 = arith.addf %509, %646 : vector<16x16xf32>
    %c78 = arith.constant 78 : index
    %648 = memref.load %arg1[%c78] : memref<256xf32, #tpu.memory_space<smem>>
    %649 = vector.broadcast %648 : f32 to vector<16x16xf32>
    %650 = arith.mulf %649, %619 : vector<16x16xf32>
    %651 = arith.addf %513, %650 : vector<16x16xf32>
    %c0_88 = arith.constant 0 : index
    %c2_89 = arith.constant 2 : index
    %c0_90 = arith.constant 0 : index
    %c2_91 = arith.constant 2 : index
    %652 = vector.load %arg3[%c0_88, %c2_89, %c0_90, %c2_91] : memref<1x4x18x18xf32, #tpu.memory_space<vmem>>, vector<1x1x16x16xf32>
    %653 = vector.shape_cast %652 : vector<1x1x16x16xf32> to vector<16x16xf32>
    %c82 = arith.constant 82 : index
    %654 = memref.load %arg1[%c82] : memref<256xf32, #tpu.memory_space<smem>>
    %655 = vector.broadcast %654 : f32 to vector<16x16xf32>
    %656 = arith.mulf %655, %653 : vector<16x16xf32>
    %657 = arith.addf %639, %656 : vector<16x16xf32>
    %c86 = arith.constant 86 : index
    %658 = memref.load %arg1[%c86] : memref<256xf32, #tpu.memory_space<smem>>
    %659 = vector.broadcast %658 : f32 to vector<16x16xf32>
    %660 = arith.mulf %659, %653 : vector<16x16xf32>
    %661 = arith.addf %643, %660 : vector<16x16xf32>
    %c90 = arith.constant 90 : index
    %662 = memref.load %arg1[%c90] : memref<256xf32, #tpu.memory_space<smem>>
    %663 = vector.broadcast %662 : f32 to vector<16x16xf32>
    %664 = arith.mulf %663, %653 : vector<16x16xf32>
    %665 = arith.addf %647, %664 : vector<16x16xf32>
    %c94 = arith.constant 94 : index
    %666 = memref.load %arg1[%c94] : memref<256xf32, #tpu.memory_space<smem>>
    %667 = vector.broadcast %666 : f32 to vector<16x16xf32>
    %668 = arith.mulf %667, %653 : vector<16x16xf32>
    %669 = arith.addf %651, %668 : vector<16x16xf32>
    %c0_92 = arith.constant 0 : index
    %c2_93 = arith.constant 2 : index
    %c1_94 = arith.constant 1 : index
    %c0_95 = arith.constant 0 : index
    %670 = vector.load %arg3[%c0_92, %c2_93, %c1_94, %c0_95] : memref<1x4x18x18xf32, #tpu.memory_space<vmem>>, vector<1x1x16x16xf32>
    %671 = vector.shape_cast %670 : vector<1x1x16x16xf32> to vector<16x16xf32>
    %c34 = arith.constant 34 : index
    %672 = memref.load %arg1[%c34] : memref<256xf32, #tpu.memory_space<smem>>
    %673 = vector.broadcast %672 : f32 to vector<16x16xf32>
    %674 = arith.mulf %673, %671 : vector<16x16xf32>
    %675 = arith.addf %623, %674 : vector<16x16xf32>
    %c38 = arith.constant 38 : index
    %676 = memref.load %arg1[%c38] : memref<256xf32, #tpu.memory_space<smem>>
    %677 = vector.broadcast %676 : f32 to vector<16x16xf32>
    %678 = arith.mulf %677, %671 : vector<16x16xf32>
    %679 = arith.addf %627, %678 : vector<16x16xf32>
    %c42 = arith.constant 42 : index
    %680 = memref.load %arg1[%c42] : memref<256xf32, #tpu.memory_space<smem>>
    %681 = vector.broadcast %680 : f32 to vector<16x16xf32>
    %682 = arith.mulf %681, %671 : vector<16x16xf32>
    %683 = arith.addf %631, %682 : vector<16x16xf32>
    %c46 = arith.constant 46 : index
    %684 = memref.load %arg1[%c46] : memref<256xf32, #tpu.memory_space<smem>>
    %685 = vector.broadcast %684 : f32 to vector<16x16xf32>
    %686 = arith.mulf %685, %671 : vector<16x16xf32>
    %687 = arith.addf %635, %686 : vector<16x16xf32>
    %c130 = arith.constant 130 : index
    %688 = memref.load %arg1[%c130] : memref<256xf32, #tpu.memory_space<smem>>
    %689 = vector.broadcast %688 : f32 to vector<16x16xf32>
    %690 = arith.mulf %689, %671 : vector<16x16xf32>
    %691 = arith.addf %553, %690 : vector<16x16xf32>
    %c134 = arith.constant 134 : index
    %692 = memref.load %arg1[%c134] : memref<256xf32, #tpu.memory_space<smem>>
    %693 = vector.broadcast %692 : f32 to vector<16x16xf32>
    %694 = arith.mulf %693, %671 : vector<16x16xf32>
    %695 = arith.addf %557, %694 : vector<16x16xf32>
    %c138 = arith.constant 138 : index
    %696 = memref.load %arg1[%c138] : memref<256xf32, #tpu.memory_space<smem>>
    %697 = vector.broadcast %696 : f32 to vector<16x16xf32>
    %698 = arith.mulf %697, %671 : vector<16x16xf32>
    %699 = arith.addf %561, %698 : vector<16x16xf32>
    %c142 = arith.constant 142 : index
    %700 = memref.load %arg1[%c142] : memref<256xf32, #tpu.memory_space<smem>>
    %701 = vector.broadcast %700 : f32 to vector<16x16xf32>
    %702 = arith.mulf %701, %671 : vector<16x16xf32>
    %703 = arith.addf %565, %702 : vector<16x16xf32>
    %c0_96 = arith.constant 0 : index
    %c2_97 = arith.constant 2 : index
    %c1_98 = arith.constant 1 : index
    %c1_99 = arith.constant 1 : index
    %704 = vector.load %arg3[%c0_96, %c2_97, %c1_98, %c1_99] : memref<1x4x18x18xf32, #tpu.memory_space<vmem>>, vector<1x1x16x16xf32>
    %705 = vector.shape_cast %704 : vector<1x1x16x16xf32> to vector<16x16xf32>
    %c50 = arith.constant 50 : index
    %706 = memref.load %arg1[%c50] : memref<256xf32, #tpu.memory_space<smem>>
    %707 = vector.broadcast %706 : f32 to vector<16x16xf32>
    %708 = arith.mulf %707, %705 : vector<16x16xf32>
    %709 = arith.addf %675, %708 : vector<16x16xf32>
    %c54 = arith.constant 54 : index
    %710 = memref.load %arg1[%c54] : memref<256xf32, #tpu.memory_space<smem>>
    %711 = vector.broadcast %710 : f32 to vector<16x16xf32>
    %712 = arith.mulf %711, %705 : vector<16x16xf32>
    %713 = arith.addf %679, %712 : vector<16x16xf32>
    %c58 = arith.constant 58 : index
    %714 = memref.load %arg1[%c58] : memref<256xf32, #tpu.memory_space<smem>>
    %715 = vector.broadcast %714 : f32 to vector<16x16xf32>
    %716 = arith.mulf %715, %705 : vector<16x16xf32>
    %717 = arith.addf %683, %716 : vector<16x16xf32>
    %c62 = arith.constant 62 : index
    %718 = memref.load %arg1[%c62] : memref<256xf32, #tpu.memory_space<smem>>
    %719 = vector.broadcast %718 : f32 to vector<16x16xf32>
    %720 = arith.mulf %719, %705 : vector<16x16xf32>
    %721 = arith.addf %687, %720 : vector<16x16xf32>
    %c98 = arith.constant 98 : index
    %722 = memref.load %arg1[%c98] : memref<256xf32, #tpu.memory_space<smem>>
    %723 = vector.broadcast %722 : f32 to vector<16x16xf32>
    %724 = arith.mulf %723, %705 : vector<16x16xf32>
    %725 = arith.addf %657, %724 : vector<16x16xf32>
    %c102 = arith.constant 102 : index
    %726 = memref.load %arg1[%c102] : memref<256xf32, #tpu.memory_space<smem>>
    %727 = vector.broadcast %726 : f32 to vector<16x16xf32>
    %728 = arith.mulf %727, %705 : vector<16x16xf32>
    %729 = arith.addf %661, %728 : vector<16x16xf32>
    %c106 = arith.constant 106 : index
    %730 = memref.load %arg1[%c106] : memref<256xf32, #tpu.memory_space<smem>>
    %731 = vector.broadcast %730 : f32 to vector<16x16xf32>
    %732 = arith.mulf %731, %705 : vector<16x16xf32>
    %733 = arith.addf %665, %732 : vector<16x16xf32>
    %c110 = arith.constant 110 : index
    %734 = memref.load %arg1[%c110] : memref<256xf32, #tpu.memory_space<smem>>
    %735 = vector.broadcast %734 : f32 to vector<16x16xf32>
    %736 = arith.mulf %735, %705 : vector<16x16xf32>
    %737 = arith.addf %669, %736 : vector<16x16xf32>
    %c146 = arith.constant 146 : index
    %738 = memref.load %arg1[%c146] : memref<256xf32, #tpu.memory_space<smem>>
    %739 = vector.broadcast %738 : f32 to vector<16x16xf32>
    %740 = arith.mulf %739, %705 : vector<16x16xf32>
    %741 = arith.addf %691, %740 : vector<16x16xf32>
    %c150 = arith.constant 150 : index
    %742 = memref.load %arg1[%c150] : memref<256xf32, #tpu.memory_space<smem>>
    %743 = vector.broadcast %742 : f32 to vector<16x16xf32>
    %744 = arith.mulf %743, %705 : vector<16x16xf32>
    %745 = arith.addf %695, %744 : vector<16x16xf32>
    %c154 = arith.constant 154 : index
    %746 = memref.load %arg1[%c154] : memref<256xf32, #tpu.memory_space<smem>>
    %747 = vector.broadcast %746 : f32 to vector<16x16xf32>
    %748 = arith.mulf %747, %705 : vector<16x16xf32>
    %749 = arith.addf %699, %748 : vector<16x16xf32>
    %c158 = arith.constant 158 : index
    %750 = memref.load %arg1[%c158] : memref<256xf32, #tpu.memory_space<smem>>
    %751 = vector.broadcast %750 : f32 to vector<16x16xf32>
    %752 = arith.mulf %751, %705 : vector<16x16xf32>
    %753 = arith.addf %703, %752 : vector<16x16xf32>
    %c194 = arith.constant 194 : index
    %754 = memref.load %arg1[%c194] : memref<256xf32, #tpu.memory_space<smem>>
    %755 = vector.broadcast %754 : f32 to vector<16x16xf32>
    %756 = arith.mulf %755, %705 : vector<16x16xf32>
    %757 = arith.addf %587, %756 : vector<16x16xf32>
    %c198 = arith.constant 198 : index
    %758 = memref.load %arg1[%c198] : memref<256xf32, #tpu.memory_space<smem>>
    %759 = vector.broadcast %758 : f32 to vector<16x16xf32>
    %760 = arith.mulf %759, %705 : vector<16x16xf32>
    %761 = arith.addf %591, %760 : vector<16x16xf32>
    %c202 = arith.constant 202 : index
    %762 = memref.load %arg1[%c202] : memref<256xf32, #tpu.memory_space<smem>>
    %763 = vector.broadcast %762 : f32 to vector<16x16xf32>
    %764 = arith.mulf %763, %705 : vector<16x16xf32>
    %765 = arith.addf %595, %764 : vector<16x16xf32>
    %c206 = arith.constant 206 : index
    %766 = memref.load %arg1[%c206] : memref<256xf32, #tpu.memory_space<smem>>
    %767 = vector.broadcast %766 : f32 to vector<16x16xf32>
    %768 = arith.mulf %767, %705 : vector<16x16xf32>
    %769 = arith.addf %599, %768 : vector<16x16xf32>
    %c0_100 = arith.constant 0 : index
    %c2_101 = arith.constant 2 : index
    %c1_102 = arith.constant 1 : index
    %c2_103 = arith.constant 2 : index
    %770 = vector.load %arg3[%c0_100, %c2_101, %c1_102, %c2_103] : memref<1x4x18x18xf32, #tpu.memory_space<vmem>>, vector<1x1x16x16xf32>
    %771 = vector.shape_cast %770 : vector<1x1x16x16xf32> to vector<16x16xf32>
    %c114 = arith.constant 114 : index
    %772 = memref.load %arg1[%c114] : memref<256xf32, #tpu.memory_space<smem>>
    %773 = vector.broadcast %772 : f32 to vector<16x16xf32>
    %774 = arith.mulf %773, %771 : vector<16x16xf32>
    %775 = arith.addf %725, %774 : vector<16x16xf32>
    %c118 = arith.constant 118 : index
    %776 = memref.load %arg1[%c118] : memref<256xf32, #tpu.memory_space<smem>>
    %777 = vector.broadcast %776 : f32 to vector<16x16xf32>
    %778 = arith.mulf %777, %771 : vector<16x16xf32>
    %779 = arith.addf %729, %778 : vector<16x16xf32>
    %c122 = arith.constant 122 : index
    %780 = memref.load %arg1[%c122] : memref<256xf32, #tpu.memory_space<smem>>
    %781 = vector.broadcast %780 : f32 to vector<16x16xf32>
    %782 = arith.mulf %781, %771 : vector<16x16xf32>
    %783 = arith.addf %733, %782 : vector<16x16xf32>
    %c126 = arith.constant 126 : index
    %784 = memref.load %arg1[%c126] : memref<256xf32, #tpu.memory_space<smem>>
    %785 = vector.broadcast %784 : f32 to vector<16x16xf32>
    %786 = arith.mulf %785, %771 : vector<16x16xf32>
    %787 = arith.addf %737, %786 : vector<16x16xf32>
    %c210 = arith.constant 210 : index
    %788 = memref.load %arg1[%c210] : memref<256xf32, #tpu.memory_space<smem>>
    %789 = vector.broadcast %788 : f32 to vector<16x16xf32>
    %790 = arith.mulf %789, %771 : vector<16x16xf32>
    %791 = arith.addf %757, %790 : vector<16x16xf32>
    %c214 = arith.constant 214 : index
    %792 = memref.load %arg1[%c214] : memref<256xf32, #tpu.memory_space<smem>>
    %793 = vector.broadcast %792 : f32 to vector<16x16xf32>
    %794 = arith.mulf %793, %771 : vector<16x16xf32>
    %795 = arith.addf %761, %794 : vector<16x16xf32>
    %c218 = arith.constant 218 : index
    %796 = memref.load %arg1[%c218] : memref<256xf32, #tpu.memory_space<smem>>
    %797 = vector.broadcast %796 : f32 to vector<16x16xf32>
    %798 = arith.mulf %797, %771 : vector<16x16xf32>
    %799 = arith.addf %765, %798 : vector<16x16xf32>
    %c222 = arith.constant 222 : index
    %800 = memref.load %arg1[%c222] : memref<256xf32, #tpu.memory_space<smem>>
    %801 = vector.broadcast %800 : f32 to vector<16x16xf32>
    %802 = arith.mulf %801, %771 : vector<16x16xf32>
    %803 = arith.addf %769, %802 : vector<16x16xf32>
    %c0_104 = arith.constant 0 : index
    %c2_105 = arith.constant 2 : index
    %c2_106 = arith.constant 2 : index
    %c0_107 = arith.constant 0 : index
    %804 = vector.load %arg3[%c0_104, %c2_105, %c2_106, %c0_107] : memref<1x4x18x18xf32, #tpu.memory_space<vmem>>, vector<1x1x16x16xf32>
    %805 = vector.shape_cast %804 : vector<1x1x16x16xf32> to vector<16x16xf32>
    %c162 = arith.constant 162 : index
    %806 = memref.load %arg1[%c162] : memref<256xf32, #tpu.memory_space<smem>>
    %807 = vector.broadcast %806 : f32 to vector<16x16xf32>
    %808 = arith.mulf %807, %805 : vector<16x16xf32>
    %809 = arith.addf %741, %808 : vector<16x16xf32>
    %c166 = arith.constant 166 : index
    %810 = memref.load %arg1[%c166] : memref<256xf32, #tpu.memory_space<smem>>
    %811 = vector.broadcast %810 : f32 to vector<16x16xf32>
    %812 = arith.mulf %811, %805 : vector<16x16xf32>
    %813 = arith.addf %745, %812 : vector<16x16xf32>
    %c170 = arith.constant 170 : index
    %814 = memref.load %arg1[%c170] : memref<256xf32, #tpu.memory_space<smem>>
    %815 = vector.broadcast %814 : f32 to vector<16x16xf32>
    %816 = arith.mulf %815, %805 : vector<16x16xf32>
    %817 = arith.addf %749, %816 : vector<16x16xf32>
    %c174 = arith.constant 174 : index
    %818 = memref.load %arg1[%c174] : memref<256xf32, #tpu.memory_space<smem>>
    %819 = vector.broadcast %818 : f32 to vector<16x16xf32>
    %820 = arith.mulf %819, %805 : vector<16x16xf32>
    %821 = arith.addf %753, %820 : vector<16x16xf32>
    %c0_108 = arith.constant 0 : index
    %c2_109 = arith.constant 2 : index
    %c2_110 = arith.constant 2 : index
    %c1_111 = arith.constant 1 : index
    %822 = vector.load %arg3[%c0_108, %c2_109, %c2_110, %c1_111] : memref<1x4x18x18xf32, #tpu.memory_space<vmem>>, vector<1x1x16x16xf32>
    %823 = vector.shape_cast %822 : vector<1x1x16x16xf32> to vector<16x16xf32>
    %c178 = arith.constant 178 : index
    %824 = memref.load %arg1[%c178] : memref<256xf32, #tpu.memory_space<smem>>
    %825 = vector.broadcast %824 : f32 to vector<16x16xf32>
    %826 = arith.mulf %825, %823 : vector<16x16xf32>
    %827 = arith.addf %809, %826 : vector<16x16xf32>
    %c182 = arith.constant 182 : index
    %828 = memref.load %arg1[%c182] : memref<256xf32, #tpu.memory_space<smem>>
    %829 = vector.broadcast %828 : f32 to vector<16x16xf32>
    %830 = arith.mulf %829, %823 : vector<16x16xf32>
    %831 = arith.addf %813, %830 : vector<16x16xf32>
    %c186 = arith.constant 186 : index
    %832 = memref.load %arg1[%c186] : memref<256xf32, #tpu.memory_space<smem>>
    %833 = vector.broadcast %832 : f32 to vector<16x16xf32>
    %834 = arith.mulf %833, %823 : vector<16x16xf32>
    %835 = arith.addf %817, %834 : vector<16x16xf32>
    %c190 = arith.constant 190 : index
    %836 = memref.load %arg1[%c190] : memref<256xf32, #tpu.memory_space<smem>>
    %837 = vector.broadcast %836 : f32 to vector<16x16xf32>
    %838 = arith.mulf %837, %823 : vector<16x16xf32>
    %839 = arith.addf %821, %838 : vector<16x16xf32>
    %c226 = arith.constant 226 : index
    %840 = memref.load %arg1[%c226] : memref<256xf32, #tpu.memory_space<smem>>
    %841 = vector.broadcast %840 : f32 to vector<16x16xf32>
    %842 = arith.mulf %841, %823 : vector<16x16xf32>
    %843 = arith.addf %791, %842 : vector<16x16xf32>
    %c230 = arith.constant 230 : index
    %844 = memref.load %arg1[%c230] : memref<256xf32, #tpu.memory_space<smem>>
    %845 = vector.broadcast %844 : f32 to vector<16x16xf32>
    %846 = arith.mulf %845, %823 : vector<16x16xf32>
    %847 = arith.addf %795, %846 : vector<16x16xf32>
    %c234 = arith.constant 234 : index
    %848 = memref.load %arg1[%c234] : memref<256xf32, #tpu.memory_space<smem>>
    %849 = vector.broadcast %848 : f32 to vector<16x16xf32>
    %850 = arith.mulf %849, %823 : vector<16x16xf32>
    %851 = arith.addf %799, %850 : vector<16x16xf32>
    %c238 = arith.constant 238 : index
    %852 = memref.load %arg1[%c238] : memref<256xf32, #tpu.memory_space<smem>>
    %853 = vector.broadcast %852 : f32 to vector<16x16xf32>
    %854 = arith.mulf %853, %823 : vector<16x16xf32>
    %855 = arith.addf %803, %854 : vector<16x16xf32>
    %c0_112 = arith.constant 0 : index
    %c2_113 = arith.constant 2 : index
    %c2_114 = arith.constant 2 : index
    %c2_115 = arith.constant 2 : index
    %856 = vector.load %arg3[%c0_112, %c2_113, %c2_114, %c2_115] : memref<1x4x18x18xf32, #tpu.memory_space<vmem>>, vector<1x1x16x16xf32>
    %857 = vector.shape_cast %856 : vector<1x1x16x16xf32> to vector<16x16xf32>
    %c242 = arith.constant 242 : index
    %858 = memref.load %arg1[%c242] : memref<256xf32, #tpu.memory_space<smem>>
    %859 = vector.broadcast %858 : f32 to vector<16x16xf32>
    %860 = arith.mulf %859, %857 : vector<16x16xf32>
    %861 = arith.addf %843, %860 : vector<16x16xf32>
    %c246 = arith.constant 246 : index
    %862 = memref.load %arg1[%c246] : memref<256xf32, #tpu.memory_space<smem>>
    %863 = vector.broadcast %862 : f32 to vector<16x16xf32>
    %864 = arith.mulf %863, %857 : vector<16x16xf32>
    %865 = arith.addf %847, %864 : vector<16x16xf32>
    %c250 = arith.constant 250 : index
    %866 = memref.load %arg1[%c250] : memref<256xf32, #tpu.memory_space<smem>>
    %867 = vector.broadcast %866 : f32 to vector<16x16xf32>
    %868 = arith.mulf %867, %857 : vector<16x16xf32>
    %869 = arith.addf %851, %868 : vector<16x16xf32>
    %c254 = arith.constant 254 : index
    %870 = memref.load %arg1[%c254] : memref<256xf32, #tpu.memory_space<smem>>
    %871 = vector.broadcast %870 : f32 to vector<16x16xf32>
    %872 = arith.mulf %871, %857 : vector<16x16xf32>
    %873 = arith.addf %855, %872 : vector<16x16xf32>
    %c0_116 = arith.constant 0 : index
    %c3_117 = arith.constant 3 : index
    %c0_118 = arith.constant 0 : index
    %c0_119 = arith.constant 0 : index
    %874 = vector.load %arg3[%c0_116, %c3_117, %c0_118, %c0_119] : memref<1x4x18x18xf32, #tpu.memory_space<vmem>>, vector<1x1x16x16xf32>
    %875 = vector.shape_cast %874 : vector<1x1x16x16xf32> to vector<16x16xf32>
    %c3_120 = arith.constant 3 : index
    %876 = memref.load %arg1[%c3_120] : memref<256xf32, #tpu.memory_space<smem>>
    %877 = vector.broadcast %876 : f32 to vector<16x16xf32>
    %878 = arith.mulf %877, %875 : vector<16x16xf32>
    %879 = arith.addf %709, %878 : vector<16x16xf32>
    %c7 = arith.constant 7 : index
    %880 = memref.load %arg1[%c7] : memref<256xf32, #tpu.memory_space<smem>>
    %881 = vector.broadcast %880 : f32 to vector<16x16xf32>
    %882 = arith.mulf %881, %875 : vector<16x16xf32>
    %883 = arith.addf %713, %882 : vector<16x16xf32>
    %c11 = arith.constant 11 : index
    %884 = memref.load %arg1[%c11] : memref<256xf32, #tpu.memory_space<smem>>
    %885 = vector.broadcast %884 : f32 to vector<16x16xf32>
    %886 = arith.mulf %885, %875 : vector<16x16xf32>
    %887 = arith.addf %717, %886 : vector<16x16xf32>
    %c15 = arith.constant 15 : index
    %888 = memref.load %arg1[%c15] : memref<256xf32, #tpu.memory_space<smem>>
    %889 = vector.broadcast %888 : f32 to vector<16x16xf32>
    %890 = arith.mulf %889, %875 : vector<16x16xf32>
    %891 = arith.addf %721, %890 : vector<16x16xf32>
    %c0_121 = arith.constant 0 : index
    %c3_122 = arith.constant 3 : index
    %c0_123 = arith.constant 0 : index
    %c1_124 = arith.constant 1 : index
    %892 = vector.load %arg3[%c0_121, %c3_122, %c0_123, %c1_124] : memref<1x4x18x18xf32, #tpu.memory_space<vmem>>, vector<1x1x16x16xf32>
    %893 = vector.shape_cast %892 : vector<1x1x16x16xf32> to vector<16x16xf32>
    %c19 = arith.constant 19 : index
    %894 = memref.load %arg1[%c19] : memref<256xf32, #tpu.memory_space<smem>>
    %895 = vector.broadcast %894 : f32 to vector<16x16xf32>
    %896 = arith.mulf %895, %893 : vector<16x16xf32>
    %897 = arith.addf %879, %896 : vector<16x16xf32>
    %c23 = arith.constant 23 : index
    %898 = memref.load %arg1[%c23] : memref<256xf32, #tpu.memory_space<smem>>
    %899 = vector.broadcast %898 : f32 to vector<16x16xf32>
    %900 = arith.mulf %899, %893 : vector<16x16xf32>
    %901 = arith.addf %883, %900 : vector<16x16xf32>
    %c27 = arith.constant 27 : index
    %902 = memref.load %arg1[%c27] : memref<256xf32, #tpu.memory_space<smem>>
    %903 = vector.broadcast %902 : f32 to vector<16x16xf32>
    %904 = arith.mulf %903, %893 : vector<16x16xf32>
    %905 = arith.addf %887, %904 : vector<16x16xf32>
    %c31 = arith.constant 31 : index
    %906 = memref.load %arg1[%c31] : memref<256xf32, #tpu.memory_space<smem>>
    %907 = vector.broadcast %906 : f32 to vector<16x16xf32>
    %908 = arith.mulf %907, %893 : vector<16x16xf32>
    %909 = arith.addf %891, %908 : vector<16x16xf32>
    %c67 = arith.constant 67 : index
    %910 = memref.load %arg1[%c67] : memref<256xf32, #tpu.memory_space<smem>>
    %911 = vector.broadcast %910 : f32 to vector<16x16xf32>
    %912 = arith.mulf %911, %893 : vector<16x16xf32>
    %913 = arith.addf %775, %912 : vector<16x16xf32>
    %c71 = arith.constant 71 : index
    %914 = memref.load %arg1[%c71] : memref<256xf32, #tpu.memory_space<smem>>
    %915 = vector.broadcast %914 : f32 to vector<16x16xf32>
    %916 = arith.mulf %915, %893 : vector<16x16xf32>
    %917 = arith.addf %779, %916 : vector<16x16xf32>
    %c75 = arith.constant 75 : index
    %918 = memref.load %arg1[%c75] : memref<256xf32, #tpu.memory_space<smem>>
    %919 = vector.broadcast %918 : f32 to vector<16x16xf32>
    %920 = arith.mulf %919, %893 : vector<16x16xf32>
    %921 = arith.addf %783, %920 : vector<16x16xf32>
    %c79 = arith.constant 79 : index
    %922 = memref.load %arg1[%c79] : memref<256xf32, #tpu.memory_space<smem>>
    %923 = vector.broadcast %922 : f32 to vector<16x16xf32>
    %924 = arith.mulf %923, %893 : vector<16x16xf32>
    %925 = arith.addf %787, %924 : vector<16x16xf32>
    %c0_125 = arith.constant 0 : index
    %c3_126 = arith.constant 3 : index
    %c0_127 = arith.constant 0 : index
    %c2_128 = arith.constant 2 : index
    %926 = vector.load %arg3[%c0_125, %c3_126, %c0_127, %c2_128] : memref<1x4x18x18xf32, #tpu.memory_space<vmem>>, vector<1x1x16x16xf32>
    %927 = vector.shape_cast %926 : vector<1x1x16x16xf32> to vector<16x16xf32>
    %c83 = arith.constant 83 : index
    %928 = memref.load %arg1[%c83] : memref<256xf32, #tpu.memory_space<smem>>
    %929 = vector.broadcast %928 : f32 to vector<16x16xf32>
    %930 = arith.mulf %929, %927 : vector<16x16xf32>
    %931 = arith.addf %913, %930 : vector<16x16xf32>
    %c87 = arith.constant 87 : index
    %932 = memref.load %arg1[%c87] : memref<256xf32, #tpu.memory_space<smem>>
    %933 = vector.broadcast %932 : f32 to vector<16x16xf32>
    %934 = arith.mulf %933, %927 : vector<16x16xf32>
    %935 = arith.addf %917, %934 : vector<16x16xf32>
    %c91 = arith.constant 91 : index
    %936 = memref.load %arg1[%c91] : memref<256xf32, #tpu.memory_space<smem>>
    %937 = vector.broadcast %936 : f32 to vector<16x16xf32>
    %938 = arith.mulf %937, %927 : vector<16x16xf32>
    %939 = arith.addf %921, %938 : vector<16x16xf32>
    %c95 = arith.constant 95 : index
    %940 = memref.load %arg1[%c95] : memref<256xf32, #tpu.memory_space<smem>>
    %941 = vector.broadcast %940 : f32 to vector<16x16xf32>
    %942 = arith.mulf %941, %927 : vector<16x16xf32>
    %943 = arith.addf %925, %942 : vector<16x16xf32>
    %c0_129 = arith.constant 0 : index
    %c3_130 = arith.constant 3 : index
    %c1_131 = arith.constant 1 : index
    %c0_132 = arith.constant 0 : index
    %944 = vector.load %arg3[%c0_129, %c3_130, %c1_131, %c0_132] : memref<1x4x18x18xf32, #tpu.memory_space<vmem>>, vector<1x1x16x16xf32>
    %945 = vector.shape_cast %944 : vector<1x1x16x16xf32> to vector<16x16xf32>
    %c35 = arith.constant 35 : index
    %946 = memref.load %arg1[%c35] : memref<256xf32, #tpu.memory_space<smem>>
    %947 = vector.broadcast %946 : f32 to vector<16x16xf32>
    %948 = arith.mulf %947, %945 : vector<16x16xf32>
    %949 = arith.addf %897, %948 : vector<16x16xf32>
    %c39 = arith.constant 39 : index
    %950 = memref.load %arg1[%c39] : memref<256xf32, #tpu.memory_space<smem>>
    %951 = vector.broadcast %950 : f32 to vector<16x16xf32>
    %952 = arith.mulf %951, %945 : vector<16x16xf32>
    %953 = arith.addf %901, %952 : vector<16x16xf32>
    %c43 = arith.constant 43 : index
    %954 = memref.load %arg1[%c43] : memref<256xf32, #tpu.memory_space<smem>>
    %955 = vector.broadcast %954 : f32 to vector<16x16xf32>
    %956 = arith.mulf %955, %945 : vector<16x16xf32>
    %957 = arith.addf %905, %956 : vector<16x16xf32>
    %c47 = arith.constant 47 : index
    %958 = memref.load %arg1[%c47] : memref<256xf32, #tpu.memory_space<smem>>
    %959 = vector.broadcast %958 : f32 to vector<16x16xf32>
    %960 = arith.mulf %959, %945 : vector<16x16xf32>
    %961 = arith.addf %909, %960 : vector<16x16xf32>
    %c131 = arith.constant 131 : index
    %962 = memref.load %arg1[%c131] : memref<256xf32, #tpu.memory_space<smem>>
    %963 = vector.broadcast %962 : f32 to vector<16x16xf32>
    %964 = arith.mulf %963, %945 : vector<16x16xf32>
    %965 = arith.addf %827, %964 : vector<16x16xf32>
    %c135 = arith.constant 135 : index
    %966 = memref.load %arg1[%c135] : memref<256xf32, #tpu.memory_space<smem>>
    %967 = vector.broadcast %966 : f32 to vector<16x16xf32>
    %968 = arith.mulf %967, %945 : vector<16x16xf32>
    %969 = arith.addf %831, %968 : vector<16x16xf32>
    %c139 = arith.constant 139 : index
    %970 = memref.load %arg1[%c139] : memref<256xf32, #tpu.memory_space<smem>>
    %971 = vector.broadcast %970 : f32 to vector<16x16xf32>
    %972 = arith.mulf %971, %945 : vector<16x16xf32>
    %973 = arith.addf %835, %972 : vector<16x16xf32>
    %c143 = arith.constant 143 : index
    %974 = memref.load %arg1[%c143] : memref<256xf32, #tpu.memory_space<smem>>
    %975 = vector.broadcast %974 : f32 to vector<16x16xf32>
    %976 = arith.mulf %975, %945 : vector<16x16xf32>
    %977 = arith.addf %839, %976 : vector<16x16xf32>
    %c0_133 = arith.constant 0 : index
    %c3_134 = arith.constant 3 : index
    %c1_135 = arith.constant 1 : index
    %c1_136 = arith.constant 1 : index
    %978 = vector.load %arg3[%c0_133, %c3_134, %c1_135, %c1_136] : memref<1x4x18x18xf32, #tpu.memory_space<vmem>>, vector<1x1x16x16xf32>
    %979 = vector.shape_cast %978 : vector<1x1x16x16xf32> to vector<16x16xf32>
    %c51 = arith.constant 51 : index
    %980 = memref.load %arg1[%c51] : memref<256xf32, #tpu.memory_space<smem>>
    %981 = vector.broadcast %980 : f32 to vector<16x16xf32>
    %982 = arith.mulf %981, %979 : vector<16x16xf32>
    %983 = arith.addf %949, %982 : vector<16x16xf32>
    %c55 = arith.constant 55 : index
    %984 = memref.load %arg1[%c55] : memref<256xf32, #tpu.memory_space<smem>>
    %985 = vector.broadcast %984 : f32 to vector<16x16xf32>
    %986 = arith.mulf %985, %979 : vector<16x16xf32>
    %987 = arith.addf %953, %986 : vector<16x16xf32>
    %c59 = arith.constant 59 : index
    %988 = memref.load %arg1[%c59] : memref<256xf32, #tpu.memory_space<smem>>
    %989 = vector.broadcast %988 : f32 to vector<16x16xf32>
    %990 = arith.mulf %989, %979 : vector<16x16xf32>
    %991 = arith.addf %957, %990 : vector<16x16xf32>
    %c63 = arith.constant 63 : index
    %992 = memref.load %arg1[%c63] : memref<256xf32, #tpu.memory_space<smem>>
    %993 = vector.broadcast %992 : f32 to vector<16x16xf32>
    %994 = arith.mulf %993, %979 : vector<16x16xf32>
    %995 = arith.addf %961, %994 : vector<16x16xf32>
    %c99 = arith.constant 99 : index
    %996 = memref.load %arg1[%c99] : memref<256xf32, #tpu.memory_space<smem>>
    %997 = vector.broadcast %996 : f32 to vector<16x16xf32>
    %998 = arith.mulf %997, %979 : vector<16x16xf32>
    %999 = arith.addf %931, %998 : vector<16x16xf32>
    %c103 = arith.constant 103 : index
    %1000 = memref.load %arg1[%c103] : memref<256xf32, #tpu.memory_space<smem>>
    %1001 = vector.broadcast %1000 : f32 to vector<16x16xf32>
    %1002 = arith.mulf %1001, %979 : vector<16x16xf32>
    %1003 = arith.addf %935, %1002 : vector<16x16xf32>
    %c107 = arith.constant 107 : index
    %1004 = memref.load %arg1[%c107] : memref<256xf32, #tpu.memory_space<smem>>
    %1005 = vector.broadcast %1004 : f32 to vector<16x16xf32>
    %1006 = arith.mulf %1005, %979 : vector<16x16xf32>
    %1007 = arith.addf %939, %1006 : vector<16x16xf32>
    %c111 = arith.constant 111 : index
    %1008 = memref.load %arg1[%c111] : memref<256xf32, #tpu.memory_space<smem>>
    %1009 = vector.broadcast %1008 : f32 to vector<16x16xf32>
    %1010 = arith.mulf %1009, %979 : vector<16x16xf32>
    %1011 = arith.addf %943, %1010 : vector<16x16xf32>
    %c147 = arith.constant 147 : index
    %1012 = memref.load %arg1[%c147] : memref<256xf32, #tpu.memory_space<smem>>
    %1013 = vector.broadcast %1012 : f32 to vector<16x16xf32>
    %1014 = arith.mulf %1013, %979 : vector<16x16xf32>
    %1015 = arith.addf %965, %1014 : vector<16x16xf32>
    %c151 = arith.constant 151 : index
    %1016 = memref.load %arg1[%c151] : memref<256xf32, #tpu.memory_space<smem>>
    %1017 = vector.broadcast %1016 : f32 to vector<16x16xf32>
    %1018 = arith.mulf %1017, %979 : vector<16x16xf32>
    %1019 = arith.addf %969, %1018 : vector<16x16xf32>
    %c155 = arith.constant 155 : index
    %1020 = memref.load %arg1[%c155] : memref<256xf32, #tpu.memory_space<smem>>
    %1021 = vector.broadcast %1020 : f32 to vector<16x16xf32>
    %1022 = arith.mulf %1021, %979 : vector<16x16xf32>
    %1023 = arith.addf %973, %1022 : vector<16x16xf32>
    %c159 = arith.constant 159 : index
    %1024 = memref.load %arg1[%c159] : memref<256xf32, #tpu.memory_space<smem>>
    %1025 = vector.broadcast %1024 : f32 to vector<16x16xf32>
    %1026 = arith.mulf %1025, %979 : vector<16x16xf32>
    %1027 = arith.addf %977, %1026 : vector<16x16xf32>
    %c195 = arith.constant 195 : index
    %1028 = memref.load %arg1[%c195] : memref<256xf32, #tpu.memory_space<smem>>
    %1029 = vector.broadcast %1028 : f32 to vector<16x16xf32>
    %1030 = arith.mulf %1029, %979 : vector<16x16xf32>
    %1031 = arith.addf %861, %1030 : vector<16x16xf32>
    %c199 = arith.constant 199 : index
    %1032 = memref.load %arg1[%c199] : memref<256xf32, #tpu.memory_space<smem>>
    %1033 = vector.broadcast %1032 : f32 to vector<16x16xf32>
    %1034 = arith.mulf %1033, %979 : vector<16x16xf32>
    %1035 = arith.addf %865, %1034 : vector<16x16xf32>
    %c203 = arith.constant 203 : index
    %1036 = memref.load %arg1[%c203] : memref<256xf32, #tpu.memory_space<smem>>
    %1037 = vector.broadcast %1036 : f32 to vector<16x16xf32>
    %1038 = arith.mulf %1037, %979 : vector<16x16xf32>
    %1039 = arith.addf %869, %1038 : vector<16x16xf32>
    %c207 = arith.constant 207 : index
    %1040 = memref.load %arg1[%c207] : memref<256xf32, #tpu.memory_space<smem>>
    %1041 = vector.broadcast %1040 : f32 to vector<16x16xf32>
    %1042 = arith.mulf %1041, %979 : vector<16x16xf32>
    %1043 = arith.addf %873, %1042 : vector<16x16xf32>
    %c0_137 = arith.constant 0 : index
    %c3_138 = arith.constant 3 : index
    %c1_139 = arith.constant 1 : index
    %c2_140 = arith.constant 2 : index
    %1044 = vector.load %arg3[%c0_137, %c3_138, %c1_139, %c2_140] : memref<1x4x18x18xf32, #tpu.memory_space<vmem>>, vector<1x1x16x16xf32>
    %1045 = vector.shape_cast %1044 : vector<1x1x16x16xf32> to vector<16x16xf32>
    %c115 = arith.constant 115 : index
    %1046 = memref.load %arg1[%c115] : memref<256xf32, #tpu.memory_space<smem>>
    %1047 = vector.broadcast %1046 : f32 to vector<16x16xf32>
    %1048 = arith.mulf %1047, %1045 : vector<16x16xf32>
    %1049 = arith.addf %999, %1048 : vector<16x16xf32>
    %c119 = arith.constant 119 : index
    %1050 = memref.load %arg1[%c119] : memref<256xf32, #tpu.memory_space<smem>>
    %1051 = vector.broadcast %1050 : f32 to vector<16x16xf32>
    %1052 = arith.mulf %1051, %1045 : vector<16x16xf32>
    %1053 = arith.addf %1003, %1052 : vector<16x16xf32>
    %c123 = arith.constant 123 : index
    %1054 = memref.load %arg1[%c123] : memref<256xf32, #tpu.memory_space<smem>>
    %1055 = vector.broadcast %1054 : f32 to vector<16x16xf32>
    %1056 = arith.mulf %1055, %1045 : vector<16x16xf32>
    %1057 = arith.addf %1007, %1056 : vector<16x16xf32>
    %c127 = arith.constant 127 : index
    %1058 = memref.load %arg1[%c127] : memref<256xf32, #tpu.memory_space<smem>>
    %1059 = vector.broadcast %1058 : f32 to vector<16x16xf32>
    %1060 = arith.mulf %1059, %1045 : vector<16x16xf32>
    %1061 = arith.addf %1011, %1060 : vector<16x16xf32>
    %c211 = arith.constant 211 : index
    %1062 = memref.load %arg1[%c211] : memref<256xf32, #tpu.memory_space<smem>>
    %1063 = vector.broadcast %1062 : f32 to vector<16x16xf32>
    %1064 = arith.mulf %1063, %1045 : vector<16x16xf32>
    %1065 = arith.addf %1031, %1064 : vector<16x16xf32>
    %c215 = arith.constant 215 : index
    %1066 = memref.load %arg1[%c215] : memref<256xf32, #tpu.memory_space<smem>>
    %1067 = vector.broadcast %1066 : f32 to vector<16x16xf32>
    %1068 = arith.mulf %1067, %1045 : vector<16x16xf32>
    %1069 = arith.addf %1035, %1068 : vector<16x16xf32>
    %c219 = arith.constant 219 : index
    %1070 = memref.load %arg1[%c219] : memref<256xf32, #tpu.memory_space<smem>>
    %1071 = vector.broadcast %1070 : f32 to vector<16x16xf32>
    %1072 = arith.mulf %1071, %1045 : vector<16x16xf32>
    %1073 = arith.addf %1039, %1072 : vector<16x16xf32>
    %c223 = arith.constant 223 : index
    %1074 = memref.load %arg1[%c223] : memref<256xf32, #tpu.memory_space<smem>>
    %1075 = vector.broadcast %1074 : f32 to vector<16x16xf32>
    %1076 = arith.mulf %1075, %1045 : vector<16x16xf32>
    %1077 = arith.addf %1043, %1076 : vector<16x16xf32>
    %c0_141 = arith.constant 0 : index
    %c3_142 = arith.constant 3 : index
    %c2_143 = arith.constant 2 : index
    %c0_144 = arith.constant 0 : index
    %1078 = vector.load %arg3[%c0_141, %c3_142, %c2_143, %c0_144] : memref<1x4x18x18xf32, #tpu.memory_space<vmem>>, vector<1x1x16x16xf32>
    %1079 = vector.shape_cast %1078 : vector<1x1x16x16xf32> to vector<16x16xf32>
    %c163 = arith.constant 163 : index
    %1080 = memref.load %arg1[%c163] : memref<256xf32, #tpu.memory_space<smem>>
    %1081 = vector.broadcast %1080 : f32 to vector<16x16xf32>
    %1082 = arith.mulf %1081, %1079 : vector<16x16xf32>
    %1083 = arith.addf %1015, %1082 : vector<16x16xf32>
    %c167 = arith.constant 167 : index
    %1084 = memref.load %arg1[%c167] : memref<256xf32, #tpu.memory_space<smem>>
    %1085 = vector.broadcast %1084 : f32 to vector<16x16xf32>
    %1086 = arith.mulf %1085, %1079 : vector<16x16xf32>
    %1087 = arith.addf %1019, %1086 : vector<16x16xf32>
    %c171 = arith.constant 171 : index
    %1088 = memref.load %arg1[%c171] : memref<256xf32, #tpu.memory_space<smem>>
    %1089 = vector.broadcast %1088 : f32 to vector<16x16xf32>
    %1090 = arith.mulf %1089, %1079 : vector<16x16xf32>
    %1091 = arith.addf %1023, %1090 : vector<16x16xf32>
    %c175 = arith.constant 175 : index
    %1092 = memref.load %arg1[%c175] : memref<256xf32, #tpu.memory_space<smem>>
    %1093 = vector.broadcast %1092 : f32 to vector<16x16xf32>
    %1094 = arith.mulf %1093, %1079 : vector<16x16xf32>
    %1095 = arith.addf %1027, %1094 : vector<16x16xf32>
    %c0_145 = arith.constant 0 : index
    %c3_146 = arith.constant 3 : index
    %c2_147 = arith.constant 2 : index
    %c1_148 = arith.constant 1 : index
    %1096 = vector.load %arg3[%c0_145, %c3_146, %c2_147, %c1_148] : memref<1x4x18x18xf32, #tpu.memory_space<vmem>>, vector<1x1x16x16xf32>
    %1097 = vector.shape_cast %1096 : vector<1x1x16x16xf32> to vector<16x16xf32>
    %c179 = arith.constant 179 : index
    %1098 = memref.load %arg1[%c179] : memref<256xf32, #tpu.memory_space<smem>>
    %1099 = vector.broadcast %1098 : f32 to vector<16x16xf32>
    %1100 = arith.mulf %1099, %1097 : vector<16x16xf32>
    %1101 = arith.addf %1083, %1100 : vector<16x16xf32>
    %c183 = arith.constant 183 : index
    %1102 = memref.load %arg1[%c183] : memref<256xf32, #tpu.memory_space<smem>>
    %1103 = vector.broadcast %1102 : f32 to vector<16x16xf32>
    %1104 = arith.mulf %1103, %1097 : vector<16x16xf32>
    %1105 = arith.addf %1087, %1104 : vector<16x16xf32>
    %c187 = arith.constant 187 : index
    %1106 = memref.load %arg1[%c187] : memref<256xf32, #tpu.memory_space<smem>>
    %1107 = vector.broadcast %1106 : f32 to vector<16x16xf32>
    %1108 = arith.mulf %1107, %1097 : vector<16x16xf32>
    %1109 = arith.addf %1091, %1108 : vector<16x16xf32>
    %c191 = arith.constant 191 : index
    %1110 = memref.load %arg1[%c191] : memref<256xf32, #tpu.memory_space<smem>>
    %1111 = vector.broadcast %1110 : f32 to vector<16x16xf32>
    %1112 = arith.mulf %1111, %1097 : vector<16x16xf32>
    %1113 = arith.addf %1095, %1112 : vector<16x16xf32>
    %c227 = arith.constant 227 : index
    %1114 = memref.load %arg1[%c227] : memref<256xf32, #tpu.memory_space<smem>>
    %1115 = vector.broadcast %1114 : f32 to vector<16x16xf32>
    %1116 = arith.mulf %1115, %1097 : vector<16x16xf32>
    %1117 = arith.addf %1065, %1116 : vector<16x16xf32>
    %c231 = arith.constant 231 : index
    %1118 = memref.load %arg1[%c231] : memref<256xf32, #tpu.memory_space<smem>>
    %1119 = vector.broadcast %1118 : f32 to vector<16x16xf32>
    %1120 = arith.mulf %1119, %1097 : vector<16x16xf32>
    %1121 = arith.addf %1069, %1120 : vector<16x16xf32>
    %c235 = arith.constant 235 : index
    %1122 = memref.load %arg1[%c235] : memref<256xf32, #tpu.memory_space<smem>>
    %1123 = vector.broadcast %1122 : f32 to vector<16x16xf32>
    %1124 = arith.mulf %1123, %1097 : vector<16x16xf32>
    %1125 = arith.addf %1073, %1124 : vector<16x16xf32>
    %c239 = arith.constant 239 : index
    %1126 = memref.load %arg1[%c239] : memref<256xf32, #tpu.memory_space<smem>>
    %1127 = vector.broadcast %1126 : f32 to vector<16x16xf32>
    %1128 = arith.mulf %1127, %1097 : vector<16x16xf32>
    %1129 = arith.addf %1077, %1128 : vector<16x16xf32>
    %c0_149 = arith.constant 0 : index
    %c3_150 = arith.constant 3 : index
    %c2_151 = arith.constant 2 : index
    %c2_152 = arith.constant 2 : index
    %1130 = vector.load %arg3[%c0_149, %c3_150, %c2_151, %c2_152] : memref<1x4x18x18xf32, #tpu.memory_space<vmem>>, vector<1x1x16x16xf32>
    %1131 = vector.shape_cast %1130 : vector<1x1x16x16xf32> to vector<16x16xf32>
    %c243 = arith.constant 243 : index
    %1132 = memref.load %arg1[%c243] : memref<256xf32, #tpu.memory_space<smem>>
    %1133 = vector.broadcast %1132 : f32 to vector<16x16xf32>
    %1134 = arith.mulf %1133, %1131 : vector<16x16xf32>
    %1135 = arith.addf %1117, %1134 : vector<16x16xf32>
    %c247 = arith.constant 247 : index
    %1136 = memref.load %arg1[%c247] : memref<256xf32, #tpu.memory_space<smem>>
    %1137 = vector.broadcast %1136 : f32 to vector<16x16xf32>
    %1138 = arith.mulf %1137, %1131 : vector<16x16xf32>
    %1139 = arith.addf %1121, %1138 : vector<16x16xf32>
    %c251 = arith.constant 251 : index
    %1140 = memref.load %arg1[%c251] : memref<256xf32, #tpu.memory_space<smem>>
    %1141 = vector.broadcast %1140 : f32 to vector<16x16xf32>
    %1142 = arith.mulf %1141, %1131 : vector<16x16xf32>
    %1143 = arith.addf %1125, %1142 : vector<16x16xf32>
    %c255 = arith.constant 255 : index
    %1144 = memref.load %arg1[%c255] : memref<256xf32, #tpu.memory_space<smem>>
    %1145 = vector.broadcast %1144 : f32 to vector<16x16xf32>
    %1146 = arith.mulf %1145, %1131 : vector<16x16xf32>
    %1147 = arith.addf %1129, %1146 : vector<16x16xf32>
    %cst = arith.constant dense<0.000000e+00> : vector<16x32xf32>
    %1148 = tpu.matmul %983, %24, %cst {dimension_numbers = #tpu.dot_dimension_numbers<[1], [0], [0], [1], [0, 0, 1, 1], [], []>} : vector<16x16xf32>, vector<16x32xf32>, vector<16x32xf32> -> vector<16x32xf32>
    %cst_153 = arith.constant dense<0.000000e+00> : vector<16x32xf32>
    %1149 = tpu.matmul %1049, %31, %cst_153 {dimension_numbers = #tpu.dot_dimension_numbers<[1], [0], [0], [1], [0, 0, 1, 1], [], []>} : vector<16x16xf32>, vector<16x32xf32>, vector<16x32xf32> -> vector<16x32xf32>
    %1150 = arith.addf %1148, %1149 : vector<16x32xf32>
    %cst_154 = arith.constant dense<0.000000e+00> : vector<16x32xf32>
    %1151 = tpu.matmul %1101, %24, %cst_154 {dimension_numbers = #tpu.dot_dimension_numbers<[1], [0], [0], [1], [0, 0, 1, 1], [], []>} : vector<16x16xf32>, vector<16x32xf32>, vector<16x32xf32> -> vector<16x32xf32>
    %cst_155 = arith.constant dense<0.000000e+00> : vector<16x32xf32>
    %1152 = tpu.matmul %1135, %31, %cst_155 {dimension_numbers = #tpu.dot_dimension_numbers<[1], [0], [0], [1], [0, 0, 1, 1], [], []>} : vector<16x16xf32>, vector<16x32xf32>, vector<16x32xf32> -> vector<16x32xf32>
    %1153 = arith.addf %1151, %1152 : vector<16x32xf32>
    %cst_156 = arith.constant dense<0.000000e+00> : vector<32x32xf32>
    %1154 = tpu.matmul %8, %1150, %cst_156 {dimension_numbers = #tpu.dot_dimension_numbers<[1], [0], [0], [1], [0, 0, 1, 1], [], []>} : vector<32x16xf32>, vector<16x32xf32>, vector<32x32xf32> -> vector<32x32xf32>
    %cst_157 = arith.constant dense<0.000000e+00> : vector<32x32xf32>
    %1155 = tpu.matmul %15, %1153, %cst_157 {dimension_numbers = #tpu.dot_dimension_numbers<[1], [0], [0], [1], [0, 0, 1, 1], [], []>} : vector<32x16xf32>, vector<16x32xf32>, vector<32x32xf32> -> vector<32x32xf32>
    %1156 = arith.addf %1154, %1155 : vector<32x32xf32>
    %c0_158 = arith.constant 0 : index
    %c0_159 = arith.constant 0 : index
    %c0_160 = arith.constant 0 : index
    %c0_161 = arith.constant 0 : index
    %1157 = vector.load %arg4[%c0_158, %c0_159, %c0_160, %c0_161] : memref<1x4x32x32xf32, #tpu.memory_space<vmem>>, vector<1x1x32x32xf32>
    %1158 = vector.shape_cast %1157 : vector<1x1x32x32xf32> to vector<32x32xf32>
    %1159 = vector.shape_cast %1156 : vector<32x32xf32> to vector<1x1x32x32xf32>
    tpu.vector_store %arg4[%c0_158, %c0_159, %c0_160, %c0_161], %1159 {strides = array<i32>} : memref<1x4x32x32xf32, #tpu.memory_space<vmem>>, vector<1x1x32x32xf32>,
    %cst_162 = arith.constant dense<0.000000e+00> : vector<16x32xf32>
    %1160 = tpu.matmul %987, %24, %cst_162 {dimension_numbers = #tpu.dot_dimension_numbers<[1], [0], [0], [1], [0, 0, 1, 1], [], []>} : vector<16x16xf32>, vector<16x32xf32>, vector<16x32xf32> -> vector<16x32xf32>
    %cst_163 = arith.constant dense<0.000000e+00> : vector<16x32xf32>
    %1161 = tpu.matmul %1053, %31, %cst_163 {dimension_numbers = #tpu.dot_dimension_numbers<[1], [0], [0], [1], [0, 0, 1, 1], [], []>} : vector<16x16xf32>, vector<16x32xf32>, vector<16x32xf32> -> vector<16x32xf32>
    %1162 = arith.addf %1160, %1161 : vector<16x32xf32>
    %cst_164 = arith.constant dense<0.000000e+00> : vector<16x32xf32>
    %1163 = tpu.matmul %1105, %24, %cst_164 {dimension_numbers = #tpu.dot_dimension_numbers<[1], [0], [0], [1], [0, 0, 1, 1], [], []>} : vector<16x16xf32>, vector<16x32xf32>, vector<16x32xf32> -> vector<16x32xf32>
    %cst_165 = arith.constant dense<0.000000e+00> : vector<16x32xf32>
    %1164 = tpu.matmul %1139, %31, %cst_165 {dimension_numbers = #tpu.dot_dimension_numbers<[1], [0], [0], [1], [0, 0, 1, 1], [], []>} : vector<16x16xf32>, vector<16x32xf32>, vector<16x32xf32> -> vector<16x32xf32>
    %1165 = arith.addf %1163, %1164 : vector<16x32xf32>
    %cst_166 = arith.constant dense<0.000000e+00> : vector<32x32xf32>
    %1166 = tpu.matmul %8, %1162, %cst_166 {dimension_numbers = #tpu.dot_dimension_numbers<[1], [0], [0], [1], [0, 0, 1, 1], [], []>} : vector<32x16xf32>, vector<16x32xf32>, vector<32x32xf32> -> vector<32x32xf32>
    %cst_167 = arith.constant dense<0.000000e+00> : vector<32x32xf32>
    %1167 = tpu.matmul %15, %1165, %cst_167 {dimension_numbers = #tpu.dot_dimension_numbers<[1], [0], [0], [1], [0, 0, 1, 1], [], []>} : vector<32x16xf32>, vector<16x32xf32>, vector<32x32xf32> -> vector<32x32xf32>
    %1168 = arith.addf %1166, %1167 : vector<32x32xf32>
    %c0_168 = arith.constant 0 : index
    %c1_169 = arith.constant 1 : index
    %c0_170 = arith.constant 0 : index
    %c0_171 = arith.constant 0 : index
    %1169 = vector.load %arg4[%c0_168, %c1_169, %c0_170, %c0_171] : memref<1x4x32x32xf32, #tpu.memory_space<vmem>>, vector<1x1x32x32xf32>
    %1170 = vector.shape_cast %1169 : vector<1x1x32x32xf32> to vector<32x32xf32>
    %1171 = vector.shape_cast %1168 : vector<32x32xf32> to vector<1x1x32x32xf32>
    tpu.vector_store %arg4[%c0_168, %c1_169, %c0_170, %c0_171], %1171 {strides = array<i32>} : memref<1x4x32x32xf32, #tpu.memory_space<vmem>>, vector<1x1x32x32xf32>,
    %cst_172 = arith.constant dense<0.000000e+00> : vector<16x32xf32>
    %1172 = tpu.matmul %991, %24, %cst_172 {dimension_numbers = #tpu.dot_dimension_numbers<[1], [0], [0], [1], [0, 0, 1, 1], [], []>} : vector<16x16xf32>, vector<16x32xf32>, vector<16x32xf32> -> vector<16x32xf32>
    %cst_173 = arith.constant dense<0.000000e+00> : vector<16x32xf32>
    %1173 = tpu.matmul %1057, %31, %cst_173 {dimension_numbers = #tpu.dot_dimension_numbers<[1], [0], [0], [1], [0, 0, 1, 1], [], []>} : vector<16x16xf32>, vector<16x32xf32>, vector<16x32xf32> -> vector<16x32xf32>
    %1174 = arith.addf %1172, %1173 : vector<16x32xf32>
    %cst_174 = arith.constant dense<0.000000e+00> : vector<16x32xf32>
    %1175 = tpu.matmul %1109, %24, %cst_174 {dimension_numbers = #tpu.dot_dimension_numbers<[1], [0], [0], [1], [0, 0, 1, 1], [], []>} : vector<16x16xf32>, vector<16x32xf32>, vector<16x32xf32> -> vector<16x32xf32>
    %cst_175 = arith.constant dense<0.000000e+00> : vector<16x32xf32>
    %1176 = tpu.matmul %1143, %31, %cst_175 {dimension_numbers = #tpu.dot_dimension_numbers<[1], [0], [0], [1], [0, 0, 1, 1], [], []>} : vector<16x16xf32>, vector<16x32xf32>, vector<16x32xf32> -> vector<16x32xf32>
    %1177 = arith.addf %1175, %1176 : vector<16x32xf32>
    %cst_176 = arith.constant dense<0.000000e+00> : vector<32x32xf32>
    %1178 = tpu.matmul %8, %1174, %cst_176 {dimension_numbers = #tpu.dot_dimension_numbers<[1], [0], [0], [1], [0, 0, 1, 1], [], []>} : vector<32x16xf32>, vector<16x32xf32>, vector<32x32xf32> -> vector<32x32xf32>
    %cst_177 = arith.constant dense<0.000000e+00> : vector<32x32xf32>
    %1179 = tpu.matmul %15, %1177, %cst_177 {dimension_numbers = #tpu.dot_dimension_numbers<[1], [0], [0], [1], [0, 0, 1, 1], [], []>} : vector<32x16xf32>, vector<16x32xf32>, vector<32x32xf32> -> vector<32x32xf32>
    %1180 = arith.addf %1178, %1179 : vector<32x32xf32>
    %c0_178 = arith.constant 0 : index
    %c2_179 = arith.constant 2 : index
    %c0_180 = arith.constant 0 : index
    %c0_181 = arith.constant 0 : index
    %1181 = vector.load %arg4[%c0_178, %c2_179, %c0_180, %c0_181] : memref<1x4x32x32xf32, #tpu.memory_space<vmem>>, vector<1x1x32x32xf32>
    %1182 = vector.shape_cast %1181 : vector<1x1x32x32xf32> to vector<32x32xf32>
    %1183 = vector.shape_cast %1180 : vector<32x32xf32> to vector<1x1x32x32xf32>
    tpu.vector_store %arg4[%c0_178, %c2_179, %c0_180, %c0_181], %1183 {strides = array<i32>} : memref<1x4x32x32xf32, #tpu.memory_space<vmem>>, vector<1x1x32x32xf32>,
    %cst_182 = arith.constant dense<0.000000e+00> : vector<16x32xf32>
    %1184 = tpu.matmul %995, %24, %cst_182 {dimension_numbers = #tpu.dot_dimension_numbers<[1], [0], [0], [1], [0, 0, 1, 1], [], []>} : vector<16x16xf32>, vector<16x32xf32>, vector<16x32xf32> -> vector<16x32xf32>
    %cst_183 = arith.constant dense<0.000000e+00> : vector<16x32xf32>
    %1185 = tpu.matmul %1061, %31, %cst_183 {dimension_numbers = #tpu.dot_dimension_numbers<[1], [0], [0], [1], [0, 0, 1, 1], [], []>} : vector<16x16xf32>, vector<16x32xf32>, vector<16x32xf32> -> vector<16x32xf32>
    %1186 = arith.addf %1184, %1185 : vector<16x32xf32>
    %cst_184 = arith.constant dense<0.000000e+00> : vector<16x32xf32>
    %1187 = tpu.matmul %1113, %24, %cst_184 {dimension_numbers = #tpu.dot_dimension_numbers<[1], [0], [0], [1], [0, 0, 1, 1], [], []>} : vector<16x16xf32>, vector<16x32xf32>, vector<16x32xf32> -> vector<16x32xf32>
    %cst_185 = arith.constant dense<0.000000e+00> : vector<16x32xf32>
    %1188 = tpu.matmul %1147, %31, %cst_185 {dimension_numbers = #tpu.dot_dimension_numbers<[1], [0], [0], [1], [0, 0, 1, 1], [], []>} : vector<16x16xf32>, vector<16x32xf32>, vector<16x32xf32> -> vector<16x32xf32>
    %1189 = arith.addf %1187, %1188 : vector<16x32xf32>
    %cst_186 = arith.constant dense<0.000000e+00> : vector<32x32xf32>
    %1190 = tpu.matmul %8, %1186, %cst_186 {dimension_numbers = #tpu.dot_dimension_numbers<[1], [0], [0], [1], [0, 0, 1, 1], [], []>} : vector<32x16xf32>, vector<16x32xf32>, vector<32x32xf32> -> vector<32x32xf32>
    %cst_187 = arith.constant dense<0.000000e+00> : vector<32x32xf32>
    %1191 = tpu.matmul %15, %1189, %cst_187 {dimension_numbers = #tpu.dot_dimension_numbers<[1], [0], [0], [1], [0, 0, 1, 1], [], []>} : vector<32x16xf32>, vector<16x32xf32>, vector<32x32xf32> -> vector<32x32xf32>
    %1192 = arith.addf %1190, %1191 : vector<32x32xf32>
    %c0_188 = arith.constant 0 : index
    %c3_189 = arith.constant 3 : index
    %c0_190 = arith.constant 0 : index
    %c0_191 = arith.constant 0 : index
    %1193 = vector.load %arg4[%c0_188, %c3_189, %c0_190, %c0_191] : memref<1x4x32x32xf32, #tpu.memory_space<vmem>>, vector<1x1x32x32xf32>
    %1194 = vector.shape_cast %1193 : vector<1x1x32x32xf32> to vector<32x32xf32>
    %1195 = vector.shape_cast %1192 : vector<32x32xf32> to vector<1x1x32x32xf32>
    tpu.vector_store %arg4[%c0_188, %c3_189, %c0_190, %c0_191], %1195 {strides = array<i32>} : memref<1x4x32x32xf32, #tpu.memory_space<vmem>>, vector<1x1x32x32xf32>,
    return
  }
  func.func @transform_0(%arg0: i32) -> i32 {
    %c0_i32 = arith.constant 0 : i32
    %c0_i32_0 = arith.constant 0 : i32
    return %c0_i32 : i32
  }
  func.func @transform_1(%arg0: i32) -> i32 {
    %c0_i32 = arith.constant 0 : i32
    %c0_i32_0 = arith.constant 0 : i32
    return %c0_i32 : i32
  }
  func.func @transform_2(%arg0: i32) -> (i32, i32, i32, i32) {
    %c0_i32 = arith.constant 0 : i32
    %c0_i32_0 = arith.constant 0 : i32
    %c0_i32_1 = arith.constant 0 : i32
    %c0_i32_2 = arith.constant 0 : i32
    return %arg0, %c0_i32, %c0_i32_0, %c0_i32_1 : i32, i32, i32, i32
  }
  func.func @transform_3(%arg0: i32) -> (i32, i32, i32, i32) {
    %c0_i32 = arith.constant 0 : i32
    %c0_i32_0 = arith.constant 0 : i32
    %c0_i32_1 = arith.constant 0 : i32
    %c0_i32_2 = arith.constant 0 : i32
    return %arg0, %c0_i32, %c0_i32_0, %c0_i32_1 : i32, i32, i32, i32
  }
}

</mosaic_0001>

<bundles_post_ra>
// kernel: tpu_custom_call.1
= control target key start
LH: loop header
LB: loop body
LE: loop exit
PB: predicated region body
PF: predicated region fallthrough
CT: control target
= control target key end

     0   :  { %8 = vsyncpa [#allocation4], 0  ;;  %s8358_s0 = inlined_call_operand.vmem [shape: f32[256], index: 0, kind: input, shape index: {}]   ;;  %s8359_s1 = inlined_call_operand.vmem [shape: f32[4], index: 1, kind: input, shape index: {}]   ;;  %s8360_s2 = inlined_call_operand.vmem [shape: f32[2,4,18,18], index: 2, kind: input, shape index: {}]   ;;  %s8361_s3 = inlined_call_operand.hbm [shape: f32[2,4,32,32], index: 3, kind: output, shape index: {}]  }
   0x1   :  { %9 = vsyncpa [#allocation6], 0 }
   0x2   :  { %10 = vsyncpa [#allocation3], 0 }
   0x3   :  { %12 = vsyncpa [#allocation3 + $0x1], 0  ;;  %s5973_s12 = smov 0   ;;  %s5975_s13 = smov 0  }
   0x4   :  { %s5977_s14 = smov 0   ;;  %s5979_s15 = smov 0  }
   0x5 LB: > { %s5994_s16 = sadd.s32 4294967295, %s5943_s15   ;;  %s4991_s17 = sadd.s32 4294967294, %s5943_s15   ;;  %s5943_s15 = sphi %s5979_s15, %s8467_s15   ;;  %s5939_s14 = sphi %s5977_s14, %s8466_s14   ;;  %s5935_s13 = sphi %s5975_s13, %s8465_s13   ;;  %s5931_s12 = sphi %s5973_s12, %s8464_s12  }
   0x6   : > { %s5998_s18 = sadd.s32 1, %s5943_s15   ;;  %s93_s19 = sadd.s32 1, %s5939_s14 }
   0x7   : > { %s90_s20 = ssub.s32 %s5943_s15, %s5998_s18  ;;  %p103_p0 = scmp.ne.s32.totalorder %s5939_s14, %s5935_s13 }
   0x8   : > { %p91_p1 = scmp.eq.s32.totalorder %s90_s20, 0  ;;  %p104_p2 = scmp.eq.s32.totalorder %s5994_s16, 1 }
   0x9   : > { %p109_p3 = scmp.ne.s32.totalorder %s5935_s13, %s5931_s12  ;;  %p110_p4 = scmp.eq.s32.totalorder %s4991_s17, 1 }
   0xa   : > { %s6009_s21 = scalar_select %p91_p1, %s5939_s14, %s93_s19  }
   0xb   : > { %p6011_p5 = por %p104_p2, %p103_p0  ;;  %p6015_p6 = por %p110_p4, %p109_p3 }
   0xc   : > { %p4992_p7 = scmp.ge.s32.totalorder %s5943_s15, 1  ;;  %p117_p8 = scmp.lt.s32.totalorder %s5943_s15, 3 }
   0xd   : > { %s8402_s22 = scalar_select %p6011_p5, 1, 0 }
   0xe   : > { %s8403_s23 = scalar_select %p6015_p6, 1, 0 }
   0xf   : > { %p8362_p9 = scmp.eq.s32.totalorder %s5994_s16, 0  ;;  %p6022_p10 = pnand %p4992_p7, %p117_p8 }
  0x10   : > { %s130_s27 = sshll.u32 %s8358_s0, 4  ;;  %s141_s30 = sshll.u32 %s8359_s1, 4  ;;  %s131_s27 = int_to_ptr.vmem [resolvable:$true] %s130_s27  ;;  %s142_s30 = int_to_ptr.vmem [resolvable:$true] %s141_s30 }
  0x11   : > { %s8404_s24 = scalar_select %p6022_p10, 1, 0 }
  0x12   : > { %p5718_p11 = pneg %p6022_p10  ;;  %s5845_s5 = scalar_lea.vmem %s131_s27, 32 }
  0x13   : > { %p5846_p13 = scmp.ne.s32.totalorder %s131_s27, %s5845_s5  ;;  %p5853_p3 = scmp.lt.s32.totalorder %s131_s27, %s131_s27 }
  0x14   : > { %p6036_p12 = pnand %p8362_p9, %p5718_p11  ;;  %p5854_p4 = scmp.lt.s32.totalorder %s5845_s5, %s5845_s5 }
  0x16   : > { %p5847_p0 = pneg %p6036_p12  ;;  %p5855_p7 = por %p5854_p4, %p5853_p3 }
  0x18   : > { %p5848_p1 = pnand %p5847_p0, %p5846_p13 }
  0x1a   : > { %p5849_p2 = pneg %p5848_p1 }
  0x1c   : > { %p5856_p8 = pnand %p5855_p7, %p5849_p2 }
  0x1e   : > { %5859 = shalt.err (!%p5856_p8)
}
  0x1f   : > { %s5945_s6 = smov [#allocation2]   ;;  %s5860_s7 = scalar_lea.vmem %s142_s30, 16 }
  0x20   : > { %5721 = dma.vmem_to_smem (!%p6036_p12), %s131_s27, 32, %s5945_s6, [#allocation4]  }
  0x21   : > { %p5861_p11 = scmp.ne.s32.totalorder %s142_s30, %s5860_s7  ;;  %p5868_p5 = scmp.lt.s32.totalorder %s142_s30, %s142_s30 }
  0x22   : > { %p5869_p10 = scmp.lt.s32.totalorder %s5860_s7, %s5860_s7 }
  0x23   : > { %p5863_p9 = pnand %p5861_p11, %p5847_p0 }
  0x24   : > { %p5870_p13 = por %p5869_p10, %p5868_p5 }
  0x25   : > { %p5864_p6 = pneg %p5863_p9 }
  0x27   : > { %p5871_p1 = pnand %p5870_p13, %p5864_p6 }
  0x29   : > { %5874 = shalt.err (!%p5871_p1)
}
  0x2a   : > { %s5946_s8 = smov [#allocation5]   ;;  %p8406_p2 = scmp.ne.s32.totalorder %s8404_s24, 0 }
  0x2b   : > { %5724 = dma.vmem_to_smem (!%p6036_p12), %s142_s30, 16, %s5946_s8, [#allocation6]  }
  0x2c   : > { %162 = sbr.rel (%p8406_p2) target bundleno = 1410 (0x582), region = 32 }
  0x31   : > { %p8407_p3 = scmp.eq.s32.totalorder %s5994_s16, 0 }
  0x33   : > { %5918 = dma.done.wait (%p8407_p3), [#allocation4], 32   ;;  %p8408_p4 = pmov %p8407_p3 }
  0x34   : > { %p8409_p9 = pmov %p8407_p3 }
  0x35   : > { %5920 = vsyncadd (%p8408_p4), [#allocation4], 4294967264 }
  0x36   : > { %5922 = dma.done.wait (%p8409_p9), [#allocation6], 16   ;;  %p8410_p5 = pmov %p8407_p3 }
  0x38   : > { %5924 = vsyncadd (%p8410_p5), [#allocation6], 4294967280 }
  0x39   : > { %172 = sfence }
  0x3a   : > { %p191_p6 = scmp.lt.s32.totalorder %s5994_s16, 1  ;;  %s5055_s9 = sld [smem:[#allocation2 + $0x70]]  ;;  %vm2846_vm4 = vcmask 130048   ;;  %vm3367_vm13 = vcmask 261120  }
  0x3b   : > { %s5027_s11 = sld [smem:[#allocation2 + $0x50]]  ;;  %s5947_s28 = smov 127  }
  0x3c   : > { %s192_s10 = scalar_select %p191_p6, %s5994_s16, 1 }
  0x3d   : > { %s5059_s19 = sld [smem:[#allocation2 + $0xd0]]  ;;  %p8462_p12 = scmp.ne.s32.totalorder %s8402_s22, 0 }
  0x3e   : > { %s5707_s17 = smul.u32 96, %s192_s10  ;;  %s6069_s26 = sld [smem:[#allocation2 + $0x51]] }
  0x3f   : > { %s6075_s27 = sld [smem:[#allocation2 + $0xf0]] }
  0x40   : > { %s6061_s25 = scalar_lea.vmem %s8360_s2, %s5707_s17  ;;  %v626_v1 = vstv %s5055_s9  ;;  %s5127_s29 = sld [smem:[#allocation2 + $0xd1]] }
  0x41   : > { %v6064_v0 = vld [vmem:[%s6061_s25 + $0x1] sm:$0xff]  ;;  %v360_v5 = vstv %s5027_s11  ;;  %v6080_v8 = vld [vmem:[%s6061_s25 + $0x9] sm:$0xff]  ;;  %v6088_v12 = vld [vmem:[%s6061_s25 + $0x18] sm:$0xff]  ;;  %s5123_s30 = sld [smem:[#allocation2 + $0x71]] }
  0x42   : > { %v6067_v2 = vld [vmem:[%s6061_s25] sm:$0xff]  ;;  %v627_v3 = vmul.f32 %v626_v1, %v6064_v0  ;;  %v6073_v4 = vld [vmem:[%s6061_s25 + $0x8] sm:$0xff]  ;;  %v628_v14 = vmul.f32 %v626_v1, %v6080_v8  ;;  %s5163_s4 = sld [smem:[#allocation2 + $0x52]]  ;;  %v6124_v30 = vld [vmem:[%s6061_s25 + $0x30] sm:$0xff] }
  0x43   : > { %v361_v6 = vmul.f32 %v360_v5, %v6067_v2  ;;  %v682_v7 = vstv %s5059_s19  ;;  %v362_v10 = vmul.f32 %v360_v5, %v6073_v4  ;;  %v6094_v15 = vld [vmem:[%s6061_s25 + $0x2] sm:$0xff]  ;;  %v6105_v20 = vld [vmem:[%s6061_s25 + $0xa] sm:$0xff]  ;;  %v6110_v22 = vld [vmem:[%s6061_s25 + $0x19] sm:$0xff]  ;;  %s5145_s5 = sld [smem:[#allocation2 + $0xf1]] }
  0x44   : > { %631 = vrot.lane.b32.xlu1 %v627_v3, %s5947_s28  ;;  %v683_v9 = vmul.f32 %v682_v7, %v6064_v0  ;;  %v684_v11 = vmul.f32 %v682_v7, %v6080_v8  ;;  %v1007_v13 = vstv %s6069_s26  ;;  %v6100_v18 = vld [vmem:[%s6061_s25 + $0x20] sm:$0xff]  ;;  %s5197_s6 = sld [smem:[#allocation2 + $0xd2]]  ;;  %v6134_v36 = vld [vmem:[%s6061_s25 + $0x38] sm:$0xff] }
  0x45   : > { %365 = vrot.lane.b32.xlu0 %v361_v6, %s5947_s28  ;;  %v844_v16 = vstv %s6075_s27  ;;  %v1008_v17 = vmul.f32 %v6088_v12, %v1007_v13  ;;  %v1009_v21 = vmul.f32 %v6100_v18, %v1007_v13  ;;  %v6117_v27 = vld [vmem:[%s6061_s25 + $0x21] sm:$0xff]  ;;  %s5193_s7 = sld [smem:[#allocation2 + $0x72]]  ;;  %v6144_v40 = vld [vmem:[%s6061_s25 + $0x31] sm:$0xff] }
  0x46   : > { %v845_v19 = vmul.f32 %v844_v16, %v6094_v15  ;;  %v1329_v23 = vstv %s5127_s29  ;;  %v846_v24 = vmul.f32 %v844_v16, %v6105_v20  ;;  %v6129_v33 = vld [vmem:[%s6061_s25 + $0x1a] sm:$0xff]  ;;  %v6139_v38 = vld [vmem:[%s6061_s25 + $0x22] sm:$0xff]  ;;  %s5233_s8 = sld [smem:[#allocation2 + $0x53]]  ;;  %v6163_v51 = vld [vmem:[%s6061_s25 + $0x32] sm:$0xff] }
  0x47   : > { %v1273_v25 = vstv %s5123_s30  ;;  %v1330_v26 = vmul.f32 %v6110_v22, %v1329_v23  ;;  %v1331_v29 = vmul.f32 %v6117_v27, %v1329_v23  ;;  %s5215_s9 = sld [smem:[#allocation2 + $0xf2]]  ;;  %v6151_v45 = vld [vmem:[%s6061_s25 + $0x39] sm:$0xff]  ;;  %v6158_v48 = vld [vmem:[%s6061_s25 + $0x48] sm:$0xff]  ;;  %v6168_v54 = vld [vmem:[%s6061_s25 + $0x50] sm:$0xff] }
  0x48   : > { %687 = vrot.lane.b32.xlu1 %v683_v9, %s5947_s28  ;;  %v1274_v28 = vmul.f32 %v6110_v22, %v1273_v25  ;;  %v1654_v31 = vstv %s5163_s4  ;;  %v1275_v32 = vmul.f32 %v6117_v27, %v1273_v25  ;;  %s5267_s10 = sld [smem:[#allocation2 + $0xd3]]  ;;  %v6173_v56 = vld [vmem:[%s6061_s25 + $0x3a] sm:$0xff]  ;;  %v6178_v58 = vld [vmem:[%s6061_s25 + $0x49] sm:$0xff] }
  0x49   : > { %367 = vrot.lane.b32.xlu0 %v362_v10, %s5947_s28  ;;  %v1491_v34 = vstv %s5145_s5  ;;  %v1655_v35 = vmul.f32 %v6124_v30, %v1654_v31  ;;  %v1656_v39 = vmul.f32 %v6134_v36, %v1654_v31  ;;  %s5263_s11 = sld [smem:[#allocation2 + $0x73]]  ;;  %v6185_v63 = vld [vmem:[%s6061_s25 + $0x51] sm:$0xff] }
  0x4a   : > { %v1492_v37 = vmul.f32 %v6129_v33, %v1491_v34  ;;  %v1976_v41 = vstv %s5197_s6  ;;  %v1493_v42 = vmul.f32 %v6139_v38, %v1491_v34  ;;  %s5285_s17 = sld [smem:[#allocation2 + $0xf3]]  ;;  %v6192_v5 = vld [vmem:[%s6061_s25 + $0x52] sm:$0xff]  ;;  %v6197_v9 = vld [vmem:[%s6061_s25 + $0x4a] sm:$0xff] }
  0x4b   : > { %v1920_v43 = vstv %s5193_s7  ;;  %v1977_v44 = vmul.f32 %v6144_v40, %v1976_v41  ;;  %v1978_v47 = vmul.f32 %v6151_v45, %v1976_v41  ;;  %s5019_s19 = sld [smem:[#allocation2 + $0x10]] }
  0x4c   : > { %689 = vrot.lane.b32.xlu1 %v684_v11, %s5947_s28  ;;  %v1921_v46 = vmul.f32 %v6144_v40, %v1920_v43  ;;  %v2301_v49 = vstv %s5233_s8  ;;  %v1922_v50 = vmul.f32 %v6151_v45, %v1920_v43  ;;  %s5047_s20 = sld [smem:[#allocation2 + $0x90]] }
  0x4d   : > { %633 = vrot.lane.b32.xlu0 %v628_v14, %s5947_s28  ;;  %v2138_v52 = vstv %s5215_s9  ;;  %v2302_v53 = vmul.f32 %v6158_v48, %v2301_v49  ;;  %v2303_v57 = vmul.f32 %v6168_v54, %v2301_v49  ;;  %s5039_s24 = sld [smem:[#allocation2 + $0x30]] }
  0x4e   : > { %v2139_v55 = vmul.f32 %v6163_v51, %v2138_v52  ;;  %v2623_v59 = vstv %s5267_s10  ;;  %v2140_v60 = vmul.f32 %v6173_v56, %v2138_v52  ;;  %s5085_s26 = sld [smem:[#allocation2 + $0x11]] }
  0x4f   : > { %v2567_v61 = vstv %s5263_s11  ;;  %v2624_v62 = vmul.f32 %v6178_v58, %v2623_v59  ;;  %v2625_v3 = vmul.f32 %v6185_v63, %v2623_v59  ;;  %s5067_s27 = sld [smem:[#allocation2 + $0xb0]] }
  0x50   : > { %1012 = vrot.lane.b32.xlu1 %v1008_v17, %s5947_s28  ;;  %v2568_v1 = vmul.f32 %v6178_v58, %v2567_v61  ;;  %v2785_v6 = vstv %s5285_s17  ;;  %v2569_v7 = vmul.f32 %v6185_v63, %v2567_v61  ;;  %s5115_s29 = sld [smem:[#allocation2 + $0x91]] }
  0x51   : > { %849 = vrot.lane.b32.xlu0 %v845_v19, %s5947_s28  ;;  %v2787_v10 = vmul.f32 %v6192_v5, %v2785_v6  ;;  %v2786_v11 = vmul.f32 %v6197_v9, %v2785_v6  ;;  %v280_v13 = vstv %s5019_s19  ;;  %s5107_s30 = sld [smem:[#allocation2 + $0x31]] }
  0x52   : > { %v282_v14 = vmul.f32 %v280_v13, %v6073_v4  ;;  %v546_v16 = vstv %s5047_s20  ;;  %v281_v17 = vmul.f32 %v280_v13, %v6067_v2  ;;  %s5155_s4 = sld [smem:[#allocation2 + $0x12]] }
  0x53   : > { %v466_v19 = vstv %s5039_s24  ;;  %s5137_s5 = sld [smem:[#allocation2 + $0xb1]] }
  0x54   : > { %1014 = vrot.lane.b32.xlu1 %v1009_v21, %s5947_s28  ;;  %v547_v21 = vmul.f32 %v546_v16, %v6064_v0  ;;  %v467_v23 = vmul.f32 %v466_v19, %v6064_v0  ;;  %v927_v25 = vstv %s5085_s26  ;;  %s5185_s6 = sld [smem:[#allocation2 + $0x92]] }
  0x55   : > { %851 = vrot.lane.b32.xlu0 %v846_v24, %s5947_s28  ;;  %v548_v24 = vmul.f32 %v546_v16, %v6080_v8  ;;  %s5177_s7 = sld [smem:[#allocation2 + $0x32]] }
  0x56   : > { %v1193_v34 = vstv %s5115_s29  ;;  %s5225_s8 = sld [smem:[#allocation2 + $0x13]] }
  0x57   : > { %s5207_s9 = sld [smem:[#allocation2 + $0xb2]] }
  0x58   : > { %1334 = vrot.lane.b32.xlu1 %v1330_v26, %s5947_s28  ;;  %v468_v26 = vmul.f32 %v466_v19, %v6080_v8  ;;  %v1574_v43 = vstv %s5155_s4  ;;  %s5255_s10 = sld [smem:[#allocation2 + $0x93]] }
  0x59   : > { %1278 = vrot.lane.b32.xlu0 %v1274_v28, %s5947_s28  ;;  %v764_v28 = vstv %s5067_s27  ;;  %s6247_s11 = sld [smem:[#allocation2 + $0x33]] }
  0x5a   : > { %v765_v31 = vmul.f32 %v764_v28, %v6094_v15  ;;  %v1840_v52 = vstv %s5185_s6  ;;  %s6251_s17 = sld [smem:[#allocation2 + $0x40]] }
  0x5b   : > { %s245_s19 = sld [smem:[#allocation5]] }
  0x5c   : > { %1336 = vrot.lane.b32.xlu1 %v1331_v29, %s5947_s28  ;;  %v928_v29 = vmul.f32 %v6088_v12, %v927_v25  ;;  %v2221_v61 = vstv %s5225_s8  ;;  %s6260_s20 = sld [smem:[#allocation2 + $0xb3]] }
  0x5d   : > { %1280 = vrot.lane.b32.xlu0 %v1275_v32, %s5947_s28  ;;  %v929_v32 = vmul.f32 %v6100_v18, %v927_v25  ;;  %s6267_s24 = sld [smem:[#allocation2 + $0x60]] }
  0x5e   : > { %s6271_s26 = sld [smem:[#allocation2 + $0xc0]] }
  0x5f   : > { %v2407_v13 = vstv %s6247_s11  ;;  %s6295_s27 = sld [smem:[#allocation2 + $0x41]] }
  0x60   : > { %1659 = vrot.lane.b32.xlu1 %v1655_v35, %s5947_s28  ;;  %v766_v35 = vmul.f32 %v764_v28, %v6105_v20  ;;  %v2408_v19 = vmul.f32 %v6178_v58, %v2407_v13  ;;  %s6314_s29 = sld [smem:[#allocation2 + $0xe0]] }
  0x61   : > { %1496 = vrot.lane.b32.xlu0 %v1492_v37, %s5947_s28  ;;  %v1113_v37 = vstv %s5107_s30  ;;  %v6278_v28 = vstv %s245_s19  ;;  %s6337_s30 = sld [smem:[#allocation2 + $0x61]] }
  0x62   : > { %v1114_v41 = vmul.f32 %v6110_v22, %v1113_v37  ;;  %s6340_s4 = sld [smem:[#allocation2 + $0xc1]] }
  0x63   : > { %s6352_s6 = sld [smem:[#allocation2 + $0xe1]] }
  0x64   : > { %1661 = vrot.lane.b32.xlu1 %v1656_v39, %s5947_s28  ;;  %v1194_v39 = vmul.f32 %v6110_v22, %v1193_v34  ;;  %s6362_s8 = sld [smem:[#allocation2 + $0xc2]] }
  0x65   : > { %1498 = vrot.lane.b32.xlu0 %v1493_v42, %s5947_s28  ;;  %v1195_v42 = vmul.f32 %v6117_v27, %v1193_v34  ;;  %s6379_s11 = sld [smem:[#allocation2 + $0x63]] }
  0x66   : > { %s6411_s19 = sld [smem:[#allocation2 + $0xe3]] }
  0x68   : > { %1981 = vrot.lane.b32.xlu1 %v1977_v44, %s5947_s28  ;;  %v1115_v44 = vmul.f32 %v6117_v27, %v1113_v37 }
  0x69   : > { %1925 = vrot.lane.b32.xlu0 %v1921_v46, %s5947_s28  ;;  %v1411_v46 = vstv %s5137_s5  ;;  %s6349_s5 = sld [smem:[#allocation2 + $0x42]] }
  0x6a   : > { %v1412_v49 = vmul.f32 %v6129_v33, %v1411_v46 }
  0x6c   : > { %1983 = vrot.lane.b32.xlu1 %v1978_v47, %s5947_s28  ;;  %v1575_v47 = vmul.f32 %v6124_v30, %v1574_v43 }
  0x6d   : > { %1927 = vrot.lane.b32.xlu0 %v1922_v50, %s5947_s28  ;;  %v1576_v50 = vmul.f32 %v6134_v36, %v1574_v43 }
  0x70   : > { %2306 = vrot.lane.b32.xlu1 %v2302_v53, %s5947_s28  ;;  %v1413_v53 = vmul.f32 %v6139_v38, %v1411_v46  ;;  %v522_v46 = vstv %s6267_s24  ;;  %s6429_s24 = sld [smem:[#allocation2 + $0x80]] }
  0x71   : > { %2143 = vrot.lane.b32.xlu0 %v2139_v55, %s5947_s28  ;;  %v1760_v55 = vstv %s5177_s7  ;;  %s6359_s7 = sld [smem:[#allocation2 + $0x62]] }
  0x72   : > { %v1761_v59 = vmul.f32 %v6144_v40, %v1760_v55 }
  0x74   : > { %2308 = vrot.lane.b32.xlu1 %v2303_v57, %s5947_s28  ;;  %v1841_v57 = vmul.f32 %v6144_v40, %v1840_v52 }
  0x75   : > { %2145 = vrot.lane.b32.xlu0 %v2140_v60, %s5947_s28  ;;  %v1842_v60 = vmul.f32 %v6151_v45, %v1840_v52 }
  0x78   : > { %2628 = vrot.lane.b32.xlu1 %v2624_v62, %s5947_s28  ;;  %v1762_v62 = vmul.f32 %v6151_v45, %v1760_v55  ;;  %v8365_v55 = vmov 1.0  }
  0x79   : > { %2572 = vrot.lane.b32.xlu0 %v2568_v1, %s5947_s28  ;;  %v2058_v1 = vstv %s5207_s9  ;;  %s6368_s9 = sld [smem:[#allocation2 + $0x43]] }
  0x7a   : > { %v2059_v6 = vmul.f32 %v6163_v51, %v2058_v1 }
  0x7c   : > { %2630 = vrot.lane.b32.xlu1 %v2625_v3, %s5947_s28  ;;  %v2222_v3 = vmul.f32 %v6158_v48, %v2221_v61 }
  0x7d   : > { %2574 = vrot.lane.b32.xlu0 %v2569_v7, %s5947_s28  ;;  %v2223_v7 = vmul.f32 %v6168_v54, %v2221_v61 }
  0x80   : > { %2792 = vrot.lane.b32.xlu1 %v2787_v10, %s5947_s28  ;;  %v2487_v10 = vstv %s5255_s10  ;;  %s6372_s10 = sld [smem:[#allocation2 + $0xe2]] }
  0x81   : > { %2790 = vrot.lane.b32.xlu0 %v2786_v11, %s5947_s28  ;;  %v2060_v11 = vmul.f32 %v6173_v56, %v2058_v1 }
  0x84   : > { %287 = vrot.lane.b32.xlu1 %v282_v14, %s5947_s28  ;;  %v2488_v14 = vmul.f32 %v6178_v58, %v2487_v10 }
  0x85   : > { %285 = vrot.lane.b32.xlu0 %v281_v17, %s5947_s28  ;;  %v336_v17 = vstv %s6251_s17  ;;  %s6383_s17 = sld [smem:[#allocation2 + $0xc3]] }
  0x88   : > { %551 = vrot.lane.b32.xlu1 %v547_v21, %s5947_s28  ;;  %v196_v21 = vlaneseq }
  0x89   : > { %471 = vrot.lane.b32.xlu0 %v467_v23, %s5947_s28 }
  0x8a   : > { %v6275_v25 = vshrl.u32 %v196_v21, 7  ;;  %v6285_v34 = vand.u32 127, %v196_v21  ;;  %v820_v21 = vstv %s6314_s29  ;;  %s6441_s29 = sld [smem:[#allocation2 + $0x74]] }
  0x8c   : > { %553 = vrot.lane.b32.xlu1 %v548_v24, %s5947_s28  ;;  %v2489_v24 = vmul.f32 %v6185_v63, %v2487_v10  ;;  %v229_v37 = vmul.u32 2, %v6275_v25 }
  0x8d   : > { %473 = vrot.lane.b32.xlu0 %v468_v26, %s5947_s28  ;;  %v337_v26 = vmul.f32 %v336_v17, %v6067_v2 }
  0x8e   : > { %vm6309_vm1 = vcmp.eq.s32.totalorder %v6285_v34, %v229_v37 }
  0x8f   : > { %v339_v43 = vadd.f32 %v337_v26, %v6278_v28 }
  0x90   : > { %932 = vrot.lane.b32.xlu1 %v928_v29, %s5947_s28 }
  0x91   : > { %769 = vrot.lane.b32.xlu0 %v765_v31, %s5947_s28  ;;  %v2409_v31 = vmul.f32 %v6185_v63, %v2407_v13 }
  0x94   : > { %934 = vrot.lane.b32.xlu1 %v929_v32, %s5947_s28  ;;  %v6283_v32 = vadd.s32 8, %v6275_v25 }
  0x95   : > { %771 = vrot.lane.b32.xlu0 %v766_v35, %s5947_s28  ;;  %v2705_v35 = vstv %s6260_s20  ;;  %s6421_s20 = sld [smem:[#allocation2]] }
  0x98   : > { %1198 = vrot.lane.b32.xlu1 %v1194_v39, %s5947_s28 }
  0x99   : > { %1118 = vrot.lane.b32.xlu0 %v1114_v41, %s5947_s28  ;;  %v2707_v41 = vmul.f32 %v6192_v5, %v2705_v35 }
  0x9c   : > { %1200 = vrot.lane.b32.xlu1 %v1195_v42, %s5947_s28  ;;  %v230_v42 = vmul.u32 2, %v6283_v32 }
  0x9d   : > { %1120 = vrot.lane.b32.xlu0 %v1115_v44, %s5947_s28  ;;  %v338_v44 = vmul.f32 %v336_v17, %v6073_v4 }
  0x9e   : > { %vm6302_vm0 = vcmp.eq.s32.totalorder %v6285_v34, %v230_v42 }
  0x9f   : > { %5522 = vmatprep.subr.msk.mxu1 %vm6302_vm0, %v8365_v55  ;;  %v340_v61 = vadd.f32 %v338_v44, %v6278_v28  ;;  %v822_v44 = vmul.f32 %v820_v21, %v6105_v20 }
  0xa0   : > { %1579 = vrot.lane.b32.xlu1 %v1575_v47, %s5947_s28  ;;  %5523 = vmatpush3.msk.msra.mxu1 %vm6302_vm0, %v8365_v55 }
  0xa1   : > { %1416 = vrot.lane.b32.xlu0 %v1412_v49, %s5947_s28  ;;  %v2706_v49 = vmul.f32 %v6197_v9, %v2705_v35  ;;  %5524 = vmatprep.subr.msk.mxu1 %vm6309_vm1, %v8365_v55 }
  0xa2   : > { %5525 = vmatpush3.msk.msra.mxu1 %vm6309_vm1, %v8365_v55 }
  0xa3   : > { %5536 = vmatprep.subr.msk.mxu1 %vm6302_vm0, %v8365_v55 }
  0xa4   : > { %1581 = vrot.lane.b32.xlu1 %v1576_v50, %s5947_s28 }
  0xa5   : > { %1418 = vrot.lane.b32.xlu0 %v1413_v53, %s5947_s28  ;;  %v602_v53 = vstv %s6271_s26  ;;  %s6432_s26 = sld [smem:[#allocation2 + $0x54]] }
  0xa8   : > { %1845 = vrot.lane.b32.xlu1 %v1841_v57, %s5947_s28 }
  0xa9   : > { %1765 = vrot.lane.b32.xlu0 %v1761_v59, %s5947_s28  ;;  %v523_v59 = vmul.f32 %v522_v46, %v6064_v0 }
  0xac   : > { %1847 = vrot.lane.b32.xlu1 %v1842_v60, %s5947_s28 }
  0xad   : > { %1767 = vrot.lane.b32.xlu0 %v1762_v62, %s5947_s28  ;;  %v603_v62 = vmul.f32 %v602_v53, %v6064_v0 }
  0xaf   : > { %v605_v13 = vadd.f32 %v603_v62, %v6278_v28 }
  0xb0   : > { %2226 = vrot.lane.b32.xlu1 %v2222_v3, %s5947_s28  ;;  %v604_v3 = vmul.f32 %v602_v53, %v6080_v8 }
  0xb1   : > { %2063 = vrot.lane.b32.xlu0 %v2059_v6, %s5947_s28 }
  0xb4   : > { %2228 = vrot.lane.b32.xlu1 %v2223_v7, %s5947_s28 }
  0xb5   : > { %2065 = vrot.lane.b32.xlu0 %v2060_v11, %s5947_s28  ;;  %v524_v11 = vmul.f32 %v522_v46, %v6080_v8  ;;  %v1169_v46 = vstv %s6337_s30  ;;  %s6443_s30 = sld [smem:[#allocation2 + $0xd4]] }
  0xb6   : > { %v6264_v16 = vpop.permute.xlu1 %631 }
  0xb7   : > { %v366_v23 = vpop.permute.xlu0 %365 }
  0xb8   : > { %2492 = vrot.lane.b32.xlu1 %v2488_v14, %s5947_s28  ;;  %v371_v60 = vadd.f32 %v366_v23, %v339_v43  ;;  %v983_v14 = vstv %s6295_s27  ;;  %s6435_s27 = sld [smem:[#allocation2 + $0x20]] }
  0xb9   : > { %2412 = vrot.lane.b32.xlu0 %v2408_v19, %s5947_s28  ;;  %v606_v19 = vadd.f32 %v604_v3, %v6278_v28  ;;  %v984_v26 = vmul.f32 %v6088_v12, %v983_v14 }
  0xba   : > { %v688_v29 = vpop.permute.xlu1 %687  ;;  %v525_v7 = vadd.f32 %v523_v59, %v371_v60  ;;  %v985_v60 = vmul.f32 %v6100_v18, %v983_v14  ;;  %v1630_v14 = vstv %s6349_s5  ;;  %s6450_s5 = sld [smem:[#allocation2 + $0x1]] }
  0xbb   : > { %v368_v39 = vpop.permute.xlu0 %367  ;;  %v693_v35 = vadd.f32 %v688_v29, %v605_v13 }
  0xbc   : > { %2494 = vrot.lane.b32.xlu1 %v2489_v24, %s5947_s28  ;;  %v372_v10 = vadd.f32 %v368_v39, %v340_v61  ;;  %v821_v39 = vmul.f32 %v820_v21, %v6094_v15  ;;  %v1249_v61 = vstv %s6340_s4  ;;  %s6447_s4 = sld [smem:[#allocation2 + $0xa0]] }
  0xbd   : > { %2414 = vrot.lane.b32.xlu0 %v2409_v31, %s5947_s28  ;;  %v637_v31 = vadd.f32 %v6264_v16, %v525_v7  ;;  %v1170_v7 = vmul.f32 %v6110_v22, %v1169_v46 }
  0xbe   : > { %v690_v47 = vpop.permute.xlu1 %689  ;;  %v526_v24 = vadd.f32 %v524_v11, %v372_v10  ;;  %v823_v16 = vadd.f32 %v821_v39, %v693_v35  ;;  %v1250_v10 = vmul.f32 %v6110_v22, %v1249_v61 }
  0xbf   : > { %v634_v57 = vpop.permute.xlu0 %633  ;;  %v694_v43 = vadd.f32 %v690_v47, %v606_v19  ;;  %v986_v59 = vadd.f32 %v984_v26, %v637_v31  ;;  %v1251_v19 = vmul.f32 %v6117_v27, %v1249_v61  ;;  %v1171_v26 = vmul.f32 %v6117_v27, %v1169_v46 }
  0xc0   : > { %2712 = vrot.lane.b32.xlu1 %v2707_v41, %s5947_s28  ;;  %v638_v53 = vadd.f32 %v634_v57, %v526_v24  ;;  %v1467_v31 = vstv %s6352_s6  ;;  %s6455_s6 = sld [smem:[#allocation2 + $0xf4]] }
  0xc1   : > { %2710 = vrot.lane.b32.xlu0 %v2706_v49, %s5947_s28  ;;  %v824_v3 = vadd.f32 %v822_v44, %v694_v43  ;;  %v1631_v44 = vmul.f32 %v6124_v30, %v1630_v14  ;;  %v1469_v61 = vmul.f32 %v6139_v38, %v1467_v31 }
  0xc2   : > { %v1013_v1 = vpop.permute.xlu1 %1012  ;;  %v987_v13 = vadd.f32 %v985_v60, %v638_v53  ;;  %v1468_v53 = vmul.f32 %v6129_v33, %v1467_v31  ;;  %v2277_v31 = vstv %s6368_s9  ;;  %s6473_s9 = sld [smem:[#allocation2 + $0x81]] }
  0xc3   : > { %v850_v6 = vpop.permute.xlu0 %849  ;;  %v1018_v62 = vadd.f32 %v1013_v1, %v986_v59 }
  0xc4   : > { %v855_v47 = vadd.f32 %v850_v6, %v823_v16  ;;  %v1816_v16 = vstv %s6359_s7  ;;  %s6460_s7 = sld [smem:[#allocation2 + $0x55]] }
  0xc5   : > { %v1172_v1 = vadd.f32 %v1170_v7, %v1018_v62  ;;  %v1896_v7 = vstv %s6362_s8  ;;  %s6467_s8 = sld [smem:[#allocation2 + $0x21]] }
  0xc6   : > { %v1015_v17 = vpop.permute.xlu1 %1014  ;;  %v1252_v6 = vadd.f32 %v1250_v10, %v855_v47 }
  0xc7   : > { %v852_v23 = vpop.permute.xlu0 %851  ;;  %v1019_v24 = vadd.f32 %v1015_v17, %v987_v13 }
  0xc8   : > { %v856_v57 = vadd.f32 %v852_v23, %v824_v3  ;;  %v1632_v3 = vmul.f32 %v6134_v36, %v1630_v14 }
  0xc9   : > { %v1173_v17 = vadd.f32 %v1171_v26, %v1019_v24  ;;  %v1898_v26 = vmul.f32 %v6151_v45, %v1896_v7 }
  0xca   : > { %v1335_v41 = vpop.permute.xlu1 %1334  ;;  %v1253_v43 = vadd.f32 %v1251_v19, %v856_v57  ;;  %v1897_v19 = vmul.f32 %v6144_v40, %v1896_v7 }
  0xcb   : > { %v1279_v49 = vpop.permute.xlu0 %1278  ;;  %v1340_v23 = vadd.f32 %v1335_v41, %v1252_v6 }
  0xcc   : > { %v1284_v39 = vadd.f32 %v1279_v49, %v1172_v1 }
  0xcd   : > { %v1470_v47 = vadd.f32 %v1468_v53, %v1340_v23  ;;  %v2278_v53 = vmul.f32 %v6158_v48, %v2277_v31 }
  0xce   : > { %v1337_v29 = vpop.permute.xlu1 %1336  ;;  %v1633_v49 = vadd.f32 %v1631_v44, %v1284_v39 }
  0xcf   : > { %v1281_v11 = vpop.permute.xlu0 %1280  ;;  %v1341_v60 = vadd.f32 %v1337_v29, %v1253_v43  ;;  %v1817_v29 = vmul.f32 %v6144_v40, %v1816_v16  ;;  %v2114_v43 = vstv %s6372_s10  ;;  %s6484_s10 = sld [smem:[#allocation2 + $0x75]] }
  0xd0   : > { %v1285_v62 = vadd.f32 %v1281_v11, %v1173_v17 }
  0xd1   : > { %v1471_v13 = vadd.f32 %v1469_v61, %v1341_v60 }
  0xd2   : > { %v1660_v21 = vpop.permute.xlu1 %1659  ;;  %v1634_v1 = vadd.f32 %v1632_v3, %v1285_v62 }
  0xd3   : > { %v1497_v35 = vpop.permute.xlu0 %1496  ;;  %v1665_v41 = vadd.f32 %v1660_v21, %v1633_v49  ;;  %v1818_v21 = vmul.f32 %v6151_v45, %v1816_v16  ;;  %v2115_v16 = vmul.f32 %v6163_v51, %v2114_v43 }
  0xd4   : > { %v1502_v57 = vadd.f32 %v1497_v35, %v1470_v47  ;;  %v238_v35 = vadd.s32 1, %v230_v42  ;;  %v2116_v42 = vmul.f32 %v6173_v56, %v2114_v43  ;;  %v2463_v47 = vstv %s6379_s11  ;;  %s6487_s11 = sld [smem:[#allocation2 + $0xd5]] }
  0xd5   : > { %v1819_v39 = vadd.f32 %v1817_v29, %v1665_v41  ;;  %v2543_v29 = vstv %s6383_s17  ;;  %s6495_s17 = sld [smem:[#allocation2 + $0xa1]] }
  0xd6   : > { %v1662_v59 = vpop.permute.xlu1 %1661  ;;  %v1899_v44 = vadd.f32 %v1897_v19, %v1502_v57  ;;  %vm6391_vm2 = vcmp.eq.s32.totalorder %v6285_v34, %v238_v35 }
  0xd7   : > { %v1499_v46 = vpop.permute.xlu0 %1498  ;;  %v1666_v6 = vadd.f32 %v1662_v59, %v1634_v1  ;;  %v237_v59 = vadd.s32 1, %v229_v37  ;;  %5515 = vmatprep.subr.msk.mxu0 %vm6391_vm2, %v8365_v55 }
  0xd8   : > { %v1503_v11 = vadd.f32 %v1499_v46, %v1471_v13  ;;  %5516 = vmatpush3.msk.msra.mxu0 %vm6391_vm2, %v8365_v55  ;;  %v2279_v13 = vmul.f32 %v6168_v54, %v2277_v31  ;;  %v2544_v31 = vmul.f32 %v6178_v58, %v2543_v29 }
  0xd9   : > { %v1820_v3 = vadd.f32 %v1818_v21, %v1666_v6  ;;  %vm6406_vm3 = vcmp.eq.s32.totalorder %v6285_v34, %v237_v59 }
  0xda   : > { %v1982_v10 = vpop.permute.xlu1 %1981  ;;  %v1900_v17 = vadd.f32 %v1898_v26, %v1503_v11  ;;  %5517 = vmatprep.subr.msk.mxu0 %vm6406_vm3, %v8365_v55  ;;  %v2464_v11 = vmul.f32 %v6178_v58, %v2463_v47 }
  0xdb   : > { %v1926_v24 = vpop.permute.xlu0 %1925  ;;  %v1987_v62 = vadd.f32 %v1982_v10, %v1899_v44  ;;  %5518 = vmatpush3.msk.msra.mxu0 %vm6406_vm3, %v8365_v55 }
  0xdc   : > { %v1931_v60 = vadd.f32 %v1926_v24, %v1819_v39  ;;  %5529 = vmatprep.subr.msk.mxu0 %vm6391_vm2, %v8365_v55  ;;  %v2545_v39 = vmul.f32 %v6185_v63, %v2543_v29 }
  0xdd   : > { %v2117_v24 = vadd.f32 %v2115_v16, %v1987_v62  ;;  %v256_v62 = vstv %s6421_s20  ;;  %s6509_s20 = sld [smem:[#allocation2 + $0xf5]] }
  0xde   : > { %v1984_v14 = vpop.permute.xlu1 %1983  ;;  %v2280_v41 = vadd.f32 %v2278_v53, %v1931_v60  ;;  %v2761_v60 = vstv %s6411_s19  ;;  %s6501_s19 = sld [smem:[#allocation2 + $0x2]] }
  0xdf   : > { %v1928_v23 = vpop.permute.xlu0 %1927  ;;  %v1988_v49 = vadd.f32 %v1984_v14, %v1900_v17  ;;  %v2763_v16 = vmul.f32 %v6192_v5, %v2761_v60  ;;  %v257_v5 = vmul.f32 %v256_v62, %v6067_v2 }
  0xe0   : > { %v1932_v10 = vadd.f32 %v1928_v23, %v1820_v3  ;;  %v2465_v23 = vmul.f32 %v6185_v63, %v2463_v47  ;;  %v2762_v63 = vmul.f32 %v6197_v9, %v2761_v60 }
  0xe1   : > { %v2118_v1 = vadd.f32 %v2116_v42, %v1988_v49 }
  0xe2   : > { %v2307_v46 = vpop.permute.xlu1 %2306  ;;  %v2281_v21 = vadd.f32 %v2279_v13, %v1932_v10  ;;  %v258_v13 = vmul.f32 %v256_v62, %v6073_v4 }
  0xe3   : > { %v2144_v7 = vpop.permute.xlu0 %2143  ;;  %v2312_v19 = vadd.f32 %v2307_v46, %v2280_v41 }
  0xe4   : > { %v2149_v14 = vadd.f32 %v2144_v7, %v2117_v24 }
  0xe5   : > { %v2466_v44 = vadd.f32 %v2464_v11, %v2312_v19  ;;  %v418_v11 = vstv %s6435_s27  ;;  %s6525_s27 = sld [smem:[#allocation2 + $0x82]] }
  0xe6   : > { %v2309_v57 = vpop.permute.xlu1 %2308  ;;  %v2546_v17 = vadd.f32 %v2544_v31, %v2149_v14  ;;  %v259_v31 = vadd.f32 %v257_v5, %v6278_v28  ;;  %v260_v14 = vadd.f32 %v258_v13, %v6278_v28  ;;  %v420_v60 = vmul.f32 %v418_v11, %v6080_v8 }
  0xe7   : > { %v2146_v26 = vpop.permute.xlu0 %2145  ;;  %v2313_v35 = vadd.f32 %v2309_v57, %v2281_v21  ;;  %v442_v57 = vstv %s6429_s24  ;;  %s6511_s24 = sld [smem:[#allocation2 + $0x56]] }
  0xe8   : > { %v2150_v6 = vadd.f32 %v2146_v26, %v2118_v1  ;;  %v374_v1 = vstv %s6432_s26  ;;  %v443_v21 = vmul.f32 %v442_v57, %v6064_v0  ;;  %s6519_s26 = sld [smem:[#allocation2 + $0x22]] }
  0xe9   : > { %v2467_v7 = vadd.f32 %v2465_v23, %v2313_v35  ;;  %v419_v35 = vmul.f32 %v418_v11, %v6064_v0  ;;  %v696_v23 = vstv %s6443_s30  ;;  %v1065_v11 = vstv %s6467_s8  ;;  %s6535_s30 = sld [smem:[#allocation2 + $0xd6]] }
  0xea   : > { %v2629_v43 = vpop.permute.xlu1 %2628  ;;  %v2547_v46 = vadd.f32 %v2545_v39, %v2150_v6  ;;  %v375_v39 = vmul.f32 %v374_v1, %v6067_v2  ;;  %v740_v2 = vstv %s6447_s4  ;;  %s6543_s4 = sld [smem:[#allocation2 + $0x3]] }
  0xeb   : > { %v2573_v53 = vpop.permute.xlu0 %2572  ;;  %v2634_v49 = vadd.f32 %v2629_v43, %v2546_v17  ;;  %v376_v43 = vmul.f32 %v374_v1, %v6073_v4  ;;  %v444_v17 = vmul.f32 %v442_v57, %v6080_v8  ;;  %v903_v4 = vstv %s6450_s5  ;;  %s6549_s5 = sld [smem:[#allocation2 + $0xa2]] }
  0xec   : > { %v2578_v59 = vadd.f32 %v2573_v53, %v2466_v44  ;;  %v640_v44 = vstv %s6441_s29  ;;  %v904_v13 = vmul.f32 %v6088_v12, %v903_v4  ;;  %v858_v57 = vstv %s6455_s6  ;;  %s6533_s29 = sld [smem:[#allocation2 + $0x76]] }
  0xed   : > { %v2764_v19 = vadd.f32 %v2762_v63, %v2634_v49  ;;  %v641_v62 = vmul.f32 %v640_v44, %v6064_v0  ;;  %v697_v49 = vmul.f32 %v696_v23, %v6064_v0  ;;  %v446_v63 = vadd.f32 %v444_v17, %v6278_v28  ;;  %s6557_s6 = sld [smem:[#allocation2 + $0xf6]] }
  0xee   : > { %v2631_v42 = vpop.permute.xlu1 %2630  ;;  %2842 = vrot.lane.b32.xlu0 %v2578_v59, %s5947_s28  ;;  %v905_v1 = vmul.f32 %v6100_v18, %v903_v4  ;;  %v1067_v4 = vmul.f32 %v6117_v27, %v1065_v11  ;;  %s6567_s8 = sld [smem:[#allocation2 + $0x23]] }
  0xef   : > { %v2635_v3 = vadd.f32 %v2631_v42, %v2547_v46  ;;  %v2575_v47 = vpop.permute.xlu0 %2574 }
  0xf0   : > { %v2579_v10 = vadd.f32 %v2575_v47, %v2467_v7  ;;  %v741_v47 = vmul.f32 %v740_v2, %v6094_v15 }
  0xf1   : > { %v2765_v41 = vadd.f32 %v2763_v16, %v2635_v3  ;;  %v445_v16 = vadd.f32 %v443_v21, %v6278_v28  ;;  %v642_v28 = vmul.f32 %v640_v44, %v6080_v8  ;;  %v1066_v44 = vmul.f32 %v6110_v22, %v1065_v11 }
  0xf2   : > { %v2793_v29 = vpop.permute.xlu1 %2792  ;;  %2844 = vrot.lane.b32.xlu1 %v2579_v10, %s5947_s28  ;;  %v1668_v11 = vstv %s6511_s24  ;;  %s6650_s24 = sld [smem:[#allocation2 + $0x34]] }
  0xf3   : > { %v2797_v9 = vadd.f32 %v2793_v29, %v2765_v41  ;;  %v2791_v24 = vpop.permute.xlu0 %2790  ;;  %v698_v29 = vmul.f32 %v696_v23, %v6080_v8  ;;  %v859_v8 = vmul.f32 %v858_v57, %v6094_v15 }
  0xf4   : > { %v2796_v26 = vadd.f32 %v2791_v24, %v2764_v19  ;;  %v742_v24 = vmul.f32 %v740_v2, %v6105_v20  ;;  %v1343_v2 = vstv %s6487_s11  ;;  %s6589_s11 = sld [smem:[#allocation2 + $0xd7]] }
  0xf6   : > { %v288_v6 = vpop.permute.xlu1 %287  ;;  %3011 = vrot.lane.b32.xlu1 %v2797_v9, %s5947_s28  ;;  %3009 = vrot.lane.b32.xlu0 %v2796_v26, %s5947_s28  ;;  %v1021_v9 = vstv %s6460_s7  ;;  %v1089_v26 = vstv %s6473_s9  ;;  %s6559_s7 = sld [smem:[#allocation2 + $0x57]] }
  0xf7   : > { %v286_v53 = vpop.permute.xlu0 %285  ;;  %v292_v46 = vadd.f32 %v288_v6, %v260_v14  ;;  %v1090_v23 = vmul.f32 %v6110_v22, %v1089_v26  ;;  %s6573_s9 = sld [smem:[#allocation2 + $0x83]] }
  0xf8   : > { %v291_v59 = vadd.f32 %v286_v53, %v259_v31 }
  0xf9   : > { %v422_v5 = vadd.f32 %v420_v60, %v292_v46  ;;  %v1023_v46 = vmul.f32 %v6100_v18, %v1021_v9 }
  0xfa   : > { %v552_v42 = vpop.permute.xlu1 %551  ;;  %379 = vrot.lane.b32.xlu0 %v375_v39, %s5947_s28  ;;  %381 = vrot.lane.b32.xlu1 %v376_v43, %s5947_s28  ;;  %v421_v3 = vadd.f32 %v419_v35, %v291_v59  ;;  %v1022_v43 = vmul.f32 %v6088_v12, %v1021_v9  ;;  %v860_v12 = vmul.f32 %v858_v57, %v6105_v20 }
  0xfb   : > { %v472_v7 = vpop.permute.xlu0 %471  ;;  %v557_v41 = vadd.f32 %v552_v42, %v445_v16  ;;  %v1287_v16 = vstv %s6484_s10  ;;  %s6581_s10 = sld [smem:[#allocation2 + $0x77]] }
  0xfc   : > { %v477_v10 = vadd.f32 %v472_v7, %v421_v3  ;;  %v1550_v3 = vstv %s6501_s19  ;;  %v1288_v18 = vmul.f32 %v6110_v22, %v1287_v16  ;;  %s6625_s19 = sld [smem:[#allocation2 + $0xf7]] }
  0xfd   : > { %v743_v21 = vadd.f32 %v741_v47, %v557_v41  ;;  %v1344_v41 = vmul.f32 %v6110_v22, %v1343_v2  ;;  %v1289_v22 = vmul.f32 %v6117_v27, %v1287_v16  ;;  %v1670_v16 = vmul.f32 %v6134_v36, %v1668_v11 }
  0xfe   : > { %v554_v0 = vpop.permute.xlu1 %553  ;;  %645 = vrot.lane.b32.xlu0 %v641_v62, %s5947_s28  ;;  %701 = vrot.lane.b32.xlu1 %v697_v49, %s5947_s28  ;;  %v906_v6 = vadd.f32 %v904_v13, %v477_v10  ;;  %v1091_v62 = vmul.f32 %v6117_v27, %v1089_v26  ;;  %v1387_v49 = vstv %s6495_s17  ;;  %s6595_s17 = sld [smem:[#allocation2 + $0xa3]] }
  0xff   : > { %v474_v19 = vpop.permute.xlu0 %473  ;;  %v558_v14 = vadd.f32 %v554_v0, %v446_v63  ;;  %v1388_v13 = vmul.f32 %v6129_v33, %v1387_v49  ;;  %v1551_v0 = vmul.f32 %v6124_v30, %v1550_v3 }
 0x100   : > { %v478_v31 = vadd.f32 %v474_v19, %v422_v5 }
 0x101   : > { %v744_v17 = vadd.f32 %v742_v24, %v558_v14  ;;  %v1345_v24 = vmul.f32 %v6117_v27, %v1343_v2  ;;  %v1552_v14 = vmul.f32 %v6134_v36, %v1550_v3  ;;  %v1934_v2 = vstv %s6533_s29  ;;  %s5086_s29 = sld [smem:[#allocation2 + $0x15]] }
 0x102   : > { %v933_v39 = vpop.permute.xlu1 %932  ;;  %647 = vrot.lane.b32.xlu0 %v642_v28, %s5947_s28  ;;  %703 = vrot.lane.b32.xlu1 %v698_v29, %s5947_s28  ;;  %v907_v59 = vadd.f32 %v905_v1, %v478_v31  ;;  %v1505_v1 = vstv %s6509_s20  ;;  %v1389_v31 = vmul.f32 %v6139_v38, %v1387_v49  ;;  %v2034_v3 = vstv %s6549_s5  ;;  %s6640_s20 = sld [smem:[#allocation2 + $0x14]] }
 0x103   : > { %v770_v35 = vpop.permute.xlu0 %769  ;;  %v938_v60 = vadd.f32 %v933_v39, %v906_v6  ;;  %v1736_v6 = vstv %s6525_s27  ;;  %v1506_v27 = vmul.f32 %v6129_v33, %v1505_v1  ;;  %v1935_v36 = vmul.f32 %v6144_v40, %v1934_v2  ;;  %s6678_s27 = sld [smem:[#allocation2 + $0xb4]] }
 0x104   : > { %v775_v53 = vadd.f32 %v770_v35, %v743_v21  ;;  %v1712_v21 = vstv %s6519_s26  ;;  %v1738_v49 = vmul.f32 %v6151_v45, %v1736_v6  ;;  %s6654_s26 = sld [smem:[#allocation2 + $0x94]] }
 0x105   : > { %v1068_v47 = vadd.f32 %v1066_v44, %v938_v60  ;;  %v1713_v60 = vmul.f32 %v6144_v40, %v1712_v21  ;;  %s5138_s5 = sld [smem:[#allocation2 + $0xb5]] }
 0x106   : > { %v935_v15 = vpop.permute.xlu1 %934  ;;  %863 = vrot.lane.b32.xlu0 %v859_v8, %s5947_s28  ;;  %1026 = vrot.lane.b32.xlu1 %v1022_v43, %s5947_s28  ;;  %v1092_v10 = vadd.f32 %v1090_v23, %v775_v53  ;;  %v1669_v23 = vmul.f32 %v6124_v30, %v1668_v11  ;;  %v1507_v30 = vmul.f32 %v6139_v38, %v1505_v1  ;;  %v2383_v11 = vstv %s6573_s9  ;;  %s6759_s9 = sld [smem:[#allocation2 + $0xb6]] }
 0x107   : > { %v772_v42 = vpop.permute.xlu0 %771  ;;  %v939_v63 = vadd.f32 %v935_v15, %v907_v59 }
 0x108   : > { %v776_v7 = vadd.f32 %v772_v42, %v744_v17  ;;  %v1737_v17 = vmul.f32 %v6144_v40, %v1736_v6  ;;  %v1990_v42 = vstv %s6535_s30  ;;  %s5108_s30 = sld [smem:[#allocation2 + $0x35]] }
 0x109   : > { %v1069_v57 = vadd.f32 %v1067_v4, %v939_v63 }
 0x10a   : > { %v1199_v20 = vpop.permute.xlu1 %1198  ;;  %865 = vrot.lane.b32.xlu0 %v860_v12, %s5947_s28  ;;  %1028 = vrot.lane.b32.xlu1 %v1023_v46, %s5947_s28  ;;  %v1093_v9 = vadd.f32 %v1091_v62, %v776_v7  ;;  %v1714_v62 = vmul.f32 %v6151_v45, %v1712_v21  ;;  %v2197_v7 = vstv %s6543_s4  ;;  %s5116_s4 = sld [smem:[#allocation2 + $0x95]] }
 0x10b   : > { %v1119_v5 = vpop.permute.xlu0 %1118  ;;  %v1204_v29 = vadd.f32 %v1199_v20, %v1092_v10  ;;  %v2199_v1 = vmul.f32 %v6168_v54, %v2197_v7  ;;  %v6604_v54 = vld [vmem:[%s6061_s25 + $0x48] sm:$0xff] }
 0x10c   : > { %v1124_v28 = vadd.f32 %v1119_v5, %v1068_v47  ;;  %v2035_v5 = vmul.f32 %v6163_v51, %v2034_v3  ;;  %v2152_v51 = vstv %s6557_s6  ;;  %s5156_s6 = sld [smem:[#allocation2 + $0x16]] }
 0x10d   : > { %v1390_v43 = vadd.f32 %v1388_v13, %v1204_v29  ;;  %v2198_v13 = vmul.f32 %v6158_v48, %v2197_v7  ;;  %v2315_v48 = vstv %s6559_s7  ;;  %s6736_s7 = sld [smem:[#allocation2 + $0x36]] }
 0x10e   : > { %v1201_v19 = vpop.permute.xlu1 %1200  ;;  %1292 = vrot.lane.b32.xlu0 %v1288_v18, %s5947_s28  ;;  %1348 = vrot.lane.b32.xlu1 %v1344_v41, %s5947_s28  ;;  %v1553_v35 = vadd.f32 %v1551_v0, %v1124_v28  ;;  %v1991_v18 = vmul.f32 %v6144_v40, %v1990_v42  ;;  %v1936_v40 = vmul.f32 %v6151_v45, %v1934_v2 }
 0x10f   : > { %v1121_v26 = vpop.permute.xlu0 %1120  ;;  %v1205_v8 = vadd.f32 %v1201_v19, %v1093_v9  ;;  %v1992_v19 = vmul.f32 %v6151_v45, %v1990_v42 }
 0x110   : > { %v1125_v39 = vadd.f32 %v1121_v26, %v1069_v57  ;;  %v2359_v26 = vstv %s6567_s8  ;;  %s5186_s8 = sld [smem:[#allocation2 + $0x96]] }
 0x111   : > { %v1391_v12 = vadd.f32 %v1389_v31, %v1205_v8  ;;  %v2316_v8 = vmul.f32 %v6604_v54, %v2315_v48 }
 0x112   : > { %v1580_v44 = vpop.permute.xlu1 %1579  ;;  %1294 = vrot.lane.b32.xlu0 %v1289_v22, %s5947_s28  ;;  %1350 = vrot.lane.b32.xlu1 %v1345_v24, %s5947_s28  ;;  %v1554_v46 = vadd.f32 %v1552_v14, %v1125_v39  ;;  %v2036_v24 = vmul.f32 %v6173_v56, %v2034_v3  ;;  %v6600_v39 = vld [vmem:[%s6061_s25 + $0x32] sm:$0xff] }
 0x113   : > { %v1417_v53 = vpop.permute.xlu0 %1416  ;;  %v1585_v15 = vadd.f32 %v1580_v44, %v1553_v35  ;;  %v2153_v56 = vmul.f32 %v6600_v39, %v2152_v51  ;;  %v2384_v35 = vmul.f32 %v6178_v58, %v2383_v11  ;;  %v2360_v44 = vmul.f32 %v6178_v58, %v2359_v26  ;;  %v6620_v58 = vld [vmem:[%s6061_s25 + $0x51] sm:$0xff] }
 0x114   : > { %v1422_v59 = vadd.f32 %v1417_v53, %v1390_v43  ;;  %v2361_v42 = vmul.f32 %v6620_v58, %v2359_v26 }
 0x115   : > { %v1715_v10 = vadd.f32 %v1713_v60, %v1585_v15 }
 0x116   : > { %v1582_v33 = vpop.permute.xlu1 %1581  ;;  %1510 = vrot.lane.b32.xlu0 %v1506_v27, %s5947_s28  ;;  %1673 = vrot.lane.b32.xlu1 %v1669_v23, %s5947_s28  ;;  %v1739_v20 = vadd.f32 %v1737_v17, %v1422_v59  ;;  %v6612_v59 = vld [vmem:[%s6061_s25 + $0x3a] sm:$0xff] }
 0x117   : > { %v1419_v4 = vpop.permute.xlu0 %1418  ;;  %v1586_v47 = vadd.f32 %v1582_v33, %v1554_v46  ;;  %v2154_v15 = vmul.f32 %v6612_v59, %v2152_v51  ;;  %v2385_v33 = vmul.f32 %v6620_v58, %v2383_v11  ;;  %v2799_v51 = vstv %s6625_s19  ;;  %s6770_s19 = sld [smem:[#allocation2 + $0x64]] }
 0x118   : > { %v1423_v63 = vadd.f32 %v1419_v4, %v1391_v12  ;;  %v6616_v12 = vld [vmem:[%s6061_s25 + $0x50] sm:$0xff]  ;;  %v2681_v4 = vstv %s6595_s17  ;;  %s5013_s17 = sld [smem:[#allocation5 + $0x1]] }
 0x119   : > { %v1716_v29 = vadd.f32 %v1714_v62, %v1586_v47  ;;  %v2317_v46 = vmul.f32 %v6616_v12, %v2315_v48  ;;  %v6632_v47 = vld [vmem:[%s6061_s25 + $0x49] sm:$0xff] }
 0x11a   : > { %v1846_v38 = vpop.permute.xlu1 %1845  ;;  %1512 = vrot.lane.b32.xlu0 %v1507_v30, %s5947_s28  ;;  %1675 = vrot.lane.b32.xlu1 %v1670_v16, %s5947_s28  ;;  %v1740_v57 = vadd.f32 %v1738_v49, %v1423_v63  ;;  %v2581_v30 = vstv %s6581_s10  ;;  %v2637_v16 = vstv %s6589_s11  ;;  %s6761_s10 = sld [smem:[#allocation2 + $0x17]] }
 0x11b   : > { %v1766_v41 = vpop.permute.xlu0 %1765  ;;  %v1851_v28 = vadd.f32 %v1846_v38, %v1739_v20  ;;  %v2638_v20 = vmul.f32 %v6632_v47, %v2637_v16  ;;  %s5024_s11 = sld [smem:[#allocation2 + $0x44]] }
 0x11c   : > { %v1771_v0 = vadd.f32 %v1766_v41, %v1715_v10  ;;  %v2582_v10 = vmul.f32 %v6632_v47, %v2581_v30 }
 0x11d   : > { %v2037_v21 = vadd.f32 %v2035_v5, %v1851_v28  ;;  %v6643_v28 = vld [vmem:[%s6061_s25 + $0x52] sm:$0xff] }
 0x11e   : > { %v1848_v9 = vpop.permute.xlu1 %1847  ;;  %1939 = vrot.lane.b32.xlu0 %v1935_v36, %s5947_s28  ;;  %1995 = vrot.lane.b32.xlu1 %v1991_v18, %s5947_s28  ;;  %v2200_v6 = vadd.f32 %v2198_v13, %v1771_v0  ;;  %v6637_v18 = vld [vmem:[%s6061_s25 + $0x4a] sm:$0xff] }
 0x11f   : > { %v1768_v22 = vpop.permute.xlu0 %1767  ;;  %v1852_v14 = vadd.f32 %v1848_v9, %v1740_v57  ;;  %v2682_v41 = vmul.f32 %v6637_v18, %v2681_v4  ;;  %v2583_v9 = vmul.f32 %v6620_v58, %v2581_v30  ;;  %v2800_v26 = vmul.f32 %v6637_v18, %v2799_v51 }
 0x120   : > { %v1772_v31 = vadd.f32 %v1768_v22, %v1716_v29  ;;  %v2683_v29 = vmul.f32 %v6643_v28, %v2681_v4  ;;  %v941_v30 = vstv %s5086_s29  ;;  %s6803_s29 = sld [smem:[#allocation2 + $0x45]] }
 0x121   : > { %v2038_v53 = vadd.f32 %v2036_v24, %v1852_v14 }
 0x122   : > { %v2227_v45 = vpop.permute.xlu1 %2226  ;;  %1941 = vrot.lane.b32.xlu0 %v1936_v40, %s5947_s28  ;;  %1997 = vrot.lane.b32.xlu1 %v1992_v19, %s5947_s28  ;;  %v2201_v60 = vadd.f32 %v2199_v1, %v1772_v31  ;;  %v2639_v40 = vmul.f32 %v6620_v58, %v2637_v16  ;;  %v2801_v31 = vmul.f32 %v6643_v28, %v2799_v51  ;;  %v6705_v16 = vld [vmem:[%s6061_s25 + $0x2] sm:$0xff] }
 0x123   : > { %v2064_v43 = vpop.permute.xlu0 %2063  ;;  %v2232_v23 = vadd.f32 %v2227_v45, %v2200_v6  ;;  %v6751_v51 = vld [vmem:[%s6061_s25 + $0x22] sm:$0xff] }
 0x124   : > { %v2069_v27 = vadd.f32 %v2064_v43, %v2037_v21  ;;  %v294_v21 = vstv %s6640_s20  ;;  %v6675_v43 = vld [vmem:[%s6061_s25 + $0x8] sm:$0xff]  ;;  %s6772_s20 = sld [smem:[#allocation2 + $0xc4]] }
 0x125   : > { %v2362_v7 = vadd.f32 %v2360_v44, %v2232_v23  ;;  %v480_v44 = vstv %s6650_s24  ;;  %v6690_v23 = vld [vmem:[%s6061_s25 + $0x1] sm:$0xff]  ;;  %s6782_s24 = sld [smem:[#allocation2 + $0x37]] }
 0x126   : > { %v2229_v17 = vpop.permute.xlu1 %2228  ;;  %2157 = vrot.lane.b32.xlu0 %v2153_v56, %s5947_s28  ;;  %2320 = vrot.lane.b32.xlu1 %v2316_v8, %s5947_s28  ;;  %v2386_v3 = vadd.f32 %v2384_v35, %v2069_v27  ;;  %v6671_v56 = vld [vmem:[%s6061_s25] sm:$0xff]  ;;  %v296_v35 = vmul.f32 %v6675_v43, %v294_v21  ;;  %v560_v27 = vstv %s6654_s26  ;;  %s6785_s26 = sld [smem:[#allocation2 + $0x97]] }
 0x127   : > { %v2066_v2 = vpop.permute.xlu0 %2065  ;;  %v2233_v49 = vadd.f32 %v2229_v17, %v2201_v60  ;;  %v295_v8 = vmul.f32 %v6671_v56, %v294_v21  ;;  %v561_v60 = vmul.f32 %v6690_v23, %v560_v27  ;;  %v6697_v17 = vld [vmem:[%s6061_s25 + $0x9] sm:$0xff]  ;;  %v6777_v21 = vld [vmem:[%s6061_s25 + $0x39] sm:$0xff] }
 0x128   : > { %v2070_v62 = vadd.f32 %v2066_v2, %v2038_v53  ;;  %v481_v53 = vmul.f32 %v6690_v23, %v480_v44 }
 0x129   : > { %v2363_v13 = vadd.f32 %v2361_v42, %v2233_v49  ;;  %v6709_v42 = vld [vmem:[%s6061_s25 + $0x18] sm:$0xff] }
 0x12a   : > { %v2493_v63 = vpop.permute.xlu1 %2492  ;;  %2159 = vrot.lane.b32.xlu0 %v2154_v15, %s5947_s28  ;;  %2322 = vrot.lane.b32.xlu1 %v2317_v46, %s5947_s28  ;;  %v2387_v38 = vadd.f32 %v2385_v33, %v2070_v62  ;;  %v482_v15 = vmul.f32 %v6697_v17, %v480_v44  ;;  %v562_v46 = vmul.f32 %v6697_v17, %v560_v27  ;;  %v778_v33 = vstv %s6678_s27  ;;  %v6715_v62 = vld [vmem:[%s6061_s25 + $0xa] sm:$0xff]  ;;  %s6795_s27 = sld [smem:[#allocation2 + $0xe4]] }
 0x12b   : > { %v2413_v36 = vpop.permute.xlu0 %2412  ;;  %v2498_v5 = vadd.f32 %v2493_v63, %v2386_v3  ;;  %v779_v2 = vmul.f32 %v6705_v16, %v778_v33  ;;  %v942_v4 = vmul.f32 %v6709_v42, %v941_v30  ;;  %v780_v49 = vmul.f32 %v6715_v62, %v778_v33  ;;  %v6719_v3 = vld [vmem:[%s6061_s25 + $0x20] sm:$0xff] }
 0x12c   : > { %v2418_v0 = vadd.f32 %v2413_v36, %v2362_v7  ;;  %v943_v7 = vmul.f32 %v6719_v3, %v941_v30  ;;  %v1127_v63 = vstv %s5108_s30  ;;  %v2235_v44 = vstv %s6761_s10  ;;  %s6826_s30 = sld [smem:[#allocation2 + $0x65]] }
 0x12d   : > { %v2684_v24 = vadd.f32 %v2682_v41, %v2498_v5  ;;  %v6732_v41 = vld [vmem:[%s6061_s25 + $0x21] sm:$0xff]  ;;  %v342_v27 = vstv %s5024_s11  ;;  %v6800_v30 = vstv %s5013_s17  ;;  %s6872_s10 = sld [smem:[#allocation2 + $0xe6]] }
 0x12e   : > { %v2495_v57 = vpop.permute.xlu1 %2494  ;;  %2586 = vrot.lane.b32.xlu0 %v2582_v10, %s5947_s28  ;;  %2642 = vrot.lane.b32.xlu1 %v2638_v20, %s5947_s28  ;;  %v1207_v10 = vstv %s5116_s4  ;;  %v6725_v20 = vld [vmem:[%s6061_s25 + $0x19] sm:$0xff]  ;;  %v1129_v5 = vmul.f32 %v6732_v41, %v1127_v63  ;;  %v344_v33 = vmul.f32 %v6675_v43, %v342_v27  ;;  %s6832_s4 = sld [smem:[#allocation2 + $0xc5]] }
 0x12f   : > { %v2499_v19 = vadd.f32 %v2495_v57, %v2387_v38  ;;  %v2415_v48 = vpop.permute.xlu0 %2414  ;;  %5526 = vmatprep.mubr.msk.f32.mxu1 %vm2846_vm4, %v2418_v0  ;;  %v1128_v38 = vmul.f32 %v6725_v20, %v1127_v63  ;;  %v1208_v36 = vmul.f32 %v6725_v20, %v1207_v10  ;;  %v1425_v0 = vstv %s5138_s5  ;;  %v6741_v57 = vld [vmem:[%s6061_s25 + $0x1a] sm:$0xff]  ;;  %s6845_s5 = sld [smem:[#allocation2 + $0xe5]] }
 0x130   : > { %v2419_v22 = vadd.f32 %v2415_v48, %v2363_v13  ;;  %v1209_v13 = vmul.f32 %v6732_v41, %v1207_v10  ;;  %v1427_v48 = vmul.f32 %v6751_v51, %v1425_v0  ;;  %s6876_s11 = sld [smem:[#allocation2 + $0x67]] }
 0x131   : > { %v2685_v1 = vadd.f32 %v2683_v29, %v2499_v19  ;;  %v1588_v29 = vstv %s5156_s6  ;;  %s6852_s6 = sld [smem:[#allocation2 + $0x46]] }
 0x132   : > { %v2713_v11 = vpop.permute.xlu1 %2712  ;;  %2588 = vrot.lane.b32.xlu0 %v2583_v9, %s5947_s28  ;;  %2644 = vrot.lane.b32.xlu1 %v2639_v40, %s5947_s28  ;;  %v1426_v9 = vmul.f32 %v6741_v57, %v1425_v0  ;;  %v6745_v40 = vld [vmem:[%s6061_s25 + $0x30] sm:$0xff]  ;;  %s6882_s17 = sld [smem:[#allocation2 + $0xc7]] }
 0x133   : > { %5527 = vmatmul.mubr.msk.f32.vlgmr.msra.gmra.mxu1 %vm2846_vm4, %v2419_v22  ;;  %v2711_v14 = vpop.permute.xlu0 %2710  ;;  %v2717_v45 = vadd.f32 %v2713_v11, %v2685_v1  ;;  %v1589_v19 = vmul.f32 %v6745_v40, %v1588_v29  ;;  %v6755_v22 = vld [vmem:[%s6061_s25 + $0x38] sm:$0xff]  ;;  %v1774_v1 = vstv %s6736_s7  ;;  %v1854_v11 = vstv %s5186_s8  ;;  %s6856_s7 = sld [smem:[#allocation2 + $0x66]] }
 0x134   : > { %v2716_v6 = vadd.f32 %v2711_v14, %v2684_v24  ;;  %5537 = vmatpush3.msk.msra.mxu1 %vm6302_vm0, %v8365_v55  ;;  %v1590_v24 = vmul.f32 %v6755_v22, %v1588_v29  ;;  %s6862_s8 = sld [smem:[#allocation2 + $0xc6]] }
 0x135   : > { %5538 = vmatprep.subr.msk.mxu1 %vm6309_vm1, %v8365_v55 }
 0x136   : > { %2804 = vrot.lane.b32.xlu0 %v2800_v26, %s5947_s28  ;;  %2806 = vrot.lane.b32.xlu1 %v2801_v31, %s5947_s28  ;;  %v6766_v26 = vld [vmem:[%s6061_s25 + $0x31] sm:$0xff] }
 0x137   : > { %5540 = vmatprep.mubr.msk.f32.mxu1 %vm2846_vm4, %v2716_v6  ;;  %5539 = vmatpush3.msk.msra.mxu1 %vm6309_vm1, %v8365_v55  ;;  %v1775_v31 = vmul.f32 %v6766_v26, %v1774_v1  ;;  %v1855_v14 = vmul.f32 %v6766_v26, %v1854_v11  ;;  %v1776_v6 = vmul.f32 %v6777_v21, %v1774_v1 }
 0x138   : > { %5541 = vmatmul.mubr.msk.f32.vlgmr.msra.gmra.mxu1 %vm2846_vm4, %v2717_v45  ;;  %v1856_v45 = vmul.f32 %v6777_v21, %v1854_v11 }
 0x13a   : > { %299 = vrot.lane.b32.xlu0 %v295_v8, %s5947_s28  ;;  %301 = vrot.lane.b32.xlu1 %v296_v35, %s5947_s28  ;;  %v2072_v8 = vstv %s6759_s9  ;;  %s6866_s9 = sld [smem:[#allocation2 + $0x47]] }
 0x13e   : > { %485 = vrot.lane.b32.xlu0 %v481_v53, %s5947_s28  ;;  %565 = vrot.lane.b32.xlu1 %v561_v60, %s5947_s28  ;;  %v2073_v53 = vmul.f32 %v6600_v39, %v2072_v8  ;;  %v2236_v60 = vmul.f32 %v6604_v54, %v2235_v44 }
 0x142   : > { %487 = vrot.lane.b32.xlu0 %v482_v15, %s5947_s28  ;;  %567 = vrot.lane.b32.xlu1 %v562_v46, %s5947_s28  ;;  %v343_v46 = vmul.f32 %v6671_v56, %v342_v27 }
 0x146   : > { %783 = vrot.lane.b32.xlu0 %v779_v2, %s5947_s28  ;;  %946 = vrot.lane.b32.xlu1 %v942_v4, %s5947_s28  ;;  %v608_v2 = vstv %s6772_s20  ;;  %v2074_v4 = vmul.f32 %v6612_v59, %v2072_v8  ;;  %v989_v8 = vstv %s6803_s29  ;;  %s6894_s20 = sld [smem:[#allocation2 + $0xb7]] }
 0x147   : > { %v609_v0 = vmul.f32 %v6690_v23, %v608_v2  ;;  %v610_v11 = vmul.f32 %v6697_v17, %v608_v2  ;;  %s6926_s29 = sld [smem:[#allocation2 + $0xf8]] }
 0x14a   : > { %785 = vrot.lane.b32.xlu0 %v780_v49, %s5947_s28  ;;  %948 = vrot.lane.b32.xlu1 %v943_v7, %s5947_s28  ;;  %v2237_v49 = vmul.f32 %v6616_v12, %v2235_v44  ;;  %v2421_v7 = vstv %s6782_s24  ;;  %s6901_s24 = sld [smem:[#allocation2 + $0x58]] }
 0x14b   : > { %v2422_v29 = vmul.f32 %v6632_v47, %v2421_v7 }
 0x14e   : > { %1132 = vrot.lane.b32.xlu0 %v1128_v38, %s5947_s28  ;;  %1212 = vrot.lane.b32.xlu1 %v1208_v36, %s5947_s28  ;;  %v528_v38 = vstv %s6770_s19  ;;  %v2501_v36 = vstv %s6785_s26  ;;  %s6890_s19 = sld [smem:[#allocation2 + $0xe7]] }
 0x14f   : > { %v530_v1 = vmul.f32 %v6697_v17, %v528_v38  ;;  %v2503_v27 = vmul.f32 %v6620_v58, %v2501_v36  ;;  %s6906_s26 = sld [smem:[#allocation2 + $0x78]] }
 0x152   : > { %1134 = vrot.lane.b32.xlu0 %v1129_v5, %s5947_s28  ;;  %1214 = vrot.lane.b32.xlu1 %v1209_v13, %s5947_s28  ;;  %v345_v5 = vadd.f32 %v343_v46, %v6800_v30  ;;  %v346_v13 = vadd.f32 %v344_v33, %v6800_v30 }
 0x156   : > { %1430 = vrot.lane.b32.xlu0 %v1426_v9, %s5947_s28  ;;  %1593 = vrot.lane.b32.xlu1 %v1589_v19, %s5947_s28  ;;  %v529_v9 = vmul.f32 %v6690_v23, %v528_v38  ;;  %v2502_v19 = vmul.f32 %v6632_v47, %v2501_v36  ;;  %v991_v38 = vmul.f32 %v6719_v3, %v989_v8  ;;  %v1175_v36 = vstv %s6826_s30  ;;  %s5095_s30 = sld [smem:[#allocation2 + $0x59]] }
 0x15a   : > { %1432 = vrot.lane.b32.xlu0 %v1427_v48, %s5947_s28  ;;  %1595 = vrot.lane.b32.xlu1 %v1590_v24, %s5947_s28 }
 0x15e   : > { %1779 = vrot.lane.b32.xlu0 %v1775_v31, %s5947_s28  ;;  %1859 = vrot.lane.b32.xlu1 %v1855_v14, %s5947_s28 }
 0x160   : > { %v2843_v35 = vpop.permute.xlu0 %2842 }
 0x161   : > { %5519 = vmatprep.mubr.msk.f32.mxu0 %vm2846_vm4, %v2843_v35  ;;  %v2423_v35 = vmul.f32 %v6620_v58, %v2421_v7 }
 0x162   : > { %1781 = vrot.lane.b32.xlu0 %v1776_v6, %s5947_s28  ;;  %1861 = vrot.lane.b32.xlu1 %v1856_v45, %s5947_s28  ;;  %v611_v6 = vadd.f32 %v609_v0, %v6800_v30  ;;  %v826_v45 = vstv %s6795_s27  ;;  %s6913_s27 = sld [smem:[#allocation2 + $0xd8]] }
 0x163   : > { %v827_v46 = vmul.f32 %v6705_v16, %v826_v45 }
 0x164   : > { %v2845_v15 = vpop.permute.xlu1 %2844 }
 0x165   : > { %5520 = vmatmul.mubr.msk.f32.vlgmr.msra.gmra.mxu0 %vm2846_vm4, %v2845_v15  ;;  %v612_v15 = vadd.f32 %v610_v11, %v6800_v30 }
 0x166   : > { %5530 = vmatpush3.msk.msra.mxu0 %vm6391_vm2, %v8365_v55  ;;  %2077 = vrot.lane.b32.xlu0 %v2073_v53, %s5947_s28 }
 0x167   : > { %5531 = vmatprep.subr.msk.mxu0 %vm6406_vm3, %v8365_v55  ;;  %2240 = vrot.lane.b32.xlu1 %v2236_v60, %s5947_s28 }
 0x168   : > { %v3012_v63 = vpop.permute.xlu1 %3011  ;;  %v3010_v10 = vpop.permute.xlu0 %3009  ;;  %5532 = vmatpush3.msk.msra.mxu0 %vm6406_vm3, %v8365_v55 }
 0x169   : > { %5533 = vmatprep.mubr.msk.f32.mxu0 %vm2846_vm4, %v3010_v10  ;;  %v828_v10 = vmul.f32 %v6715_v62, %v826_v45 }
 0x16a   : > { %5534 = vmatmul.mubr.msk.f32.vlgmr.msra.gmra.mxu0 %vm2846_vm4, %v3012_v63  ;;  %2079 = vrot.lane.b32.xlu0 %v2074_v4, %s5947_s28 }
 0x16b   : > { %2242 = vrot.lane.b32.xlu1 %v2237_v49, %s5947_s28  ;;  %v990_v49 = vmul.f32 %v6709_v42, %v989_v8 }
 0x16c   : > { %v380_v48 = vpop.permute.xlu0 %379  ;;  %v382_v24 = vpop.permute.xlu1 %381 }
 0x16d   : > { %v385_v31 = vadd.f32 %v380_v48, %v345_v5  ;;  %v386_v14 = vadd.f32 %v382_v24, %v346_v13  ;;  %v1255_v5 = vstv %s6832_s4  ;;  %v1176_v24 = vmul.f32 %v6725_v20, %v1175_v36  ;;  %s5125_s4 = sld [smem:[#allocation2 + $0x79]] }
 0x16e   : > { %2426 = vrot.lane.b32.xlu0 %v2422_v29, %s5947_s28 }
 0x16f   : > { %v531_v44 = vadd.f32 %v529_v9, %v385_v31  ;;  %2506 = vrot.lane.b32.xlu1 %v2502_v19, %s5947_s28  ;;  %v532_v4 = vadd.f32 %v530_v1, %v386_v14  ;;  %v1256_v1 = vmul.f32 %v6725_v20, %v1255_v5 }
 0x170   : > { %v646_v53 = vpop.permute.xlu0 %645  ;;  %v702_v60 = vpop.permute.xlu1 %701 }
 0x171   : > { %v651_v33 = vadd.f32 %v646_v53, %v531_v44  ;;  %v707_v2 = vadd.f32 %v702_v60, %v611_v6  ;;  %v1257_v44 = vmul.f32 %v6732_v41, %v1255_v5  ;;  %v1636_v53 = vstv %s6852_s6  ;;  %s5147_s6 = sld [smem:[#allocation2 + $0xf9]] }
 0x172   : > { %2428 = vrot.lane.b32.xlu0 %v2423_v35, %s5947_s28  ;;  %v1177_v35 = vmul.f32 %v6732_v41, %v1175_v36 }
 0x173   : > { %2508 = vrot.lane.b32.xlu1 %v2503_v27, %s5947_s28  ;;  %v829_v29 = vadd.f32 %v827_v46, %v707_v2  ;;  %v992_v9 = vadd.f32 %v990_v49, %v651_v33  ;;  %v1473_v27 = vstv %s6845_s5  ;;  %s5129_s5 = sld [smem:[#allocation2 + $0xd9]] }
 0x174   : > { %v648_v7 = vpop.permute.xlu0 %647  ;;  %v704_v63 = vpop.permute.xlu1 %703  ;;  %v1474_v49 = vmul.f32 %v6741_v57, %v1473_v27 }
 0x175   : > { %v652_v13 = vadd.f32 %v648_v7, %v532_v4  ;;  %v708_v0 = vadd.f32 %v704_v63, %v612_v15  ;;  %v1637_v7 = vmul.f32 %v6745_v40, %v1636_v53 }
 0x177   : > { %v830_v14 = vadd.f32 %v828_v10, %v708_v0  ;;  %v993_v6 = vadd.f32 %v991_v38, %v652_v13  ;;  %v1475_v0 = vmul.f32 %v6751_v51, %v1473_v27 }
 0x178   : > { %v864_v19 = vpop.permute.xlu0 %863  ;;  %v1027_v48 = vpop.permute.xlu1 %1026 }
 0x179   : > { %v869_v11 = vadd.f32 %v864_v19, %v829_v29  ;;  %v1032_v31 = vadd.f32 %v1027_v48, %v992_v9  ;;  %v1638_v29 = vmul.f32 %v6755_v22, %v1636_v53  ;;  %v1822_v9 = vstv %s6856_s7  ;;  %s5165_s7 = sld [smem:[#allocation2 + $0x5a]] }
 0x17a   : > { %v1902_v19 = vstv %s6862_s8  ;;  %s5195_s8 = sld [smem:[#allocation2 + $0x7a]] }
 0x17b   : > { %v1178_v46 = vadd.f32 %v1176_v24, %v1032_v31  ;;  %v1258_v33 = vadd.f32 %v1256_v1, %v869_v11 }
 0x17c   : > { %v866_v45 = vpop.permute.xlu0 %865  ;;  %v1029_v8 = vpop.permute.xlu1 %1028 }
 0x17d   : > { %v870_v60 = vadd.f32 %v866_v45, %v830_v14  ;;  %v1033_v15 = vadd.f32 %v1029_v8, %v993_v6  ;;  %v1823_v6 = vmul.f32 %v6766_v26, %v1822_v9  ;;  %v1903_v45 = vmul.f32 %v6766_v26, %v1902_v19 }
 0x17f   : > { %v1179_v38 = vadd.f32 %v1177_v35, %v1033_v15  ;;  %v1259_v36 = vadd.f32 %v1257_v44, %v870_v60  ;;  %v1824_v15 = vmul.f32 %v6777_v21, %v1822_v9 }
 0x180   : > { %v1293_v2 = vpop.permute.xlu0 %1292  ;;  %v1349_v4 = vpop.permute.xlu1 %1348 }
 0x181   : > { %v1298_v63 = vadd.f32 %v1293_v2, %v1178_v46  ;;  %v1354_v10 = vadd.f32 %v1349_v4, %v1258_v33  ;;  %v1904_v46 = vmul.f32 %v6777_v21, %v1902_v19  ;;  %v2120_v33 = vstv %s6872_s10  ;;  %s5217_s10 = sld [smem:[#allocation2 + $0xfa]] }
 0x182   : > { %v2283_v2 = vstv %s6866_s9  ;;  %s5199_s9 = sld [smem:[#allocation2 + $0xda]] }
 0x183   : > { %v1476_v1 = vadd.f32 %v1474_v49, %v1354_v10  ;;  %v1639_v11 = vadd.f32 %v1637_v7, %v1298_v63 }
 0x184   : > { %v1295_v5 = vpop.permute.xlu0 %1294  ;;  %v1351_v13 = vpop.permute.xlu1 %1350 }
 0x185   : > { %v1299_v48 = vadd.f32 %v1295_v5, %v1179_v38  ;;  %v1355_v24 = vadd.f32 %v1351_v13, %v1259_v36  ;;  %v2121_v36 = vmul.f32 %v6600_v39, %v2120_v33  ;;  %v2284_v5 = vmul.f32 %v6604_v54, %v2283_v2 }
 0x187   : > { %v1477_v44 = vadd.f32 %v1475_v0, %v1355_v24  ;;  %v1640_v27 = vadd.f32 %v1638_v29, %v1299_v48  ;;  %v2122_v24 = vmul.f32 %v6612_v59, %v2120_v33 }
 0x188   : > { %v1511_v31 = vpop.permute.xlu0 %1510  ;;  %v1674_v14 = vpop.permute.xlu1 %1673 }
 0x189   : > { %v1516_v8 = vadd.f32 %v1511_v31, %v1476_v1  ;;  %v1679_v35 = vadd.f32 %v1674_v14, %v1639_v11  ;;  %v2285_v1 = vmul.f32 %v6616_v12, %v2283_v2  ;;  %v2469_v11 = vstv %s6876_s11  ;;  %s5235_s11 = sld [smem:[#allocation2 + $0x5b]] }
 0x18a   : > { %v2549_v31 = vstv %s6882_s17  ;;  %s5265_s17 = sld [smem:[#allocation2 + $0x7b]] }
 0x18b   : > { %v1825_v7 = vadd.f32 %v1823_v6, %v1679_v35  ;;  %v1905_v63 = vadd.f32 %v1903_v45, %v1516_v8 }
 0x18c   : > { %v1513_v53 = vpop.permute.xlu0 %1512  ;;  %v1676_v60 = vpop.permute.xlu1 %1675 }
 0x18d   : > { %v1517_v4 = vadd.f32 %v1513_v53, %v1477_v44  ;;  %v1680_v49 = vadd.f32 %v1676_v60, %v1640_v27  ;;  %v2470_v27 = vmul.f32 %v6632_v47, %v2469_v11  ;;  %v2550_v53 = vmul.f32 %v6632_v47, %v2549_v31 }
 0x18f   : > { %v1826_v29 = vadd.f32 %v1824_v15, %v1680_v49  ;;  %v1906_v9 = vadd.f32 %v1904_v46, %v1517_v4  ;;  %v2471_v49 = vmul.f32 %v6620_v58, %v2469_v11 }
 0x190   : > { %v1940_v10 = vpop.permute.xlu0 %1939  ;;  %v1996_v38 = vpop.permute.xlu1 %1995 }
 0x191   : > { %v1945_v13 = vadd.f32 %v1940_v10, %v1825_v7  ;;  %v2001_v0 = vadd.f32 %v1996_v38, %v1905_v63  ;;  %v2551_v7 = vmul.f32 %v6620_v58, %v2549_v31  ;;  %v2767_v63 = vstv %s6890_s19  ;;  %s5269_s19 = sld [smem:[#allocation2 + $0xdb]] }
 0x192   : > { %v2769_v31 = vmul.f32 %v6643_v28, %v2767_v63 }
 0x193   : > { %v2123_v45 = vadd.f32 %v2121_v36, %v2001_v0  ;;  %v2286_v8 = vadd.f32 %v2284_v5, %v1945_v13 }
 0x194   : > { %v1942_v19 = vpop.permute.xlu0 %1941  ;;  %v1998_v48 = vpop.permute.xlu1 %1997 }
 0x195   : > { %v1946_v14 = vadd.f32 %v1942_v19, %v1826_v29  ;;  %v2002_v6 = vadd.f32 %v1998_v48, %v1906_v9  ;;  %v2719_v29 = vstv %s6894_s20  ;;  %v2768_v9 = vmul.f32 %v6637_v18, %v2767_v63  ;;  %s7019_s20 = sld [smem:[#allocation2 + $0xfb]] }
 0x196   : > { %v2720_v11 = vmul.f32 %v6637_v18, %v2719_v29  ;;  %v199_v63 = vadd.s32 16, %v6275_v25 }
 0x197   : > { %v2124_v46 = vadd.f32 %v2122_v24, %v2002_v6  ;;  %v2287_v33 = vadd.f32 %v2285_v1, %v1946_v14 }
 0x198   : > { %v2158_v35 = vpop.permute.xlu0 %2157  ;;  %v2321_v44 = vpop.permute.xlu1 %2320 }
 0x199   : > { %v2163_v60 = vadd.f32 %v2158_v35, %v2123_v45  ;;  %v2326_v15 = vadd.f32 %v2321_v44, %v2286_v8  ;;  %v2721_v44 = vmul.f32 %v6643_v28, %v2719_v29 }
 0x19b   : > { %v2472_v36 = vadd.f32 %v2470_v27, %v2326_v15  ;;  %v2552_v5 = vadd.f32 %v2550_v53, %v2163_v60  ;;  %v203_v53 = vmul.u32 2, %v6285_v34 }
 0x19c   : > { %v2160_v2 = vpop.permute.xlu0 %2159  ;;  %v2323_v4 = vpop.permute.xlu1 %2322 }
 0x19d   : > { %v2164_v10 = vadd.f32 %v2160_v2, %v2124_v46  ;;  %v2327_v38 = vadd.f32 %v2323_v4, %v2287_v33  ;;  %v388_v46 = vstv %s6901_s24  ;;  %vm204_vm5 = vcmp.eq.s32.totalorder %v6275_v25, %v203_v53  ;;  %s7029_s24 = sld [smem:[#allocation2 + $0x18]] }
 0x19e   : > { %v5949_v2 = vmov 0.0   ;;  %vm205_vm6 = vcmp.eq.s32.totalorder %v6283_v32, %v203_v53  ;;  %v389_v34 = vmul.f32 %v6671_v56, %v388_v46  ;;  %vm206_vm7 = vcmp.eq.s32.totalorder %v199_v63, %v203_v53 }
 0x19f   : > { %v2473_v48 = vadd.f32 %v2471_v49, %v2327_v38  ;;  %v2553_v1 = vadd.f32 %v2551_v7, %v2164_v10  ;;  %v6916_v4 = vsel %vm204_vm5, 1.0, %v5949_v2  ;;  %v6922_v7 = vsel %vm205_vm6, 1.0, %v5949_v2 }
 0x1a0   : > { %v2587_v13 = vpop.permute.xlu0 %2586  ;;  %v2643_v0 = vpop.permute.xlu1 %2642  ;;  %8419 = vst [vmem:[#allocation11_spill] sm:$0xff] %v6916_v4  ;;  %v654_v10 = vstv %s6906_s26  ;;  %5557 = vmatprep.mubr.msk.f32.mxu1 %vm2846_vm4, %v6916_v4  ;;  %v216_v38 = vadd.s32 1, %v203_v53  ;;  %s7038_s26 = sld [smem:[#allocation2 + $0x38]] }
 0x1a1   : > { %v2592_v19 = vadd.f32 %v2587_v13, %v2472_v36  ;;  %v2648_v24 = vadd.f32 %v2643_v0, %v2552_v5  ;;  %v200_v36 = vadd.s32 24, %v6275_v25  ;;  %v6931_v5 = vsel %vm206_vm7, 1.0, %v5949_v2 }
 0x1a2   : > { %vm217_vm8 = vcmp.eq.s32.totalorder %v6275_v25, %v216_v38  ;;  %v390_v13 = vmul.f32 %v6675_v43, %v388_v46  ;;  %v655_v0 = vmul.f32 %v6690_v23, %v654_v10  ;;  %vm218_vm10 = vcmp.eq.s32.totalorder %v6283_v32, %v216_v38 }
 0x1a3   : > { %3374 = vrot.lane.b32.xlu0 %v2592_v19, %s5947_s28  ;;  %v2770_v35 = vadd.f32 %v2768_v9, %v2648_v24  ;;  %vm207_vm9 = vcmp.eq.s32.totalorder %v200_v36, %v203_v53  ;;  %v6938_v29 = vsel %vm217_vm8, 1.0, %v5949_v2  ;;  %v710_v19 = vstv %s6913_s27  ;;  %s5016_s27 = sld [smem:[#allocation2 + $0x4]] }
 0x1a4   : > { %v2589_v14 = vpop.permute.xlu0 %2588  ;;  %v2645_v6 = vpop.permute.xlu1 %2644  ;;  %8420 = vst [vmem:[#allocation12_spill] sm:$0xff] %v6938_v29  ;;  %v6940_v9 = vsel %vm207_vm9, 1.0, %v5949_v2  ;;  %5547 = vmatprep.mubr.msk.f32.mxu0 %vm2846_vm4, %v6938_v29  ;;  %v6946_v25 = vsel %vm218_vm10, 1.0, %v5949_v2  ;;  %v656_v24 = vmul.f32 %v6697_v17, %v654_v10  ;;  %vm219_vm11 = vcmp.eq.s32.totalorder %v199_v63, %v216_v38 }
 0x1a5   : > { %v2593_v45 = vadd.f32 %v2589_v14, %v2473_v48  ;;  %v2649_v8 = vadd.f32 %v2645_v6, %v2553_v1  ;;  %v711_v48 = vmul.f32 %v6690_v23, %v710_v19  ;;  %v872_v1 = vstv %s6926_s29  ;;  %s7047_s29 = sld [smem:[#allocation2 + $0x98]] }
 0x1a6   : > { %vm220_vm12 = vcmp.eq.s32.totalorder %v200_v36, %v216_v38  ;;  %v712_v32 = vmul.f32 %v6697_v17, %v710_v19  ;;  %v873_v14 = vmul.f32 %v6705_v16, %v872_v1  ;;  %v1035_v6 = vstv %s5095_s30  ;;  %s7049_s30 = sld [smem:[#allocation2 + $0x84]] }
 0x1a7   : > { %2724 = vrot.lane.b32.xlu0 %v2720_v11, %s5947_s28  ;;  %3376 = vrot.lane.b32.xlu1 %v2593_v45, %s5947_s28  ;;  %v2771_v27 = vadd.f32 %v2769_v31, %v2649_v8  ;;  %v6953_v11 = vsel %vm219_vm11, 1.0, %v5949_v2  ;;  %v6955_v31 = vsel %vm220_vm12, 1.0, %v5949_v2  ;;  %v1036_v8 = vmul.f32 %v6709_v42, %v1035_v6 }
 0x1a8   : > { %v2805_v60 = vpop.permute.xlu0 %2804  ;;  %v2807_v15 = vpop.permute.xlu1 %2806  ;;  %v1037_v53 = vmul.f32 %v6719_v3, %v1035_v6  ;;  %v1682_v36 = vstv %s5165_s7  ;;  %s7074_s7 = sld [smem:[#allocation2 + $0x19]] }
 0x1a9   : > { %v2810_v33 = vadd.f32 %v2805_v60, %v2770_v35  ;;  %v2811_v49 = vadd.f32 %v2807_v15, %v2771_v27  ;;  %v874_v35 = vmul.f32 %v6715_v62, %v872_v1  ;;  %v1357_v15 = vstv %s5129_s5  ;;  %s7062_s5 = sld [smem:[#allocation2 + $0xb8]] }
 0x1aa   : > { %v1359_v10 = vmul.f32 %v6732_v41, %v1357_v15  ;;  %v1684_v1 = vmul.f32 %v6755_v22, %v1682_v36 }
 0x1ab   : > { %2726 = vrot.lane.b32.xlu1 %v2721_v44, %s5947_s28  ;;  %3540 = vrot.lane.b32.xlu0 %v2810_v33, %s5947_s28  ;;  %v1301_v44 = vstv %s5125_s4  ;;  %v1358_v33 = vmul.f32 %v6725_v20, %v1357_v15  ;;  %s7053_s4 = sld [smem:[#allocation2 + $0x24]] }
 0x1ac   : > { %v6963_v45 = vpop.permute.xlu0 %299  ;;  %v6969_v27 = vpop.permute.xlu1 %301  ;;  %v1302_v60 = vmul.f32 %v6725_v20, %v1301_v44  ;;  %v1303_v2 = vmul.f32 %v6732_v41, %v1301_v44 }
 0x1af   : > { %3542 = vrot.lane.b32.xlu1 %v2811_v49, %s5947_s28  ;;  %393 = vrot.lane.b32.xlu0 %v389_v34, %s5947_s28  ;;  %v1519_v49 = vstv %s5147_s6  ;;  %s7064_s6 = sld [smem:[#allocation2 + $0xa4]] }
 0x1b0   : > { %v6973_v46 = vpop.permute.xlu0 %485  ;;  %v6979_v34 = vpop.permute.xlu1 %565  ;;  %v1520_v38 = vmul.f32 %v6741_v57, %v1519_v49  ;;  %v1521_v19 = vmul.f32 %v6751_v51, %v1519_v49 }
 0x1b3   : > { %395 = vrot.lane.b32.xlu1 %v390_v13, %s5947_s28  ;;  %659 = vrot.lane.b32.xlu0 %v655_v0, %s5947_s28  ;;  %v1683_v0 = vmul.f32 %v6745_v40, %v1682_v36  ;;  %v2595_v36 = vstv %s5265_s17  ;;  %s7115_s17 = sld [smem:[#allocation2 + $0x25]] }
 0x1b4   : > { %v6981_v63 = vpop.permute.xlu0 %487  ;;  %v6987_v13 = vpop.permute.xlu1 %567 }
 0x1b7   : > { %715 = vrot.lane.b32.xlu1 %v711_v48, %s5947_s28  ;;  %661 = vrot.lane.b32.xlu0 %v656_v24, %s5947_s28  ;;  %v1948_v48 = vstv %s5195_s8  ;;  %s7080_s8 = sld [smem:[#allocation2 + $0x5]] }
 0x1b8   : > { %v6993_v24 = vpop.permute.xlu0 %783  ;;  %v6999_v6 = vpop.permute.xlu1 %946  ;;  %v1950_v44 = vmul.f32 %v6777_v21, %v1948_v48 }
 0x1bb   : > { %717 = vrot.lane.b32.xlu1 %v712_v32, %s5947_s28  ;;  %877 = vrot.lane.b32.xlu0 %v873_v14, %s5947_s28  ;;  %v1949_v32 = vmul.f32 %v6766_v26, %v1948_v48  ;;  %v2004_v14 = vstv %s5199_s9  ;;  %v2596_v48 = vmul.f32 %v6632_v47, %v2595_v36  ;;  %s7090_s9 = sld [smem:[#allocation2 + $0x39]] }
 0x1bc   : > { %v2006_v15 = vmul.f32 %v6777_v21, %v2004_v14 }
 0x1bf   : > { %1040 = vrot.lane.b32.xlu1 %v1036_v8, %s5947_s28  ;;  %879 = vrot.lane.b32.xlu0 %v874_v35, %s5947_s28  ;;  %v7001_v8 = vpop.permute.xlu0 %785  ;;  %v2005_v35 = vmul.f32 %v6766_v26, %v2004_v14  ;;  %v2813_v14 = vstv %s7019_s20  ;;  %s7133_s20 = sld [smem:[#allocation2 + $0xa5]] }
 0x1c3   : > { %1042 = vrot.lane.b32.xlu1 %v1037_v53, %s5947_s28  ;;  %1306 = vrot.lane.b32.xlu0 %v1302_v60, %s5947_s28  ;;  %v2166_v53 = vstv %s5217_s10  ;;  %v7007_v60 = vpop.permute.xlu1 %948  ;;  %v7013_v49 = vpop.permute.xlu0 %1132  ;;  %s7097_s10 = sld [smem:[#allocation2 + $0x85]] }
 0x1c7   : > { %1362 = vrot.lane.b32.xlu1 %v1358_v33, %s5947_s28  ;;  %1308 = vrot.lane.b32.xlu0 %v1303_v2, %s5947_s28  ;;  %v2167_v33 = vmul.f32 %v6600_v39, %v2166_v53  ;;  %v2329_v2 = vstv %s5235_s11  ;;  %s7109_s11 = sld [smem:[#allocation2 + $0x99]] }
 0x1c8   : > { %v2331_v39 = vmul.f32 %v6616_v12, %v2329_v2 }
 0x1cb   : > { %1364 = vrot.lane.b32.xlu1 %v1359_v10, %s5947_s28  ;;  %1524 = vrot.lane.b32.xlu0 %v1520_v38, %s5947_s28  ;;  %v2330_v10 = vmul.f32 %v6604_v54, %v2329_v2  ;;  %v2168_v38 = vmul.f32 %v6612_v59, %v2166_v53  ;;  %v2597_v59 = vmul.f32 %v6620_v58, %v2595_v36  ;;  %v308_v53 = vstv %s7029_s24  ;;  %s7142_s24 = sld [smem:[#allocation2 + $0x1a]] }
 0x1cc   : > { %v262_v2 = vstv %s5016_s27  ;;  %s7160_s27 = sld [smem:[#allocation2 + $0x3a]] }
 0x1cd   : > { %v263_v36 = vmul.f32 %v6671_v56, %v262_v2 }
 0x1cf   : > { %1687 = vrot.lane.b32.xlu1 %v1683_v0, %s5947_s28  ;;  %1526 = vrot.lane.b32.xlu0 %v1521_v19, %s5947_s28  ;;  %v7021_v0 = vpop.permute.xlu1 %1212  ;;  %v7023_v19 = vpop.permute.xlu0 %1134 }
 0x1d3   : > { %1689 = vrot.lane.b32.xlu1 %v1684_v1, %s5947_s28  ;;  %1953 = vrot.lane.b32.xlu0 %v1949_v32, %s5947_s28  ;;  %v2651_v1 = vstv %s5269_s19  ;;  %v7031_v54 = vpop.permute.xlu1 %1214  ;;  %v7040_v12 = vpop.permute.xlu0 %1430  ;;  %s7126_s19 = sld [smem:[#allocation2 + $0xb9]] }
 0x1d4   : > { %v2652_v32 = vmul.f32 %v6632_v47, %v2651_v1 }
 0x1d7   : > { %2009 = vrot.lane.b32.xlu1 %v2005_v35, %s5947_s28  ;;  %1955 = vrot.lane.b32.xlu0 %v1950_v44, %s5947_s28  ;;  %v2653_v35 = vmul.f32 %v6620_v58, %v2651_v1  ;;  %v2814_v44 = vmul.f32 %v6637_v18, %v2813_v14  ;;  %v7051_v47 = vpop.permute.xlu1 %1593  ;;  %v2815_v58 = vmul.f32 %v6643_v28, %v2813_v14  ;;  %v448_v1 = vstv %s7049_s30  ;;  %s7176_s30 = sld [smem:[#allocation2 + $0x9a]] }
 0x1d8   : > { %v309_v18 = vmul.f32 %v6671_v56, %v308_v53  ;;  %v265_v56 = vadd.f32 %v263_v36, %v6800_v30 }
 0x1da   : > { %v305_v36 = vadd.f32 %v6963_v45, %v265_v56 }
 0x1db   : > { %2011 = vrot.lane.b32.xlu1 %v2006_v15, %s5947_s28  ;;  %2171 = vrot.lane.b32.xlu0 %v2167_v33, %s5947_s28  ;;  %v7055_v15 = vpop.permute.xlu0 %1432  ;;  %v494_v33 = vstv %s7038_s26  ;;  %s7150_s26 = sld [smem:[#allocation2 + $0x6]] }
 0x1dc   : > { %v495_v28 = vmul.f32 %v6690_v23, %v494_v33  ;;  %v496_v14 = vmul.f32 %v6697_v17, %v494_v33 }
 0x1df   : > { %2334 = vrot.lane.b32.xlu1 %v2330_v10, %s5947_s28  ;;  %2173 = vrot.lane.b32.xlu0 %v2168_v38, %s5947_s28  ;;  %v7066_v10 = vpop.permute.xlu1 %1595  ;;  %v310_v38 = vmul.f32 %v6675_v43, %v308_v53 }
 0x1e3   : > { %2336 = vrot.lane.b32.xlu1 %v2331_v39, %s5947_s28  ;;  %2600 = vrot.lane.b32.xlu0 %v2596_v48, %s5947_s28  ;;  %v574_v39 = vstv %s7047_s29  ;;  %v264_v48 = vmul.f32 %v6675_v43, %v262_v2  ;;  %v792_v43 = vstv %s7062_s5  ;;  %s7165_s29 = sld [smem:[#allocation2 + $0x86]] }
 0x1e4   : > { %s7192_s5 = sld [smem:[#allocation2 + $0xba]] }
 0x1e5   : > { %v266_v53 = vadd.f32 %v264_v48, %v6800_v30 }
 0x1e7   : > { %2602 = vrot.lane.b32.xlu0 %v2597_v59, %s5947_s28  ;;  %2656 = vrot.lane.b32.xlu1 %v2652_v32, %s5947_s28  ;;  %v7078_v59 = vpop.permute.xlu0 %1779  ;;  %v575_v32 = vmul.f32 %v6690_v23, %v574_v39  ;;  %v306_v55 = vadd.f32 %v6969_v27, %v266_v53 }
 0x1eb   : > { %2658 = vrot.lane.b32.xlu1 %v2653_v35, %s5947_s28  ;;  %2818 = vrot.lane.b32.xlu0 %v2814_v44, %s5947_s28  ;;  %v424_v35 = vstv %s7053_s4  ;;  %v449_v44 = vmul.f32 %v6690_v23, %v448_v1  ;;  %v7099_v33 = vpop.permute.xlu0 %1781  ;;  %s7184_s4 = sld [smem:[#allocation2 + $0x26]] }
 0x1ec   : > { %v425_v2 = vmul.f32 %v6690_v23, %v424_v35  ;;  %v955_v23 = vstv %s7074_s7  ;;  %s7203_s7 = sld [smem:[#allocation2 + $0x48]] }
 0x1ed   : > { %v451_v48 = vadd.f32 %v449_v44, %v6800_v30  ;;  %v956_v56 = vmul.f32 %v6709_v42, %v955_v23  ;;  %v794_v44 = vmul.f32 %v6715_v62, %v792_v43 }
 0x1ee   : > { %v427_v27 = vadd.f32 %v425_v2, %v305_v36 }
 0x1ef   : > { %2820 = vrot.lane.b32.xlu1 %v2815_v58, %s5947_s28  ;;  %313 = vrot.lane.b32.xlu0 %v309_v18, %s5947_s28  ;;  %v7093_v58 = vpop.permute.xlu1 %1859  ;;  %v450_v18 = vmul.f32 %v6697_v17, %v448_v1  ;;  %v746_v1 = vstv %s7064_s6  ;;  %v7128_v53 = vpop.permute.xlu0 %2077  ;;  %s7197_s6 = sld [smem:[#allocation2 + $0xa6]] }
 0x1f3   : > { %315 = vrot.lane.b32.xlu1 %v310_v38, %s5947_s28  ;;  %499 = vrot.lane.b32.xlu0 %v495_v28, %s5947_s28  ;;  %v576_v38 = vmul.f32 %v6697_v17, %v574_v39  ;;  %v793_v28 = vmul.f32 %v6705_v16, %v792_v43  ;;  %v747_v39 = vmul.f32 %v6705_v16, %v746_v1  ;;  %v7117_v45 = vpop.permute.xlu1 %1861 }
 0x1f7   : > { %579 = vrot.lane.b32.xlu1 %v575_v32, %s5947_s28  ;;  %501 = vrot.lane.b32.xlu0 %v496_v14, %s5947_s28  ;;  %v426_v32 = vmul.f32 %v6697_v17, %v424_v35  ;;  %v452_v14 = vadd.f32 %v450_v18, %v6800_v30  ;;  %v571_v17 = vadd.f32 %v6979_v34, %v451_v48  ;;  %v909_v35 = vstv %s7080_s8  ;;  %s7212_s8 = sld [smem:[#allocation2 + $0x1b]] }
 0x1f8   : > { %v1141_v30 = vstv %s7090_s9  ;;  %v748_v18 = vmul.f32 %v6715_v62, %v746_v1  ;;  %v957_v34 = vmul.f32 %v6719_v3, %v955_v23  ;;  %v1221_v62 = vstv %s7109_s11  ;;  %v7146_v1 = vpop.permute.xlu1 %2240  ;;  %s7216_s9 = sld [smem:[#allocation2 + $0x7]] }
 0x1f9   : > { %v428_v16 = vadd.f32 %v426_v32, %v306_v55  ;;  %v1142_v43 = vmul.f32 %v6725_v20, %v1141_v30  ;;  %v491_v55 = vadd.f32 %v6973_v46, %v427_v27  ;;  %v572_v2 = vadd.f32 %v6987_v13, %v452_v14  ;;  %v7152_v46 = vpop.permute.xlu0 %2079  ;;  %s7224_s11 = sld [smem:[#allocation5 + $0x2]] }
 0x1fa   : > { %v749_v36 = vadd.f32 %v747_v39, %v571_v17  ;;  %v911_v48 = vmul.f32 %v6719_v3, %v909_v35  ;;  %v1071_v32 = vstv %s7115_s17  ;;  %v1222_v13 = vmul.f32 %v6725_v20, %v1221_v62  ;;  %s7232_s17 = sld [smem:[#allocation2 + $0x3b]] }
 0x1fb   : > { %581 = vrot.lane.b32.xlu1 %v576_v38, %s5947_s28  ;;  %797 = vrot.lane.b32.xlu0 %v793_v28, %s5947_s28  ;;  %v910_v38 = vmul.f32 %v6709_v42, %v909_v35  ;;  %v1095_v28 = vstv %s7097_s10  ;;  %v492_v42 = vadd.f32 %v6981_v63, %v428_v16  ;;  %v1143_v63 = vmul.f32 %v6732_v41, %v1141_v30  ;;  %s7218_s10 = sld [smem:[#allocation2 + $0x27]] }
 0x1fc   : > { %v1096_v23 = vmul.f32 %v6725_v20, %v1095_v28  ;;  %v789_v3 = vadd.f32 %v6993_v24, %v749_v36  ;;  %v750_v39 = vadd.f32 %v748_v18, %v572_v2  ;;  %v1072_v27 = vmul.f32 %v6725_v20, %v1071_v32  ;;  %v7167_v16 = vpop.permute.xlu1 %2242 }
 0x1fd   : > { %v912_v14 = vadd.f32 %v910_v38, %v491_v55  ;;  %v1097_v17 = vmul.f32 %v6732_v41, %v1095_v28  ;;  %v1393_v35 = vstv %s7133_s20  ;;  %v1223_v24 = vmul.f32 %v6732_v41, %v1221_v62  ;;  %v7180_v55 = vpop.permute.xlu0 %2426  ;;  %s7240_s20 = sld [smem:[#allocation2 + $0xc8]] }
 0x1fe   : > { %v790_v20 = vadd.f32 %v7001_v8, %v750_v39  ;;  %v1098_v38 = vadd.f32 %v1096_v23, %v789_v3  ;;  %v1602_v28 = vstv %s7142_s24  ;;  %v1394_v2 = vmul.f32 %v6741_v57, %v1393_v35  ;;  %s7243_s24 = sld [smem:[#allocation2 + $0x87]] }
 0x1ff   : > { %960 = vrot.lane.b32.xlu1 %v956_v56, %s5947_s28  ;;  %799 = vrot.lane.b32.xlu0 %v794_v44, %s5947_s28  ;;  %v1439_v56 = vstv %s7126_s19  ;;  %v913_v44 = vadd.f32 %v911_v48, %v492_v42  ;;  %v952_v18 = vadd.f32 %v6999_v6, %v912_v14  ;;  %v1556_v36 = vstv %s7150_s26  ;;  %s7236_s19 = sld [smem:[#allocation2 + $0x68]] }
 0x200   : > { %v1440_v30 = vmul.f32 %v6741_v57, %v1439_v56  ;;  %v1603_v6 = vmul.f32 %v6745_v40, %v1602_v28  ;;  %v1441_v8 = vmul.f32 %v6751_v51, %v1439_v56  ;;  %v1788_v42 = vstv %s7160_s27  ;;  %v7194_v48 = vpop.permute.xlu1 %2506  ;;  %s7256_s26 = sld [smem:[#allocation2 + $0x9b]] }
 0x201   : > { %v1074_v62 = vadd.f32 %v1072_v27, %v952_v18  ;;  %v1557_v23 = vmul.f32 %v6745_v40, %v1556_v36  ;;  %v1789_v3 = vmul.f32 %v6766_v26, %v1788_v42  ;;  %v1868_v40 = vstv %s7176_s30  ;;  %s7287_s27 = sld [smem:[#allocation2 + $0xa7]] }
 0x202   : > { %v1718_v27 = vstv %s7184_s4  ;;  %s7307_s30 = sld [smem:[#allocation2 + $0xe8]] }
 0x203   : > { %962 = vrot.lane.b32.xlu1 %v957_v34, %s5947_s28  ;;  %1146 = vrot.lane.b32.xlu0 %v1142_v43, %s5947_s28  ;;  %v953_v34 = vadd.f32 %v7007_v60, %v913_v44  ;;  %v1073_v43 = vmul.f32 %v6732_v41, %v1071_v32  ;;  %v1218_v60 = vadd.f32 %v7021_v0, %v1098_v38  ;;  %s7345_s4 = sld [smem:[#allocation2 + $0x69]] }
 0x204   : > { %v1099_v41 = vadd.f32 %v1097_v17, %v790_v20  ;;  %v1395_v32 = vmul.f32 %v6751_v51, %v1393_v35  ;;  %v1604_v0 = vmul.f32 %v6755_v22, %v1602_v28  ;;  %v1138_v51 = vadd.f32 %v7013_v49, %v1074_v62  ;;  %v7222_v35 = vpop.permute.xlu1 %2508 }
 0x205   : > { %v1075_v57 = vadd.f32 %v1073_v43, %v953_v34  ;;  %v1396_v39 = vadd.f32 %v1394_v2, %v1218_v60  ;;  %v1558_v44 = vmul.f32 %v6755_v22, %v1556_v36  ;;  %v1869_v49 = vmul.f32 %v6766_v26, %v1868_v40  ;;  %v7250_v2 = vld [vmem:[%s6061_s25 + $0x32] sm:$0xff] }
 0x206   : > { %v1219_v14 = vadd.f32 %v7031_v54, %v1099_v41  ;;  %v1790_v22 = vmul.f32 %v6777_v21, %v1788_v42  ;;  %v1559_v54 = vadd.f32 %v1557_v23, %v1138_v51  ;;  %v1719_v38 = vmul.f32 %v6766_v26, %v1718_v27  ;;  %v7260_v41 = vld [vmem:[%s6061_s25 + $0x39] sm:$0xff] }
 0x207   : > { %1226 = vrot.lane.b32.xlu1 %v1222_v13, %s5947_s28  ;;  %1148 = vrot.lane.b32.xlu0 %v1143_v63, %s5947_s28  ;;  %v1742_v13 = vstv %s7165_s29  ;;  %v7201_v63 = vpop.permute.xlu0 %2428  ;;  %v1139_v56 = vadd.f32 %v7023_v19, %v1075_v57  ;;  %v1436_v19 = vadd.f32 %v7040_v12, %v1396_v39  ;;  %v2040_v12 = vstv %s7197_s6  ;;  %s7303_s29 = sld [smem:[#allocation2 + $0x49]] }
 0x208   : > { %v1743_v17 = vmul.f32 %v6766_v26, %v1742_v13  ;;  %v1744_v28 = vmul.f32 %v6777_v21, %v1742_v13  ;;  %v348_v34 = vstv %s7203_s7  ;;  %v1870_v43 = vmul.f32 %v6777_v21, %v1868_v40  ;;  %s7399_s6 = sld [smem:[#allocation2 + $0xe9]] }
 0x209   : > { %v1560_v18 = vadd.f32 %v1558_v44, %v1139_v56  ;;  %v1599_v36 = vadd.f32 %v7051_v47, %v1559_v54  ;;  %v2249_v62 = vstv %s7212_s8  ;;  %v1720_v21 = vmul.f32 %v7260_v41, %v1718_v27  ;;  %v7298_v54 = vld [vmem:[%s6061_s25 + $0x8] sm:$0xff]  ;;  %s7405_s7 = sld [smem:[#allocation2 + $0x4a]] }
 0x20a   : > { %v2203_v47 = vstv %s7216_s9  ;;  %v2041_v23 = vmul.f32 %v7250_v2, %v2040_v12  ;;  %v7274_v13 = vstv %s7224_s11  ;;  %v2435_v56 = vstv %s7232_s17  ;;  %8424 = vst [vmem:[#allocation16_spill] sm:$0xff] %v7298_v54  ;;  %s7445_s8 = sld [smem:[#allocation2 + $0x6a]] }
 0x20b   : > { %1228 = vrot.lane.b32.xlu1 %v1223_v24, %s5947_s28  ;;  %1444 = vrot.lane.b32.xlu0 %v1440_v30, %s5947_s28  ;;  %v1397_v24 = vadd.f32 %v1395_v32, %v1219_v14  ;;  %v2086_v30 = vstv %s7192_s5  ;;  %v1600_v60 = vadd.f32 %v7066_v10, %v1560_v18  ;;  %v7269_v32 = vld [vmem:[%s6061_s25] sm:$0xff]  ;;  %v1721_v14 = vadd.f32 %v1719_v38, %v1599_v36  ;;  %s7354_s5 = sld [smem:[#allocation2 + $0xc9]] }
 0x20c   : > { %v2087_v26 = vmul.f32 %v7250_v2, %v2086_v30  ;;  %8421 = vst [vmem:[#allocation13_spill] sm:$0xff] %v7269_v32  ;;  %v7279_v10 = vld [vmem:[%s6061_s25 + $0x48] sm:$0xff]  ;;  %v2365_v18 = vstv %s7218_s10  ;;  %v2389_v38 = vstv %s7243_s24  ;;  %s7458_s9 = sld [smem:[#allocation2 + $0xca]] }
 0x20d   : > { %8422 = vst [vmem:[#allocation14_spill] sm:$0xff] %v7279_v10  ;;  %v1722_v44 = vadd.f32 %v1720_v21, %v1600_v60  ;;  %v2204_v27 = vmul.f32 %v7279_v10, %v2203_v47  ;;  %s7502_s10 = sld [smem:[#allocation2 + $0xea]] }
 0x20e   : > { %s7518_s11 = sld [smem:[#allocation2 + $0x4b]] }
 0x20f   : > { %1607 = vrot.lane.b32.xlu1 %v1603_v6, %s5947_s28  ;;  %1446 = vrot.lane.b32.xlu0 %v1441_v8, %s5947_s28  ;;  %v1437_v6 = vadd.f32 %v7055_v15, %v1397_v24  ;;  %v1745_v8 = vadd.f32 %v1743_v17, %v1436_v19  ;;  %v349_v15 = vmul.f32 %v7269_v32, %v348_v34  ;;  %v534_v24 = vstv %s7236_s19  ;;  %s7527_s17 = sld [smem:[#allocation2 + $0x6b]] }
 0x210   : > { %v1786_v60 = vadd.f32 %v7099_v33, %v1722_v44  ;;  %s7533_s19 = sld [smem:[#allocation2 + $0xcb]] }
 0x211   : > { %v1865_v39 = vadd.f32 %v7093_v58, %v1745_v8  ;;  %v1746_v40 = vadd.f32 %v1744_v28, %v1437_v6  ;;  %v351_v19 = vadd.f32 %v349_v15, %v7274_v13  ;;  %v350_v58 = vmul.f32 %v7298_v54, %v348_v34  ;;  %v7312_v28 = vld [vmem:[%s6061_s25 + $0x50] sm:$0xff]  ;;  %s7543_s24 = sld [smem:[#allocation2 + $0xeb]] }
 0x212   : > { %8425 = vst [vmem:[#allocation17_spill] sm:$0xff] %v7312_v28  ;;  %v2515_v8 = vstv %s7256_s26  ;;  %v2205_v21 = vmul.f32 %v7312_v28, %v2203_v47  ;;  %s7546_s26 = sld [smem:[#allocation2 + $0x8]] }
 0x213   : > { %1609 = vrot.lane.b32.xlu1 %v1604_v0, %s5947_s28  ;;  %1793 = vrot.lane.b32.xlu0 %v1789_v3, %s5947_s28  ;;  %v2250_v0 = vmul.f32 %v7279_v10, %v2249_v62  ;;  %v7283_v3 = vld [vmem:[%s6061_s25 + $0x3a] sm:$0xff]  ;;  %v1866_v36 = vadd.f32 %v7117_v45, %v1746_v40  ;;  %v2043_v6 = vadd.f32 %v2041_v23, %v1865_v39  ;;  %v7340_v39 = vld [vmem:[%s6061_s25 + $0x51] sm:$0xff] }
 0x214   : > { %8423 = vst [vmem:[#allocation15_spill] sm:$0xff] %v7283_v3  ;;  %v2088_v51 = vmul.f32 %v7283_v3, %v2086_v30  ;;  %v2042_v17 = vmul.f32 %v7283_v3, %v2040_v12  ;;  %v614_v30 = vstv %s7240_s20  ;;  %v2251_v12 = vmul.f32 %v7312_v28, %v2249_v62  ;;  %s7537_s20 = sld [smem:[#allocation2 + $0xbb]] }
 0x215   : > { %v7234_v20 = vpop.permute.xlu0 %3374  ;;  %v2437_v40 = vmul.f32 %v7340_v39, %v2435_v56  ;;  %v2083_v44 = vadd.f32 %v7128_v53, %v2043_v6  ;;  %v2391_v6 = vmul.f32 %v7340_v39, %v2389_v38 }
 0x217   : > { %1873 = vrot.lane.b32.xlu1 %v1869_v49, %s5947_s28  ;;  %1795 = vrot.lane.b32.xlu0 %v1790_v22, %s5947_s28 }
 0x219   : > { %v7263_v42 = vpop.permute.xlu1 %3376  ;;  %v7265_v57 = vpop.permute.xlu0 %2724 }
 0x21b   : > { %1875 = vrot.lane.b32.xlu1 %v1870_v43, %s5947_s28  ;;  %2091 = vrot.lane.b32.xlu0 %v2087_v26, %s5947_s28  ;;  %v7316_v43 = vld [vmem:[%s6061_s25 + $0x49] sm:$0xff]  ;;  %v1785_v26 = vadd.f32 %v7078_v59, %v1721_v14  ;;  %v5528_v59 = vpop.f32.mrf.mxu1  ;;  %v352_v14 = vadd.f32 %v350_v58, %v7274_v13  ;;  %v2207_v58 = vadd.f32 %v2205_v21, %v1786_v60  ;;  %v832_v60 = vstv %s7307_s30  ;;  %s7557_s30 = sld [smem:[#allocation2 + $0x88]] }
 0x21c   : > { %8426 = vst [vmem:[#allocation18_spill] sm:$0xff] %v7316_v43  ;;  %v2436_v34 = vmul.f32 %v7316_v43, %v2435_v56  ;;  %v7332_v45 = vmul.f32 %v7316_v43, %v2365_v18  ;;  %v2390_v33 = vmul.f32 %v7316_v43, %v2389_v38  ;;  %v2516_v47 = vmul.f32 %v7316_v43, %v2515_v8  ;;  %v7349_v43 = vld [vmem:[%s6061_s25 + $0x9] sm:$0xff] }
 0x21d   : > { %v7292_v49 = vpop.permute.xlu1 %2726  ;;  %v7294_v22 = vpop.permute.xlu0 %3540  ;;  %v536_v3 = vmul.f32 %v7349_v43, %v534_v24  ;;  %v7366_v38 = vld [vmem:[%s6061_s25 + $0x4a] sm:$0xff] }
 0x21e   : > { %v2998_v56 = vpop.f32.mrf.mxu1 }
 0x21f   : > { %2254 = vrot.lane.b32.xlu1 %v2250_v0, %s5947_s28  ;;  %2093 = vrot.lane.b32.xlu0 %v2088_v51, %s5947_s28  ;;  %v7327_v51 = vld [vmem:[%s6061_s25 + $0x1] sm:$0xff] }
 0x220   : > { %8427 = vst [vmem:[#allocation19_spill] sm:$0xff] %v7327_v51  ;;  %v535_v62 = vmul.f32 %v7327_v51, %v534_v24  ;;  %v615_v54 = vmul.f32 %v7327_v51, %v614_v30  ;;  %v2206_v51 = vadd.f32 %v2204_v27, %v1785_v26  ;;  %v995_v26 = vstv %s7303_s29  ;;  %v5542_v21 = vpop.f32.mrf.mxu1  ;;  %s7555_s29 = sld [smem:[#allocation2 + $0x28]] }
 0x221   : > { %v7324_v15 = vpop.permute.xlu1 %3542  ;;  %v394_v0 = vpop.permute.xlu0 %393 }
 0x222   : > { %v399_v23 = vadd.f32 %v394_v0, %v351_v19  ;;  %v2044_v19 = vadd.f32 %v2042_v17, %v1866_v36  ;;  %v2687_v0 = vstv %s7287_s27  ;;  %v616_v17 = vmul.f32 %v7349_v43, %v614_v30  ;;  %s7552_s27 = sld [smem:[#allocation2 + $0x5c]] }
 0x223   : > { %2256 = vrot.lane.b32.xlu1 %v2251_v12, %s5947_s28  ;;  %2440 = vrot.lane.b32.xlu0 %v2436_v34, %s5947_s28  ;;  %v617_v34 = vadd.f32 %v615_v54, %v7274_v13  ;;  %v2367_v36 = vmul.f32 %v7340_v39, %v2365_v18  ;;  %v2246_v24 = vadd.f32 %v7146_v1, %v2206_v51  ;;  %v7372_v1 = vld [vmem:[%s6061_s25 + $0x18] sm:$0xff] }
 0x224   : > { %v537_v28 = vadd.f32 %v535_v62, %v399_v23  ;;  %v2084_v30 = vadd.f32 %v7152_v46, %v2044_v19  ;;  %v2392_v62 = vadd.f32 %v2390_v33, %v2083_v44  ;;  %v2247_v18 = vadd.f32 %v7167_v16, %v2207_v58  ;;  %v7377_v44 = vld [vmem:[%s6061_s25 + $0x2] sm:$0xff] }
 0x225   : > { %v5521_v32 = vpop.f32.mrf.mxu0  ;;  %v396_v12 = vpop.permute.xlu1 %395  ;;  %v2688_v23 = vmul.f32 %v7366_v38, %v2687_v0  ;;  %v996_v46 = vmul.f32 %v7372_v1, %v995_v26  ;;  %v618_v16 = vadd.f32 %v616_v17, %v7274_v13  ;;  %v833_v19 = vmul.f32 %v7377_v44, %v832_v60 }
 0x226   : > { %v3004_v10 = vadd.f32 %v5528_v59, %v5521_v32  ;;  %v400_v53 = vadd.f32 %v396_v12, %v352_v14  ;;  %v660_v27 = vpop.permute.xlu0 %659  ;;  %v2517_v32 = vmul.f32 %v7340_v39, %v2515_v8  ;;  %v7385_v12 = vld [vmem:[%s6061_s25 + $0x20] sm:$0xff] }
 0x227   : > { %v2917_v54 = vpop.f32.mrf.mxu0  ;;  %2520 = vrot.lane.b32.xlu1 %v2516_v47, %s5947_s28  ;;  %2442 = vrot.lane.b32.xlu0 %v2437_v40, %s5947_s28  ;;  %v665_v14 = vadd.f32 %v660_v27, %v537_v28  ;;  %v7381_v28 = vld [vmem:[%s6061_s25 + $0xa] sm:$0xff]  ;;  %v2393_v27 = vadd.f32 %v2391_v6, %v2084_v30 }
 0x228   : > { %v2999_v59 = vadd.f32 %v2998_v56, %v2917_v54  ;;  %5553 = vmatprep.subr.mxu1 %v3004_v10  ;;  %v538_v47 = vadd.f32 %v536_v3, %v400_v53  ;;  %v834_v58 = vmul.f32 %v7381_v28, %v832_v60  ;;  %v997_v56 = vmul.f32 %v7385_v12, %v995_v26  ;;  %v3164_v3 = vpop.f32.mrf.mxu1 }
 0x229   : > { %5554 = vmatpush3.msra.mxu1 %v3004_v10  ;;  %v716_v8 = vpop.permute.xlu1 %715  ;;  %v2512_v53 = vadd.f32 %v7194_v48, %v2392_v62  ;;  %v8428_v54 = vmov 1.0   ;;  %v1181_v60 = vstv %s7345_s4  ;;  %v2369_v26 = vadd.f32 %v2367_v36, %v2247_v18  ;;  %v7408_v62 = vld [vmem:[%s6061_s25 + $0x52] sm:$0xff]  ;;  %s7563_s4 = sld [smem:[#allocation2 + $0x7c]] }
 0x22a   : > { %v5535_v51 = vpop.f32.mrf.mxu0  ;;  %5555 = vmatprep.subr.mxu1 %v2999_v59  ;;  %v721_v33 = vadd.f32 %v716_v8, %v617_v34  ;;  %v662_v40 = vpop.permute.xlu0 %661  ;;  %v2368_v34 = vadd.f32 %v7332_v45, %v2246_v24  ;;  %v998_v45 = vadd.f32 %v996_v46, %v665_v14  ;;  %v7417_v18 = vld [vmem:[%s6061_s25 + $0x19] sm:$0xff]  ;;  %v2513_v46 = vadd.f32 %v7222_v35, %v2393_v27 }
 0x22b   : > { %v3170_v10 = vadd.f32 %v5542_v21, %v5535_v51  ;;  %5556 = vmatpush3.msra.mxu1 %v2999_v59  ;;  %2522 = vrot.lane.b32.xlu1 %v2517_v32, %s5947_s28  ;;  %v666_v6 = vadd.f32 %v662_v40, %v538_v47  ;;  %v1261_v21 = vstv %s7354_s5  ;;  %v2689_v59 = vmul.f32 %v7408_v62, %v2687_v0  ;;  %s7567_s5 = sld [smem:[#allocation2 + $0xdc]] }
 0x22c   : > { %v3083_v17 = vpop.f32.mrf.mxu0  ;;  %5558 = vmatmul.mubr.msk.f32.vlgmr.msra.gmra.mxu1 %vm2846_vm4, %v6922_v7  ;;  %5570 = vmatprep.subr.msk.mxu1 %vm6302_vm0, %v8428_v54  ;;  %v835_v30 = vadd.f32 %v833_v19, %v721_v33  ;;  %v1182_v14 = vmul.f32 %v7417_v18, %v1181_v60  ;;  %v2432_v8 = vadd.f32 %v7180_v55, %v2368_v34  ;;  %v1479_v34 = vstv %s7399_s6  ;;  %s7572_s6 = sld [smem:[#allocation2 + $0xa8]] }
 0x22d   : > { %v3165_v32 = vadd.f32 %v3164_v3, %v3083_v17  ;;  %5543 = vmatprep.subr.mxu0 %v3170_v10  ;;  %5560 = vmatprep.mubr.msk.f32.mxu1 %vm2846_vm4, %v6931_v5  ;;  %v718_v48 = vpop.permute.xlu1 %717  ;;  %v2690_v51 = vadd.f32 %v2688_v23, %v2512_v53  ;;  %v2433_v0 = vadd.f32 %v7201_v63, %v2369_v26 }
 0x22e   : > { %5544 = vmatpush3.msra.mxu0 %v3170_v10  ;;  %5571 = vmatpush3.msk.msra.mxu1 %vm6302_vm0, %v8428_v54  ;;  %v722_v24 = vadd.f32 %v718_v48, %v618_v16  ;;  %v878_v36 = vpop.permute.xlu0 %877  ;;  %v1262_v55 = vmul.f32 %v7417_v18, %v1261_v21  ;;  %v999_v40 = vadd.f32 %v997_v56, %v666_v6  ;;  %v7487_v6 = vld [vmem:[%s6061_s25 + $0x30] sm:$0xff] }
 0x22f   : > { %5545 = vmatprep.subr.mxu0 %v3165_v32  ;;  %5572 = vmatprep.subr.msk.mxu1 %vm6309_vm1, %v8428_v54  ;;  %v883_v35 = vadd.f32 %v878_v36, %v835_v30  ;;  %v2730_v16 = vadd.f32 %v7265_v57, %v2690_v51  ;;  %v2691_v19 = vadd.f32 %v2689_v59, %v2513_v46  ;;  %v7453_v57 = vld [vmem:[%s6061_s25 + $0x21] sm:$0xff]  ;;  %v1828_v51 = vstv %s7445_s8  ;;  %s7585_s8 = sld [smem:[#allocation2 + $0xfc]] }
 0x230   : > { %5546 = vmatpush3.msra.mxu0 %v3165_v32  ;;  %5561 = vmatmul.mubr.msk.f32.gmra.mxu1 %vm2846_vm4, %v6940_v9  ;;  %v836_v47 = vadd.f32 %v834_v58, %v722_v24  ;;  %v1183_v56 = vmul.f32 %v7453_v57, %v1181_v60  ;;  %v1263_v3 = vmul.f32 %v7453_v57, %v1261_v21  ;;  %v1642_v32 = vstv %s7405_s7  ;;  %s7579_s7 = sld [smem:[#allocation2 + $0x9]] }
 0x231   : > { %5548 = vmatmul.mubr.msk.f32.vlgmr.msra.gmra.mxu0 %vm2846_vm4, %v6946_v25  ;;  %5563 = vmatprep.subr.msk.mxu0 %vm6391_vm2, %v8428_v54  ;;  %v1041_v33 = vpop.permute.xlu1 %1040  ;;  %v1264_v26 = vadd.f32 %v1262_v55, %v883_v35  ;;  %v2731_v60 = vadd.f32 %v7292_v49, %v2691_v19  ;;  %v1643_v24 = vmul.f32 %v7487_v6, %v1642_v32 }
 0x232   : > { %5574 = vmatprep.mubr.msk.f32.mxu1 %vm2846_vm4, %v2432_v8  ;;  %5564 = vmatpush3.msk.msra.mxu0 %vm6391_vm2, %v8428_v54  ;;  %v1046_v63 = vadd.f32 %v1041_v33, %v998_v45  ;;  %v880_v23 = vpop.permute.xlu0 %879  ;;  %v7513_v8 = vld [vmem:[%s6061_s25 + $0x38] sm:$0xff] }
 0x233   : > { %5573 = vmatpush3.msk.msra.mxu1 %vm6309_vm1, %v8428_v54  ;;  %5550 = vmatprep.mubr.msk.f32.mxu0 %vm2846_vm4, %v6953_v11  ;;  %v884_v10 = vadd.f32 %v880_v23, %v836_v47  ;;  %v1644_v46 = vmul.f32 %v7513_v8, %v1642_v32  ;;  %v7523_v23 = vld [vmem:[%s6061_s25 + $0x31] sm:$0xff] }
 0x234   : > { %5575 = vmatmul.mubr.msk.f32.vlgmr.msra.gmra.mxu1 %vm2846_vm4, %v2433_v0  ;;  %5584 = vmatprep.subr.msk.mxu1 %vm6302_vm0, %v8428_v54  ;;  %v1184_v27 = vadd.f32 %v1182_v14, %v1046_v63  ;;  %v7509_v14 = vld [vmem:[%s6061_s25 + $0x22] sm:$0xff]  ;;  %v1908_v0 = vstv %s7458_s9  ;;  %s7591_s9 = sld [smem:[#allocation2 + $0x5d]] }
 0x235   : > { %5551 = vmatmul.mubr.msk.f32.gmra.mxu0 %vm2846_vm4, %v6955_v31  ;;  %5565 = vmatprep.subr.msk.mxu0 %vm6406_vm3, %v8428_v54  ;;  %v1043_v58 = vpop.permute.xlu1 %1042  ;;  %v1265_v45 = vadd.f32 %v1263_v3, %v884_v10 }
 0x236   : > { %5585 = vmatpush3.msk.msra.mxu1 %vm6302_vm0, %v8428_v54  ;;  %5588 = vmatprep.mubr.msk.f32.mxu1 %vm2846_vm4, %v2730_v16  ;;  %v1047_v53 = vadd.f32 %v1043_v58, %v999_v40  ;;  %v1307_v17 = vpop.permute.xlu0 %1306  ;;  %v1829_v40 = vmul.f32 %v7523_v23, %v1828_v51  ;;  %v1909_v16 = vmul.f32 %v7523_v23, %v1908_v0 }
 0x237   : > { %5566 = vmatpush3.msk.msra.mxu0 %vm6406_vm3, %v8428_v54  ;;  %5567 = vmatprep.mubr.msk.f32.mxu0 %vm2846_vm4, %v7234_v20  ;;  %v7483_v20 = vld [vmem:[%s6061_s25 + $0x1a] sm:$0xff] }
 0x238   : > { %5586 = vmatprep.subr.msk.mxu1 %vm6309_vm1, %v8428_v54  ;;  %5577 = vmatprep.subr.msk.mxu0 %vm6391_vm2, %v8428_v54  ;;  %v1480_v49 = vmul.f32 %v7483_v20, %v1479_v34  ;;  %v1185_v36 = vadd.f32 %v1183_v56, %v1047_v53  ;;  %v1830_v53 = vmul.f32 %v7260_v41, %v1828_v51 }
 0x239   : > { %5587 = vmatpush3.msk.msra.mxu1 %vm6309_vm1, %v8428_v54  ;;  %5568 = vmatmul.mubr.msk.f32.vlgmr.msra.gmra.mxu0 %vm2846_vm4, %v7263_v42  ;;  %v1363_v48 = vpop.permute.xlu1 %1362  ;;  %v1312_v42 = vadd.f32 %v1307_v17, %v1184_v27  ;;  %v1910_v27 = vmul.f32 %v7260_v41, %v1908_v0  ;;  %v2126_v17 = vstv %s7502_s10  ;;  %s7599_s10 = sld [smem:[#allocation2 + $0x29]] }
 0x23a   : > { %5589 = vmatmul.mubr.msk.f32.vlgmr.msra.gmra.mxu1 %vm2846_vm4, %v2731_v60  ;;  %5578 = vmatpush3.msk.msra.mxu0 %vm6391_vm2, %v8428_v54  ;;  %v1368_v30 = vadd.f32 %v1363_v48, %v1264_v26  ;;  %v1309_v21 = vpop.permute.xlu0 %1308  ;;  %v2289_v26 = vstv %s7518_s11  ;;  %s7604_s11 = sld [smem:[#allocation2 + $0x89]] }
 0x23b   : > { %5581 = vmatprep.mubr.msk.f32.mxu0 %vm2846_vm4, %v7294_v22  ;;  %5579 = vmatprep.subr.msk.mxu0 %vm6406_vm3, %v8428_v54  ;;  %v1481_v22 = vmul.f32 %v7509_v14, %v1479_v34  ;;  %v1313_v33 = vadd.f32 %v1309_v21, %v1185_v36 }
 0x23c   : > { %5580 = vmatpush3.msk.msra.mxu0 %vm6406_vm3, %v8428_v54  ;;  %5605 = vmatprep.mubr.msk.f32.mxu1 %vm2846_vm4, %v6916_v4  ;;  %v1482_v55 = vadd.f32 %v1480_v49, %v1368_v30  ;;  %v8429_v30 = vld [vmem:[#allocation14_spill] sm:$0xff] }
 0x23d   : > { %5582 = vmatmul.mubr.msk.f32.vlgmr.msra.gmra.mxu0 %vm2846_vm4, %v7324_v15  ;;  %v1365_v59 = vpop.permute.xlu1 %1364  ;;  %v1645_v15 = vadd.f32 %v1643_v24, %v1312_v42  ;;  %v1646_v3 = vadd.f32 %v1644_v46, %v1313_v33  ;;  %v2127_v42 = vmul.f32 %v7250_v2, %v2126_v17  ;;  %v2290_v36 = vmul.f32 %v8429_v30, %v2289_v26  ;;  %v8430_v33 = vld [vmem:[#allocation15_spill] sm:$0xff] }
 0x23e   : > { %v1369_v47 = vadd.f32 %v1365_v59, %v1265_v45  ;;  %v1525_v35 = vpop.permute.xlu0 %1524  ;;  %5595 = vmatprep.mubr.msk.f32.mxu0 %vm2846_vm4, %v6938_v29 }
 0x23f   : > { %v1530_v19 = vadd.f32 %v1525_v35, %v1482_v55  ;;  %v8431_v55 = vld [vmem:[#allocation17_spill] sm:$0xff] }
 0x240   : > { %v1483_v58 = vadd.f32 %v1481_v22, %v1369_v47  ;;  %v2128_v47 = vmul.f32 %v8430_v33, %v2126_v17  ;;  %v2291_v35 = vmul.f32 %v8431_v55, %v2289_v26 }
 0x241   : > { %v1688_v63 = vpop.permute.xlu1 %1687  ;;  %v1911_v49 = vadd.f32 %v1909_v16, %v1530_v19 }
 0x242   : > { %v1693_v10 = vadd.f32 %v1688_v63, %v1645_v15  ;;  %v1527_v56 = vpop.permute.xlu0 %1526  ;;  %v2475_v15 = vstv %s7527_s17  ;;  %v2555_v63 = vstv %s7533_s19  ;;  %s7613_s17 = sld [smem:[#allocation2 + $0x7d]] }
 0x243   : > { %v1531_v32 = vadd.f32 %v1527_v56, %v1483_v58  ;;  %v8432_v56 = vld [vmem:[#allocation18_spill] sm:$0xff]  ;;  %s7623_s19 = sld [smem:[#allocation2 + $0xa9]] }
 0x244   : > { %v1831_v48 = vadd.f32 %v1829_v40, %v1693_v10 }
 0x245   : > { %v1690_v34 = vpop.permute.xlu1 %1689  ;;  %v1912_v51 = vadd.f32 %v1910_v27, %v1531_v32 }
 0x246   : > { %v1694_v60 = vadd.f32 %v1690_v34, %v1646_v3  ;;  %v1954_v45 = vpop.permute.xlu0 %1953  ;;  %v2476_v3 = vmul.f32 %v8432_v56, %v2475_v15 }
 0x247   : > { %v1959_v21 = vadd.f32 %v1954_v45, %v1831_v48  ;;  %v2477_v45 = vmul.f32 %v7340_v39, %v2475_v15 }
 0x248   : > { %v1832_v22 = vadd.f32 %v1830_v53, %v1694_v60  ;;  %v2556_v53 = vmul.f32 %v8432_v56, %v2555_v63 }
 0x249   : > { %v2010_v24 = vpop.permute.xlu1 %2009  ;;  %v2292_v58 = vadd.f32 %v2290_v36, %v1959_v21 }
 0x24a   : > { %v2015_v59 = vadd.f32 %v2010_v24, %v1911_v49  ;;  %v1956_v46 = vpop.permute.xlu0 %1955  ;;  %v2733_v24 = vstv %s7537_s20  ;;  %s7625_s20 = sld [smem:[#allocation2 + $0xdd]] }
 0x24b   : > { %v1960_v40 = vadd.f32 %v1956_v46, %v1832_v22  ;;  %v2557_v46 = vmul.f32 %v7340_v39, %v2555_v63  ;;  %v2734_v15 = vmul.f32 %v7366_v38, %v2733_v24 }
 0x24c   : > { %v2129_v19 = vadd.f32 %v2127_v42, %v2015_v59  ;;  %v2773_v42 = vstv %s7543_s24  ;;  %s7629_s24 = sld [smem:[#allocation2 + $0xa]] }
 0x24d   : > { %v2012_v0 = vpop.permute.xlu1 %2011  ;;  %v2293_v60 = vadd.f32 %v2291_v35, %v1960_v40  ;;  %v268_v35 = vstv %s7546_s26  ;;  %s7637_s26 = sld [smem:[#allocation2 + $0xfd]] }
 0x24e   : > { %v2016_v16 = vadd.f32 %v2012_v0, %v1912_v51  ;;  %v2172_v10 = vpop.permute.xlu0 %2171 }
 0x24f   : > { %v2177_v27 = vadd.f32 %v2172_v10, %v2129_v19 }
 0x250   : > { %v2130_v26 = vadd.f32 %v2128_v47, %v2016_v16  ;;  %v2774_v47 = vmul.f32 %v7366_v38, %v2773_v42 }
 0x251   : > { %v2335_v34 = vpop.permute.xlu1 %2334  ;;  %v2558_v22 = vadd.f32 %v2556_v53, %v2177_v27  ;;  %v2775_v53 = vmul.f32 %v7408_v62, %v2773_v42  ;;  %v2735_v27 = vmul.f32 %v7408_v62, %v2733_v24 }
 0x252   : > { %v2340_v17 = vadd.f32 %v2335_v34, %v2292_v58  ;;  %v2174_v32 = vpop.permute.xlu0 %2173  ;;  %v8433_v58 = vld [vmem:[#allocation13_spill] sm:$0xff] }
 0x253   : > { %v2178_v36 = vadd.f32 %v2174_v32, %v2130_v26 }
 0x254   : > { %v2478_v48 = vadd.f32 %v2476_v3, %v2340_v17  ;;  %v269_v3 = vmul.f32 %v8433_v58, %v268_v35 }
 0x255   : > { %v2337_v49 = vpop.permute.xlu1 %2336  ;;  %v2559_v63 = vadd.f32 %v2557_v46, %v2178_v36  ;;  %v430_v36 = vstv %s7555_s29  ;;  %v668_v46 = vstv %s7563_s4  ;;  %s7649_s29 = sld [smem:[#allocation2 + $0x5e]] }
 0x256   : > { %v2341_v21 = vadd.f32 %v2337_v49, %v2293_v60  ;;  %v2601_v59 = vpop.permute.xlu0 %2600  ;;  %v402_v60 = vstv %s7552_s27  ;;  %v271_v42 = vadd.f32 %v269_v3, %v7274_v13  ;;  %s7646_s27 = sld [smem:[#allocation2 + $0x2a]] }
 0x257   : > { %v2606_v51 = vadd.f32 %v2601_v59, %v2478_v48  ;;  %v8434_v48 = vld [vmem:[#allocation16_spill] sm:$0xff]  ;;  %s7661_s4 = sld [smem:[#allocation2 + $0x7e]] }
 0x258   : > { %v2479_v0 = vadd.f32 %v2477_v45, %v2341_v21  ;;  %v270_v45 = vmul.f32 %v8434_v48, %v268_v35  ;;  %v454_v21 = vstv %s7557_s30  ;;  %v8435_v35 = vld [vmem:[#allocation19_spill] sm:$0xff]  ;;  %s7653_s30 = sld [smem:[#allocation2 + $0x8a]] }
 0x259   : > { %3881 = vrot.lane.b32.xlu0 %v2606_v51, %s5947_s28  ;;  %v2657_v40 = vpop.permute.xlu1 %2656 }
 0x25a   : > { %v2603_v16 = vpop.permute.xlu0 %2602  ;;  %v2662_v19 = vadd.f32 %v2657_v40, %v2558_v22  ;;  %v403_v22 = vmul.f32 %v8433_v58, %v402_v60  ;;  %v455_v40 = vmul.f32 %v8435_v35, %v454_v21 }
 0x25b   : > { %v2607_v10 = vadd.f32 %v2603_v16, %v2479_v0 }
 0x25c   : > { %v2776_v34 = vadd.f32 %v2774_v47, %v2662_v19  ;;  %v272_v47 = vadd.f32 %v270_v45, %v7274_v13  ;;  %v404_v19 = vmul.f32 %v8434_v48, %v402_v60  ;;  %v432_v60 = vmul.f32 %v7349_v43, %v430_v36 }
 0x25d   : > { %2738 = vrot.lane.b32.xlu0 %v2734_v15, %s5947_s28  ;;  %3883 = vrot.lane.b32.xlu1 %v2607_v10, %s5947_s28  ;;  %v2659_v17 = vpop.permute.xlu1 %2658  ;;  %v431_v15 = vmul.f32 %v8435_v35, %v430_v36  ;;  %v724_v10 = vstv %s7567_s5  ;;  %v915_v45 = vstv %s7579_s7  ;;  %s7670_s5 = sld [smem:[#allocation2 + $0xaa]] }
 0x25e   : > { %v2663_v26 = vadd.f32 %v2659_v17, %v2559_v63  ;;  %v2819_v32 = vpop.permute.xlu0 %2818  ;;  %v669_v63 = vmul.f32 %v8435_v35, %v668_v46  ;;  %s7683_s7 = sld [smem:[#allocation2 + $0xfe]] }
 0x25f   : > { %v2824_v49 = vadd.f32 %v2819_v32, %v2776_v34  ;;  %v456_v34 = vmul.f32 %v7349_v43, %v454_v21  ;;  %v457_v32 = vadd.f32 %v455_v40, %v7274_v13  ;;  %v670_v21 = vmul.f32 %v7349_v43, %v668_v46 }
 0x260   : > { %v2777_v59 = vadd.f32 %v2775_v53, %v2663_v26  ;;  %v752_v53 = vstv %s7572_s6  ;;  %v726_v46 = vmul.f32 %v7349_v43, %v724_v10  ;;  %s7673_s6 = sld [smem:[#allocation2 + $0xde]] }
 0x261   : > { %2740 = vrot.lane.b32.xlu1 %v2735_v27, %s5947_s28  ;;  %4047 = vrot.lane.b32.xlu0 %v2824_v49, %s5947_s28  ;;  %v2821_v24 = vpop.permute.xlu1 %2820  ;;  %v753_v49 = vmul.f32 %v7377_v44, %v752_v53 }
 0x262   : > { %v2825_v51 = vadd.f32 %v2821_v24, %v2777_v59  ;;  %v314_v0 = vpop.permute.xlu0 %313  ;;  %v886_v59 = vstv %s7585_s8  ;;  %s7693_s8 = sld [smem:[#allocation2 + $0x5f]] }
 0x263   : > { %v319_v16 = vadd.f32 %v314_v0, %v271_v42  ;;  %v725_v42 = vmul.f32 %v8435_v35, %v724_v10 }
 0x265   : > { %4049 = vrot.lane.b32.xlu1 %v2825_v51, %s5947_s28  ;;  %407 = vrot.lane.b32.xlu0 %v403_v22, %s5947_s28  ;;  %v316_v3 = vpop.permute.xlu1 %315  ;;  %v433_v26 = vadd.f32 %v431_v15, %v319_v16  ;;  %v458_v22 = vadd.f32 %v456_v34, %v7274_v13  ;;  %v916_v15 = vmul.f32 %v7372_v1, %v915_v45 }
 0x266   : > { %v320_v27 = vadd.f32 %v316_v3, %v272_v47  ;;  %v500_v17 = vpop.permute.xlu0 %499  ;;  %v754_v16 = vmul.f32 %v7381_v28, %v752_v53  ;;  %v887_v13 = vmul.f32 %v7377_v44, %v886_v59  ;;  %v1077_v3 = vstv %s7599_s10  ;;  %s5270_s10 = sld [smem:[#allocation2 + $0xdf]] }
 0x267   : > { %v505_v36 = vadd.f32 %v500_v17, %v433_v26  ;;  %v917_v26 = vmul.f32 %v7385_v12, %v915_v45 }
 0x268   : > { %v434_v0 = vadd.f32 %v432_v60, %v320_v27  ;;  %v1101_v60 = vstv %s7604_s11  ;;  %s5288_s11 = sld [smem:[#allocation2 + $0xff]] }
 0x269   : > { %409 = vrot.lane.b32.xlu1 %v404_v19, %s5947_s28  ;;  %673 = vrot.lane.b32.xlu0 %v669_v63, %s5947_s28  ;;  %v580_v24 = vpop.permute.xlu1 %579  ;;  %v1049_v19 = vstv %s7591_s9  ;;  %v918_v17 = vadd.f32 %v916_v15, %v505_v36  ;;  %s7704_s9 = sld [smem:[#allocation2 + $0x7f]] }
 0x26a   : > { %v585_v51 = vadd.f32 %v580_v24, %v457_v32  ;;  %v502_v47 = vpop.permute.xlu0 %501 }
 0x26b   : > { %v506_v34 = vadd.f32 %v502_v47, %v434_v0  ;;  %v1102_v0 = vmul.f32 %v7417_v18, %v1101_v60 }
 0x26c   : > { %v755_v40 = vadd.f32 %v753_v49, %v585_v51  ;;  %v1078_v49 = vmul.f32 %v7417_v18, %v1077_v3 }
 0x26d   : > { %729 = vrot.lane.b32.xlu1 %v725_v42, %s5947_s28  ;;  %675 = vrot.lane.b32.xlu0 %v670_v21, %s5947_s28  ;;  %v582_v63 = vpop.permute.xlu1 %581  ;;  %v1050_v42 = vmul.f32 %v7372_v1, %v1049_v19  ;;  %v888_v21 = vmul.f32 %v7381_v28, %v886_v59  ;;  %v919_v51 = vadd.f32 %v917_v26, %v506_v34  ;;  %v1562_v26 = vstv %s7629_s24  ;;  %s5070_s24 = sld [smem:[#allocation2 + $0xbc]] }
 0x26e   : > { %v586_v27 = vadd.f32 %v582_v63, %v458_v22  ;;  %v798_v53 = vpop.permute.xlu0 %797  ;;  %v1315_v22 = vstv %s7613_s17  ;;  %v1051_v59 = vmul.f32 %v7385_v12, %v1049_v19  ;;  %v1371_v63 = vstv %s7625_s20  ;;  %s5022_s17 = sld [smem:[#allocation2 + $0x1c]] }
 0x26f   : > { %v803_v32 = vadd.f32 %v798_v53, %v755_v40  ;;  %v1079_v40 = vmul.f32 %v7453_v57, %v1077_v3  ;;  %v1103_v3 = vmul.f32 %v7453_v57, %v1101_v60  ;;  %s5050_s20 = sld [smem:[#allocation2 + $0x9c]] }
 0x270   : > { %v756_v10 = vadd.f32 %v754_v16, %v586_v27  ;;  %v1316_v16 = vmul.f32 %v7417_v18, %v1315_v22 }
 0x271   : > { %731 = vrot.lane.b32.xlu1 %v726_v46, %s5947_s28  ;;  %891 = vrot.lane.b32.xlu0 %v887_v13, %s5947_s28  ;;  %v961_v24 = vpop.permute.xlu1 %960  ;;  %v1399_v13 = vstv %s7623_s19  ;;  %v1104_v53 = vadd.f32 %v1102_v0, %v803_v32  ;;  %v1533_v32 = vstv %s7637_s26  ;;  %s5042_s19 = sld [smem:[#allocation2 + $0x3c]] }
 0x272   : > { %v966_v45 = vadd.f32 %v961_v24, %v918_v17  ;;  %v800_v36 = vpop.permute.xlu0 %799  ;;  %s5088_s26 = sld [smem:[#allocation2 + $0x1d]] }
 0x273   : > { %v804_v47 = vadd.f32 %v800_v36, %v756_v10  ;;  %v1400_v10 = vmul.f32 %v7483_v20, %v1399_v13  ;;  %v1563_v36 = vmul.f32 %v7487_v6, %v1562_v26 }
 0x274   : > { %v1080_v15 = vadd.f32 %v1078_v49, %v966_v45  ;;  %v1372_v49 = vmul.f32 %v7417_v18, %v1371_v63 }
 0x275   : > { %1054 = vrot.lane.b32.xlu1 %v1050_v42, %s5947_s28  ;;  %893 = vrot.lane.b32.xlu0 %v888_v21, %s5947_s28  ;;  %v963_v46 = vpop.permute.xlu1 %962  ;;  %v1317_v42 = vmul.f32 %v7453_v57, %v1315_v22  ;;  %v1105_v45 = vadd.f32 %v1103_v3, %v804_v47  ;;  %v1373_v22 = vmul.f32 %v7453_v57, %v1371_v63  ;;  %v1696_v47 = vstv %s7649_s29  ;;  %s5118_s29 = sld [smem:[#allocation2 + $0x9d]] }
 0x276   : > { %v967_v34 = vadd.f32 %v963_v46, %v919_v51  ;;  %v1147_v27 = vpop.permute.xlu0 %1146  ;;  %v1748_v3 = vstv %s7653_s30  ;;  %s5140_s30 = sld [smem:[#allocation2 + $0xbd]] }
 0x277   : > { %v1152_v17 = vadd.f32 %v1147_v27, %v1080_v15  ;;  %v1401_v15 = vmul.f32 %v7509_v14, %v1399_v13  ;;  %v1564_v13 = vmul.f32 %v7513_v8, %v1562_v26 }
 0x278   : > { %v1081_v19 = vadd.f32 %v1079_v40, %v967_v34  ;;  %v1534_v40 = vmul.f32 %v7483_v20, %v1533_v32 }
 0x279   : > { %1056 = vrot.lane.b32.xlu1 %v1051_v59, %s5947_s28  ;;  %1320 = vrot.lane.b32.xlu0 %v1316_v16, %s5947_s28  ;;  %v1227_v21 = vpop.permute.xlu1 %1226  ;;  %v1724_v16 = vstv %s7646_s27  ;;  %v1565_v27 = vadd.f32 %v1563_v36, %v1152_v17  ;;  %s5110_s27 = sld [smem:[#allocation2 + $0x3d]] }
 0x27a   : > { %v1232_v60 = vadd.f32 %v1227_v21, %v1104_v53  ;;  %v1149_v24 = vpop.permute.xlu0 %1148  ;;  %v1725_v63 = vmul.f32 %v7523_v23, %v1724_v16  ;;  %v1962_v21 = vstv %s7661_s4  ;;  %s5158_s4 = sld [smem:[#allocation2 + $0x1e]] }
 0x27b   : > { %v1153_v51 = vadd.f32 %v1149_v24, %v1081_v19  ;;  %v1749_v24 = vmul.f32 %v7523_v23, %v1748_v3 }
 0x27c   : > { %v1402_v0 = vadd.f32 %v1400_v10, %v1232_v60  ;;  %v1697_v10 = vmul.f32 %v7487_v6, %v1696_v47 }
 0x27d   : > { %1376 = vrot.lane.b32.xlu1 %v1372_v49, %s5947_s28  ;;  %1322 = vrot.lane.b32.xlu0 %v1317_v42, %s5947_s28  ;;  %v1229_v59 = vpop.permute.xlu1 %1228  ;;  %v1535_v49 = vmul.f32 %v7509_v14, %v1533_v32  ;;  %v1566_v60 = vadd.f32 %v1564_v13, %v1153_v51  ;;  %v1698_v32 = vmul.f32 %v7513_v8, %v1696_v47 }
 0x27e   : > { %v1233_v46 = vadd.f32 %v1229_v59, %v1105_v45  ;;  %v1445_v34 = vpop.permute.xlu0 %1444  ;;  %v2018_v59 = vstv %s7673_s6  ;;  %s7773_s6 = sld [smem:[#allocation2 + $0x9e]] }
 0x27f   : > { %v1450_v53 = vadd.f32 %v1445_v34, %v1402_v0  ;;  %v1726_v0 = vmul.f32 %v7260_v41, %v1724_v16  ;;  %v2019_v47 = vmul.f32 %v7523_v23, %v2018_v59 }
 0x280   : > { %v1403_v19 = vadd.f32 %v1401_v15, %v1233_v46  ;;  %v1963_v15 = vmul.f32 %v7523_v23, %v1962_v21 }
 0x281   : > { %1378 = vrot.lane.b32.xlu1 %v1373_v22, %s5947_s28  ;;  %1538 = vrot.lane.b32.xlu0 %v1534_v40, %s5947_s28  ;;  %v1608_v42 = vpop.permute.xlu1 %1607  ;;  %v2046_v40 = vstv %s7670_s5  ;;  %v1751_v34 = vadd.f32 %v1749_v24, %v1450_v53  ;;  %v2020_v24 = vmul.f32 %v7260_v41, %v2018_v59  ;;  %s7765_s5 = sld [smem:[#allocation2 + $0x3e]] }
 0x282   : > { %v1613_v17 = vadd.f32 %v1608_v42, %v1565_v27  ;;  %v1447_v26 = vpop.permute.xlu0 %1446  ;;  %v1750_v27 = vmul.f32 %v7260_v41, %v1748_v3 }
 0x283   : > { %v1451_v45 = vadd.f32 %v1447_v26, %v1403_v19  ;;  %v2047_v19 = vmul.f32 %v7250_v2, %v2046_v40 }
 0x284   : > { %v1727_v36 = vadd.f32 %v1725_v63, %v1613_v17  ;;  %v1964_v63 = vmul.f32 %v7260_v41, %v1962_v21 }
 0x285   : > { %1701 = vrot.lane.b32.xlu1 %v1697_v10, %s5947_s28  ;;  %1540 = vrot.lane.b32.xlu0 %v1535_v49, %s5947_s28  ;;  %v1610_v22 = vpop.permute.xlu1 %1609  ;;  %v2180_v49 = vstv %s7683_s7  ;;  %v1752_v3 = vadd.f32 %v1750_v27, %v1451_v45  ;;  %v2665_v27 = vstv %s5270_s10  ;;  %s7782_s7 = sld [smem:[#allocation2 + $0xbe]] }
 0x286   : > { %v1614_v46 = vadd.f32 %v1610_v22, %v1566_v60  ;;  %v1794_v51 = vpop.permute.xlu0 %1793  ;;  %v2048_v60 = vmul.f32 %v8430_v33, %v2046_v40  ;;  %v2181_v21 = vmul.f32 %v7250_v2, %v2180_v49  ;;  %s5015_s10 = sld [smem:[#allocation5 + $0x3]] }
 0x287   : > { %v7696_v16 = vadd.f32 %v1794_v51, %v1727_v36  ;;  %v2609_v51 = vstv %s7704_s9  ;;  %s7795_s9 = sld [smem:[#allocation2 + $0x1f]] }
 0x288   : > { %v1728_v13 = vadd.f32 %v1726_v0, %v1614_v46  ;;  %v2343_v0 = vstv %s7693_s8  ;;  %v2182_v46 = vmul.f32 %v8430_v33, %v2180_v49  ;;  %v2666_v33 = vmul.f32 %v8432_v56, %v2665_v27  ;;  %s7788_s8 = sld [smem:[#allocation2 + $0x4c]] }
 0x289   : > { %1703 = vrot.lane.b32.xlu1 %v1698_v32, %s5947_s28  ;;  %1967 = vrot.lane.b32.xlu0 %v1963_v15, %s5947_s28  ;;  %v1874_v10 = vpop.permute.xlu1 %1873  ;;  %v2344_v40 = vmul.f32 %v8429_v30, %v2343_v0  ;;  %v2345_v59 = vmul.f32 %v8431_v55, %v2343_v0  ;;  %v2611_v30 = vmul.f32 %v7340_v39, %v2609_v51  ;;  %v588_v49 = vstv %s5050_s20  ;;  %s7824_s20 = sld [smem:[#allocation2 + $0x9f]] }
 0x28a   : > { %v1879_v42 = vadd.f32 %v1874_v10, %v1751_v34  ;;  %v1796_v53 = vpop.permute.xlu0 %1795  ;;  %v2610_v34 = vmul.f32 %v8432_v56, %v2609_v51  ;;  %v2667_v55 = vmul.f32 %v7340_v39, %v2665_v27  ;;  %v508_v10 = vstv %s5042_s19  ;;  %s7814_s19 = sld [smem:[#allocation2 + $0xcc]] }
 0x28b   : > { %v7706_v17 = vadd.f32 %v1796_v53, %v1728_v13  ;;  %v2827_v13 = vstv %s5288_s11  ;;  %s7807_s11 = sld [smem:[#allocation2 + $0x3f]] }
 0x28c   : > { %v2049_v26 = vadd.f32 %v2047_v19, %v1879_v42  ;;  %v2828_v19 = vmul.f32 %v7366_v38, %v2827_v13  ;;  %v509_v38 = vmul.f32 %v8435_v35, %v508_v10  ;;  %v806_v42 = vstv %s5070_s24  ;;  %s7856_s24 = sld [smem:[#allocation2 + $0xec]] }
 0x28d   : > { %2023 = vrot.lane.b32.xlu1 %v2019_v47, %s5947_s28  ;;  %1969 = vrot.lane.b32.xlu0 %v1964_v63, %s5947_s28  ;;  %v1876_v36 = vpop.permute.xlu1 %1875  ;;  %v322_v47 = vstv %s5022_s17  ;;  %v2829_v63 = vmul.f32 %v7408_v62, %v2827_v13  ;;  %v589_v62 = vmul.f32 %v8435_v35, %v588_v49  ;;  %v807_v53 = vmul.f32 %v7377_v44, %v806_v42  ;;  %s7811_s17 = sld [smem:[#allocation2 + $0x6c]] }
 0x28e   : > { %v1880_v32 = vadd.f32 %v1876_v36, %v1752_v3  ;;  %v2092_v15 = vpop.permute.xlu0 %2091  ;;  %v323_v56 = vmul.f32 %v8433_v58, %v322_v47  ;;  %v324_v39 = vmul.f32 %v8434_v48, %v322_v47  ;;  %v510_v58 = vmul.f32 %v7349_v43, %v508_v10 }
 0x28f   : > { %v7714_v45 = vadd.f32 %v2092_v15, %v2049_v26  ;;  %v590_v48 = vmul.f32 %v7349_v43, %v588_v49  ;;  %v969_v3 = vstv %s5088_s26  ;;  %v808_v26 = vmul.f32 %v7381_v28, %v806_v42  ;;  %v7831_v49 = vld [vmem:[%s6061_s25] sm:$0xff]  ;;  %v7839_v42 = vld [vmem:[%s6061_s25 + $0x48] sm:$0xff]  ;;  %s7860_s26 = sld [smem:[#allocation2 + $0x4d]] }
 0x290   : > { %v2050_v22 = vadd.f32 %v2048_v60, %v1880_v32  ;;  %v970_v35 = vmul.f32 %v7372_v1, %v969_v3  ;;  %v1155_v60 = vstv %s5110_s27  ;;  %v971_v43 = vmul.f32 %v7385_v12, %v969_v3  ;;  %8436 = vst [vmem:[#allocation14_spill] sm:$0xff] %v7831_v49  ;;  %s7888_s27 = sld [smem:[#allocation2 + $0x6d]] }
 0x291   : > { %2025 = vrot.lane.b32.xlu1 %v2020_v24, %s5947_s28  ;;  %2185 = vrot.lane.b32.xlu0 %v2181_v21, %s5947_s28  ;;  %v1156_v44 = vmul.f32 %v7417_v18, %v1155_v60  ;;  %v1235_v24 = vstv %s5118_s29  ;;  %v7759_v21 = vpop.permute.xlu1 %2254  ;;  %v1157_v28 = vmul.f32 %v7453_v57, %v1155_v60  ;;  %v1453_v36 = vstv %s5140_s30  ;;  %s7895_s29 = sld [smem:[#allocation2 + $0xcd]] }
 0x292   : > { %v2094_v41 = vpop.permute.xlu0 %2093  ;;  %v1236_v1 = vmul.f32 %v7417_v18, %v1235_v24  ;;  %v1237_v12 = vmul.f32 %v7453_v57, %v1235_v24  ;;  %v1454_v32 = vmul.f32 %v7483_v20, %v1453_v36  ;;  %v1616_v15 = vstv %s5158_s4  ;;  %s7923_s30 = sld [smem:[#allocation2 + $0x4e]] }
 0x293   : > { %v7721_v2 = vadd.f32 %v2094_v41, %v2050_v22  ;;  %v1617_v22 = vmul.f32 %v7487_v6, %v1616_v15  ;;  %v1618_v41 = vmul.f32 %v7513_v8, %v1616_v15  ;;  %v354_v47 = vstv %s7788_s8  ;;  %s7925_s4 = sld [smem:[#allocation2 + $0xed]] }
 0x294   : > { %v2263_v10 = vstv %s7795_s9  ;;  %s7939_s8 = sld [smem:[#allocation2 + $0xce]] }
 0x295   : > { %2348 = vrot.lane.b32.xlu1 %v2344_v40, %s5947_s28  ;;  %2187 = vrot.lane.b32.xlu0 %v2182_v46, %s5947_s28  ;;  %v7767_v0 = vpop.permute.xlu1 %2256  ;;  %v1455_v40 = vmul.f32 %v7509_v14, %v1453_v36  ;;  %v1802_v46 = vstv %s7765_s5  ;;  %v7865_v36 = vld [vmem:[%s6061_s25 + $0x50] sm:$0xff]  ;;  %s7927_s5 = sld [smem:[#allocation2 + $0xb]] }
 0x296   : > { %v7775_v18 = vpop.permute.xlu0 %2440  ;;  %s7942_s9 = sld [smem:[#allocation2 + $0x2b]] }
 0x299   : > { %2350 = vrot.lane.b32.xlu1 %v2345_v59, %s5947_s28  ;;  %2614 = vrot.lane.b32.xlu0 %v2610_v34, %s5947_s28  ;;  %v7784_v51 = vpop.permute.xlu1 %2520  ;;  %v1803_v59 = vmul.f32 %v7523_v23, %v1802_v46  ;;  %v1882_v34 = vstv %s7773_s6  ;;  %s7934_s6 = sld [smem:[#allocation2 + $0x6e]] }
 0x29a   : > { %v7786_v20 = vpop.permute.xlu0 %2442 }
 0x29d   : > { %2616 = vrot.lane.b32.xlu0 %v2611_v30, %s5947_s28  ;;  %2670 = vrot.lane.b32.xlu1 %v2666_v33, %s5947_s28  ;;  %v7797_v27 = vpop.permute.xlu1 %2522  ;;  %v1883_v30 = vmul.f32 %v7523_v23, %v1882_v34  ;;  %v7803_v33 = vld [vmem:[%s6061_s25 + $0x39] sm:$0xff] }
 0x29e   : > { %v1804_v13 = vmul.f32 %v7803_v33, %v1802_v46  ;;  %v1884_v23 = vmul.f32 %v7803_v33, %v1882_v34  ;;  %v7877_v34 = vld [vmem:[%s6061_s25 + $0x1] sm:$0xff] }
 0x29f   : > { %8439 = vst [vmem:[#allocation18_spill] sm:$0xff] %v7877_v34 }
 0x2a1   : > { %2672 = vrot.lane.b32.xlu1 %v2667_v55, %s5947_s28  ;;  %2832 = vrot.lane.b32.xlu0 %v2828_v19, %s5947_s28  ;;  %v2100_v55 = vstv %s7782_s7  ;;  %s188_s7 = sand.u32 1, %s5935_s13  }
 0x2a5   : > { %2834 = vrot.lane.b32.xlu1 %v2829_v63, %s5947_s28  ;;  %327 = vrot.lane.b32.xlu0 %v323_v56, %s5947_s28  ;;  %v7820_v63 = vld [vmem:[%s6061_s25 + $0x32] sm:$0xff] }
 0x2a6   : > { %v2101_v56 = vmul.f32 %v7820_v63, %v2100_v55 }
 0x2a9   : > { %329 = vrot.lane.b32.xlu1 %v324_v39, %s5947_s28  ;;  %513 = vrot.lane.b32.xlu0 %v509_v38, %s5947_s28 }
 0x2ad   : > { %593 = vrot.lane.b32.xlu1 %v589_v62, %s5947_s28  ;;  %515 = vrot.lane.b32.xlu0 %v510_v58, %s5947_s28  ;;  %v355_v62 = vmul.f32 %v7831_v49, %v354_v47  ;;  %v7834_v58 = vstv %s5015_s10  ;;  %s7945_s10 = sld [smem:[#allocation2 + $0x8b]] }
 0x2ae   : > { %8437 = vst [vmem:[#allocation15_spill] sm:$0xff] %v7834_v58 }
 0x2b1   : > { %595 = vrot.lane.b32.xlu1 %v590_v48, %s5947_s28  ;;  %811 = vrot.lane.b32.xlu0 %v807_v53, %s5947_s28  ;;  %v2264_v48 = vmul.f32 %v7839_v42, %v2263_v10  ;;  %v7843_v53 = vld [vmem:[%s6061_s25 + $0x3a] sm:$0xff] }
 0x2b2   : > { %v2102_v3 = vmul.f32 %v7843_v53, %v2100_v55 }
 0x2b3   : > { %v2395_v29 = vstv %s7945_s10  ;;  %s5102_s10 = sld [smem:[#allocation2 + $0x2d]] }
 0x2b5   : > { %974 = vrot.lane.b32.xlu1 %v970_v35, %s5947_s28  ;;  %813 = vrot.lane.b32.xlu0 %v808_v26, %s5947_s28  ;;  %v2449_v35 = vstv %s7807_s11  ;;  %s4999_s11 = sshll.u32 %s188_s7, 7 }
 0x2b9   : > { %976 = vrot.lane.b32.xlu1 %v971_v43, %s5947_s28  ;;  %1160 = vrot.lane.b32.xlu0 %v1156_v44, %s5947_s28  ;;  %v357_v43 = vadd.f32 %v355_v62, %v7834_v58  ;;  %v7853_v44 = vld [vmem:[%s6061_s25 + $0x8] sm:$0xff] }
 0x2ba   : > { %8438 = vst [vmem:[#allocation17_spill] sm:$0xff] %v7853_v44  ;;  %v356_v24 = vmul.f32 %v7853_v44, %v354_v47  ;;  %v7885_v47 = vld [vmem:[%s6061_s25 + $0x51] sm:$0xff]  ;;  %v7891_v62 = vld [vmem:[%s6061_s25 + $0x9] sm:$0xff] }
 0x2bb   : > { %8440 = vst [vmem:[#allocation13_spill] sm:$0xff] %v7891_v62  ;;  %v7914_v44 = vld [vmem:[%s6061_s25 + $0xa] sm:$0xff] }
 0x2bc   : > { %8443 = vst [vmem:[#allocation20_spill] sm:$0xff] %v7914_v44 }
 0x2bd   : > { %1240 = vrot.lane.b32.xlu1 %v1236_v1, %s5947_s28  ;;  %1162 = vrot.lane.b32.xlu0 %v1157_v28, %s5947_s28  ;;  %v540_v1 = vstv %s7811_s17  ;;  %v620_v28 = vstv %s7814_s19  ;;  %s7957_s17 = sld [smem:[#allocation2 + $0xee]] }
 0x2be   : > { %s7962_s19 = sld [smem:[#allocation2 + $0x4f]] }
 0x2c1   : > { %1242 = vrot.lane.b32.xlu1 %v1237_v12, %s5947_s28  ;;  %1458 = vrot.lane.b32.xlu0 %v1454_v32, %s5947_s28  ;;  %v2265_v12 = vmul.f32 %v7865_v36, %v2263_v10  ;;  %v7869_v32 = vld [vmem:[%s6061_s25 + $0x49] sm:$0xff] }
 0x2c2   : > { %v2450_v15 = vmul.f32 %v7869_v32, %v2449_v35 }
 0x2c5   : > { %1621 = vrot.lane.b32.xlu1 %v1617_v22, %s5947_s28  ;;  %1460 = vrot.lane.b32.xlu0 %v1455_v40, %s5947_s28  ;;  %v2529_v22 = vstv %s7824_s20  ;;  %s7964_s20 = scalar_lea.vmem [#allocation7], %s4999_s11  ;;  %s8142_s11 = sld [smem:[#allocation2 + $0xad]] }
 0x2c6   : > { %v2530_v55 = vmul.f32 %v7869_v32, %v2529_v22 }
 0x2c9   : > { %1623 = vrot.lane.b32.xlu1 %v1618_v41, %s5947_s28  ;;  %1807 = vrot.lane.b32.xlu0 %v1803_v59, %s5947_s28  ;;  %v358_v59 = vadd.f32 %v356_v24, %v7834_v58 }
 0x2cb   : > { %v7809_v19 = vpop.permute.xlu0 %3881 }
 0x2cd   : > { %1887 = vrot.lane.b32.xlu1 %v1883_v30, %s5947_s28  ;;  %1809 = vrot.lane.b32.xlu0 %v1804_v13, %s5947_s28  ;;  %v541_v30 = vmul.f32 %v7877_v34, %v540_v1  ;;  %v621_v13 = vmul.f32 %v7877_v34, %v620_v28 }
 0x2cf   : > { %v7826_v39 = vpop.permute.xlu1 %3883  ;;  %v7828_v38 = vpop.permute.xlu0 %2738 }
 0x2d1   : > { %1889 = vrot.lane.b32.xlu1 %v1884_v23, %s5947_s28  ;;  %2105 = vrot.lane.b32.xlu0 %v2101_v56, %s5947_s28  ;;  %v2451_v23 = vmul.f32 %v7885_v47, %v2449_v35  ;;  %v1001_v35 = vstv %s7860_s26  ;;  %s7994_s26 = sld [smem:[#allocation2 + $0x6f]] }
 0x2d3   : > { %v7847_v26 = vpop.permute.xlu1 %2740  ;;  %v7849_v60 = vpop.permute.xlu0 %4047 }
 0x2d5   : > { %2268 = vrot.lane.b32.xlu1 %v2264_v48, %s5947_s28  ;;  %2107 = vrot.lane.b32.xlu0 %v2102_v3, %s5947_s28  ;;  %v542_v48 = vmul.f32 %v7891_v62, %v540_v1  ;;  %v622_v3 = vmul.f32 %v7891_v62, %v620_v28 }
 0x2d7   : > { %v7873_v40 = vpop.permute.xlu1 %4049  ;;  %v408_v46 = vpop.permute.xlu0 %407  ;;  %v624_v28 = vadd.f32 %v622_v3, %v7834_v58 }
 0x2d8   : > { %v413_v41 = vadd.f32 %v408_v46, %v357_v43  ;;  %v2531_v46 = vmul.f32 %v7885_v47, %v2529_v22 }
 0x2d9   : > { %2270 = vrot.lane.b32.xlu1 %v2265_v12, %s5947_s28  ;;  %2454 = vrot.lane.b32.xlu0 %v2450_v15, %s5947_s28  ;;  %v623_v12 = vadd.f32 %v621_v13, %v7834_v58  ;;  %v838_v15 = vstv %s7856_s24  ;;  %v7918_v58 = vld [vmem:[%s6061_s25 + $0x20] sm:$0xff]  ;;  %s7969_s24 = sld [smem:[#allocation2 + $0xab]] }
 0x2da   : > { %v543_v24 = vadd.f32 %v541_v30, %v413_v41  ;;  %v840_v3 = vmul.f32 %v7914_v44, %v838_v15  ;;  %8444 = vst [vmem:[#allocation21_spill] sm:$0xff] %v7918_v58 }
 0x2db   : > { %v410_v56 = vpop.permute.xlu1 %409  ;;  %v674_v10 = vpop.permute.xlu0 %673 }
 0x2dc   : > { %v414_v43 = vadd.f32 %v410_v56, %v358_v59  ;;  %v7905_v59 = vld [vmem:[%s6061_s25 + $0x2] sm:$0xff]  ;;  %v679_v30 = vadd.f32 %v674_v10, %v543_v24  ;;  %v1187_v10 = vstv %s7888_s27  ;;  %v1267_v24 = vstv %s7895_s29  ;;  %s7996_s27 = sld [smem:[#allocation2 + $0xcf]] }
 0x2dd   : > { %2534 = vrot.lane.b32.xlu1 %v2530_v55, %s5947_s28  ;;  %2456 = vrot.lane.b32.xlu0 %v2451_v23, %s5947_s28  ;;  %8441 = vst [vmem:[#allocation16_spill] sm:$0xff] %v7905_v59  ;;  %v839_v41 = vmul.f32 %v7905_v59, %v838_v15  ;;  %v7909_v55 = vld [vmem:[%s6061_s25 + $0x18] sm:$0xff]  ;;  %v1003_v59 = vmul.f32 %v7918_v58, %v1001_v35  ;;  %s8029_s29 = sld [smem:[#allocation2 + $0xef]] }
 0x2de   : > { %v544_v56 = vadd.f32 %v542_v48, %v414_v43  ;;  %8442 = vst [vmem:[#allocation19_spill] sm:$0xff] %v7909_v55  ;;  %v1002_v23 = vmul.f32 %v7909_v55, %v1001_v35  ;;  %v7930_v15 = vld [vmem:[%s6061_s25 + $0x19] sm:$0xff] }
 0x2df   : > { %v730_v1 = vpop.permute.xlu1 %729  ;;  %v676_v34 = vpop.permute.xlu0 %675  ;;  %8445 = vst [vmem:[#allocation22_spill] sm:$0xff] %v7930_v15  ;;  %v1188_v44 = vmul.f32 %v7930_v15, %v1187_v10  ;;  %v1268_v35 = vmul.f32 %v7930_v15, %v1267_v24 }
 0x2e0   : > { %v735_v13 = vadd.f32 %v730_v1, %v623_v12  ;;  %v680_v48 = vadd.f32 %v676_v34, %v544_v56  ;;  %v1004_v1 = vadd.f32 %v1002_v23, %v679_v30  ;;  %v1189_v23 = vmul.f32 %v7453_v57, %v1187_v10 }
 0x2e1   : > { %2536 = vrot.lane.b32.xlu1 %v2531_v46, %s5947_s28 }
 0x2e2   : > { %v841_v12 = vadd.f32 %v839_v41, %v735_v13  ;;  %v1005_v41 = vadd.f32 %v1003_v59, %v680_v48  ;;  %v1648_v59 = vstv %s7923_s30  ;;  %v1485_v48 = vstv %s7925_s4  ;;  %s8040_s30 = sld [smem:[#allocation2 + $0xbf]] }
 0x2e3   : > { %v732_v22 = vpop.permute.xlu1 %731  ;;  %v892_v62 = vpop.permute.xlu0 %891  ;;  %s5018_s4 = sld [smem:[#allocation2 + $0xc]] }
 0x2e4   : > { %v736_v43 = vadd.f32 %v732_v22, %v624_v28  ;;  %v897_v58 = vadd.f32 %v892_v62, %v841_v12  ;;  %v1269_v22 = vmul.f32 %v7453_v57, %v1267_v24  ;;  %v1649_v24 = vmul.f32 %v7487_v6, %v1648_v59 }
 0x2e6   : > { %v842_v28 = vadd.f32 %v840_v3, %v736_v43  ;;  %v1270_v3 = vadd.f32 %v1268_v35, %v897_v58 }
 0x2e7   : > { %v1055_v46 = vpop.permute.xlu1 %1054  ;;  %v894_v55 = vpop.permute.xlu0 %893 }
 0x2e8   : > { %v1060_v34 = vadd.f32 %v1055_v46, %v1004_v1  ;;  %v898_v12 = vadd.f32 %v894_v55, %v842_v28  ;;  %v7952_v28 = vld [vmem:[%s6061_s25 + $0x1a] sm:$0xff] }
 0x2e9   : > { %8446 = vst [vmem:[#allocation23_spill] sm:$0xff] %v7952_v28 }
 0x2ea   : > { %v1190_v13 = vadd.f32 %v1188_v44, %v1060_v34  ;;  %v2209_v44 = vstv %s7927_s5  ;;  %v1271_v35 = vadd.f32 %v1269_v22, %v898_v12  ;;  %v1834_v22 = vstv %s7934_s6  ;;  %s5038_s5 = sld [smem:[#allocation2 + $0x8c]] }
 0x2eb   : > { %v1057_v30 = vpop.permute.xlu1 %1056  ;;  %v1321_v56 = vpop.permute.xlu0 %1320  ;;  %v2210_v15 = vmul.f32 %v7839_v42, %v2209_v44  ;;  %v1914_v12 = vstv %s7939_s8  ;;  %s5034_s6 = sld [smem:[#allocation2 + $0x2c]] }
 0x2ec   : > { %v5559_v62 = vpop.f32.mrf.mxu1  ;;  %v1061_v1 = vadd.f32 %v1057_v30, %v1005_v41  ;;  %v1326_v10 = vadd.f32 %v1321_v56, %v1190_v13  ;;  %v1486_v41 = vmul.f32 %v7952_v28, %v1485_v48  ;;  %v1487_v56 = vmul.f32 %v7509_v14, %v1485_v48  ;;  %s5084_s8 = sld [smem:[#allocation2 + $0xd]] }
 0x2ed   : > { %v2371_v28 = vstv %s7942_s9  ;;  %s8132_s9 = sld [smem:[#allocation2 + $0x8d]] }
 0x2ee   : > { %v3348_v43 = vpop.f32.mrf.mxu1  ;;  %v1191_v58 = vadd.f32 %v1189_v23, %v1061_v1  ;;  %v1650_v23 = vmul.f32 %v7513_v8, %v1648_v59  ;;  %v2211_v8 = vmul.f32 %v7865_v36, %v2209_v44 }
 0x2ef   : > { %v1377_v46 = vpop.permute.xlu1 %1376  ;;  %v1323_v57 = vpop.permute.xlu0 %1322 }
 0x2f0   : > { %v5562_v34 = vpop.f32.mrf.mxu1  ;;  %v1382_v55 = vadd.f32 %v1377_v46, %v1270_v3  ;;  %v1651_v46 = vadd.f32 %v1649_v24, %v1326_v10  ;;  %v1327_v1 = vadd.f32 %v1323_v57, %v1191_v58 }
 0x2f1   : > { %v5549_v30 = vpop.f32.mrf.mxu0 }
 0x2f2   : > { %v3354_v49 = vadd.f32 %v5559_v62, %v5549_v30  ;;  %v3358_v13 = vpop.f32.mrf.mxu1  ;;  %v1488_v10 = vadd.f32 %v1486_v41, %v1382_v55  ;;  %v2212_v30 = vadd.f32 %v2210_v15, %v7696_v16  ;;  %v7977_v55 = vld [vmem:[%s6061_s25 + $0x31] sm:$0xff] }
 0x2f3   : > { %v3251_v6 = vpop.f32.mrf.mxu0  ;;  %v1379_v3 = vpop.permute.xlu1 %1378  ;;  %8447 = vst [vmem:[#allocation24_spill] sm:$0xff] %v7977_v55  ;;  %v1915_v44 = vmul.f32 %v7977_v55, %v1914_v12 }
 0x2f4   : > { %3369 = vst.msk [vmem:[%s7964_s20 + $0x8] sm:$0xff] %vm3367_vm13, %v3354_v49  ;;  %v3349_v14 = vadd.f32 %v3348_v43, %v3251_v6  ;;  %v5576_v62 = vpop.f32.mrf.mxu1  ;;  %v1383_v48 = vadd.f32 %v1379_v3, %v1271_v35  ;;  %v1539_v24 = vpop.permute.xlu0 %1538  ;;  %v1835_v35 = vmul.f32 %v7977_v55, %v1834_v22  ;;  %v2260_v4 = vadd.f32 %v7759_v21, %v2212_v30 }
 0x2f5   : > { %v5552_v59 = vpop.f32.mrf.mxu0  ;;  %v1544_v16 = vadd.f32 %v1539_v24, %v1488_v10  ;;  %v2213_v55 = vadd.f32 %v2211_v8, %v7706_v17 }
 0x2f6   : > { %3368 = vst.msk [vmem:[%s7964_s20] sm:$0xff] %vm3367_vm13, %v3349_v14  ;;  %v3364_v49 = vadd.f32 %v5562_v34, %v5552_v59  ;;  %v3529_v43 = vpop.f32.mrf.mxu1  ;;  %v1489_v58 = vadd.f32 %v1487_v56, %v1383_v48  ;;  %v1652_v14 = vadd.f32 %v1650_v23, %v1327_v1  ;;  %v2372_v34 = vmul.f32 %v7869_v32, %v2371_v28 }
 0x2f7   : > { %v3261_v6 = vpop.f32.mrf.mxu0  ;;  %v1702_v57 = vpop.permute.xlu1 %1701  ;;  %v2396_v56 = vmul.f32 %v7869_v32, %v2395_v29  ;;  %v2397_v48 = vmul.f32 %v7885_v47, %v2395_v29  ;;  %v1917_v30 = vadd.f32 %v1915_v44, %v1544_v16 }
 0x2f8   : > { %3371 = vst.msk [vmem:[%s7964_s20 + $0x18] sm:$0xff] %vm3367_vm13, %v3364_v49  ;;  %v3359_v41 = vadd.f32 %v3358_v13, %v3261_v6  ;;  %v1707_v15 = vadd.f32 %v1702_v57, %v1651_v46  ;;  %v1541_v3 = vpop.permute.xlu0 %1540  ;;  %v1836_v46 = vmul.f32 %v7803_v33, %v1834_v22  ;;  %v1916_v49 = vmul.f32 %v7803_v33, %v1914_v12 }
 0x2f9   : > { %v5569_v59 = vpop.f32.mrf.mxu0  ;;  %v1545_v23 = vadd.f32 %v1541_v3, %v1489_v58  ;;  %v2132_v6 = vstv %s7957_s17  ;;  %v2295_v57 = vstv %s7962_s19  ;;  %v2398_v22 = vadd.f32 %v2396_v56, %v7714_v45  ;;  %s8145_s17 = sld [smem:[#allocation2 + $0xe]] }
 0x2fa   : > { %3370 = vst.msk [vmem:[%s7964_s20 + $0x10] sm:$0xff] %vm3367_vm13, %v3359_v41  ;;  %v5590_v13 = vpop.f32.mrf.mxu1  ;;  %v3535_v10 = vadd.f32 %v5576_v62, %v5569_v59  ;;  %v1837_v17 = vadd.f32 %v1835_v35, %v1707_v15  ;;  %v2373_v62 = vmul.f32 %v7885_v47, %v2371_v28  ;;  %v2693_v58 = vstv %s7969_s24  ;;  %s8152_s19 = sld [smem:[#allocation2 + $0x8e]] }
 0x2fb   : > { %v3448_v24 = vpop.f32.mrf.mxu0  ;;  %v1704_v1 = vpop.permute.xlu1 %1703  ;;  %v2261_v12 = vadd.f32 %v7767_v0, %v2213_v55  ;;  %v2374_v3 = vadd.f32 %v2372_v34, %v2260_v4  ;;  %v2399_v59 = vadd.f32 %v2397_v48, %v7721_v2  ;;  %v1918_v45 = vadd.f32 %v1916_v49, %v1545_v23  ;;  %v8009_v34 = vld [vmem:[%s6061_s25 + $0x4a] sm:$0xff]  ;;  %v8013_v48 = vld [vmem:[%s6061_s25 + $0x52] sm:$0xff]  ;;  %s8156_s24 = sld [smem:[#allocation2 + $0x2e]] }
 0x2fc   : > { %v3530_v29 = vadd.f32 %v3529_v43, %v3448_v24  ;;  %5601 = vmatprep.subr.mxu1 %v3535_v10  ;;  %v1708_v21 = vadd.f32 %v1704_v1, %v1652_v14  ;;  %v1968_v8 = vpop.permute.xlu0 %1967  ;;  %v3695_v43 = vpop.f32.mrf.mxu1  ;;  %v2133_v28 = vmul.f32 %v7820_v63, %v2132_v6  ;;  %v2296_v15 = vmul.f32 %v7839_v42, %v2295_v57 }
 0x2fd   : > { %v5583_v41 = vpop.f32.mrf.mxu0  ;;  %5602 = vmatpush3.msra.mxu1 %v3535_v10  ;;  %v1973_v4 = vadd.f32 %v1968_v8, %v1837_v17  ;;  %v2526_v55 = vadd.f32 %v7784_v51, %v2398_v22  ;;  %v2694_v56 = vmul.f32 %v8009_v34, %v2693_v58  ;;  %v2446_v10 = vadd.f32 %v7775_v18, %v2374_v3 }
 0x2fe   : > { %v3701_v24 = vadd.f32 %v5590_v13, %v5583_v41  ;;  %5603 = vmatprep.subr.mxu1 %v3530_v29  ;;  %v1838_v16 = vadd.f32 %v1836_v46, %v1708_v21  ;;  %v2695_v13 = vmul.f32 %v8013_v48, %v2693_v58  ;;  %v2375_v46 = vadd.f32 %v2373_v62, %v2261_v12 }
 0x2ff   : > { %v3614_v35 = vpop.f32.mrf.mxu0  ;;  %5604 = vmatpush3.msra.mxu1 %v3530_v29  ;;  %v2024_v44 = vpop.permute.xlu1 %2023  ;;  %v2527_v23 = vadd.f32 %v7797_v27, %v2399_v59  ;;  %v2134_v49 = vmul.f32 %v7843_v53, %v2132_v6  ;;  %v2297_v18 = vmul.f32 %v7865_v36, %v2295_v57  ;;  %v2481_v29 = vstv %s7994_s26  ;;  %s8164_s26 = sld [smem:[#allocation2 + $0xae]] }
 0x300   : > { %v3696_v14 = vadd.f32 %v3695_v43, %v3614_v35  ;;  %5591 = vmatprep.subr.mxu0 %v3701_v24  ;;  %5606 = vmatmul.mubr.msk.f32.vlgmr.msra.gmra.mxu1 %vm2846_vm4, %v6922_v7  ;;  %v2029_v2 = vadd.f32 %v2024_v44, %v1917_v30  ;;  %v1970_v0 = vpop.permute.xlu0 %1969  ;;  %v2298_v8 = vadd.f32 %v2296_v15, %v1973_v4  ;;  %v2561_v30 = vstv %s7996_s27  ;;  %s8169_s27 = sld [smem:[#allocation2 + $0xf]] }
 0x301   : > { %5592 = vmatpush3.msra.mxu0 %v3701_v24  ;;  %5608 = vmatprep.mubr.msk.f32.mxu1 %vm2846_vm4, %v6931_v5  ;;  %v1974_v51 = vadd.f32 %v1970_v0, %v1838_v16  ;;  %v2696_v22 = vadd.f32 %v2694_v56, %v2526_v55  ;;  %v2447_v6 = vadd.f32 %v7786_v20, %v2375_v46 }
 0x302   : > { %5593 = vmatprep.subr.mxu0 %v3696_v14  ;;  %5618 = vmatprep.subr.msk.mxu1 %vm6302_vm0, %v8428_v54  ;;  %v2135_v21 = vadd.f32 %v2133_v28, %v2029_v2  ;;  %v2482_v57 = vmul.f32 %v7869_v32, %v2481_v29  ;;  %v2697_v62 = vadd.f32 %v2695_v13, %v2527_v23  ;;  %v2779_v28 = vstv %s8029_s29  ;;  %v8448_v23 = vld [vmem:[#allocation11_spill] sm:$0xff]  ;;  %s8177_s29 = sld [smem:[#allocation2 + $0x2f]] }
 0x303   : > { %5594 = vmatpush3.msra.mxu0 %v3696_v14  ;;  %5619 = vmatpush3.msk.msra.mxu1 %vm6302_vm0, %v8428_v54  ;;  %v2026_v1 = vpop.permute.xlu1 %2025  ;;  %v2299_v20 = vadd.f32 %v2297_v18, %v1974_v51  ;;  %v2562_v41 = vmul.f32 %v7869_v32, %v2561_v30  ;;  %v2744_v24 = vadd.f32 %v7828_v38, %v2696_v22  ;;  %v2747_v2 = vstv %s8040_s30  ;;  %s8190_s30 = sld [smem:[#allocation2 + $0xaf]] }
 0x304   : > { %5596 = vmatmul.mubr.msk.f32.vlgmr.msra.gmra.mxu0 %vm2846_vm4, %v6946_v25  ;;  %5609 = vmatmul.mubr.msk.f32.gmra.mxu1 %vm2846_vm4, %v6940_v9  ;;  %v2030_v27 = vadd.f32 %v2026_v1, %v1918_v45  ;;  %v2186_v17 = vpop.permute.xlu0 %2185  ;;  %v2483_v44 = vmul.f32 %v7885_v47, %v2481_v29  ;;  %v2745_v16 = vadd.f32 %v7847_v26, %v2697_v62 }
 0x305   : > { %5611 = vmatprep.subr.msk.mxu0 %vm6391_vm2, %v8428_v54  ;;  %5622 = vmatprep.mubr.msk.f32.mxu1 %vm2846_vm4, %v2446_v10  ;;  %v2191_v12 = vadd.f32 %v2186_v17, %v2135_v21  ;;  %v2563_v45 = vmul.f32 %v7885_v47, %v2561_v30  ;;  %v2780_v0 = vmul.f32 %v8009_v34, %v2779_v28 }
 0x306   : > { %5612 = vmatpush3.msk.msra.mxu0 %vm6391_vm2, %v8428_v54  ;;  %5620 = vmatprep.subr.msk.mxu1 %vm6309_vm1, %v8428_v54  ;;  %v2136_v59 = vadd.f32 %v2134_v49, %v2030_v27  ;;  %v2748_v13 = vmul.f32 %v8009_v34, %v2747_v2  ;;  %v2781_v1 = vmul.f32 %v8013_v48, %v2779_v28  ;;  %v8449_v49 = vld [vmem:[#allocation12_spill] sm:$0xff] }
 0x307   : > { %5598 = vmatprep.mubr.msk.f32.mxu0 %vm2846_vm4, %v6953_v11  ;;  %5621 = vmatpush3.msk.msra.mxu1 %vm6309_vm1, %v8428_v54  ;;  %v2349_v58 = vpop.permute.xlu1 %2348  ;;  %v2564_v14 = vadd.f32 %v2562_v41, %v2191_v12  ;;  %v2749_v18 = vmul.f32 %v8013_v48, %v2747_v2 }
 0x308   : > { %5599 = vmatmul.mubr.msk.f32.gmra.mxu0 %vm2846_vm4, %v6955_v31  ;;  %5613 = vmatprep.subr.msk.mxu0 %vm6406_vm3, %v8428_v54  ;;  %v2354_v3 = vadd.f32 %v2349_v58, %v2298_v8  ;;  %v2188_v43 = vpop.permute.xlu0 %2187 }
 0x309   : > { %5623 = vmatmul.mubr.msk.f32.vlgmr.msra.gmra.mxu1 %vm2846_vm4, %v2447_v6  ;;  %5632 = vmatprep.subr.msk.mxu1 %vm6302_vm0, %v8428_v54 }
 0x30a   : > { %5614 = vmatpush3.msk.msra.mxu0 %vm6406_vm3, %v8428_v54  ;;  %5615 = vmatprep.mubr.msk.f32.mxu0 %vm2846_vm4, %v7809_v19  ;;  %v2484_v35 = vadd.f32 %v2482_v57, %v2354_v3  ;;  %v2192_v19 = vadd.f32 %v2188_v43, %v2136_v59  ;;  %v274_v43 = vstv %s5018_s4  ;;  %s5402_s4 = sshll.u32 %s5994_s16, 11  ;;  %s8318_s16 = scalar_lea.sflag [#allocation3], %s188_s7 }
 0x30b   : > { %5633 = vmatpush3.msk.msra.mxu1 %vm6302_vm0, %v8428_v54  ;;  %5636 = vmatprep.mubr.msk.f32.mxu1 %vm2846_vm4, %v2744_v24  ;;  %v2351_v38 = vpop.permute.xlu1 %2350 }
 0x30c   : > { %5634 = vmatprep.subr.msk.mxu1 %vm6309_vm1, %v8428_v54  ;;  %5616 = vmatmul.mubr.msk.f32.vlgmr.msra.gmra.mxu0 %vm2846_vm4, %v7826_v39  ;;  %v2355_v15 = vadd.f32 %v2351_v38, %v2299_v20  ;;  %v2615_v26 = vpop.permute.xlu0 %2614  ;;  %v2565_v46 = vadd.f32 %v2563_v45, %v2192_v19  ;;  %v460_v45 = vstv %s5038_s5  ;;  %v8452_v19 = vld [vmem:[#allocation15_spill] sm:$0xff]  ;;  %s4907_s5 = sshll.u32 %s7964_s20, 4  ;;  %s8310_s5 = int_to_ptr.vmem [resolvable:$true] %s4907_s5 }
 0x30d   : > { %5635 = vmatpush3.msk.msra.mxu1 %vm6309_vm1, %v8428_v54  ;;  %5625 = vmatprep.subr.msk.mxu0 %vm6391_vm2, %v8428_v54  ;;  %v2620_v4 = vadd.f32 %v2615_v26, %v2484_v35  ;;  %v8450_v35 = vld [vmem:[#allocation14_spill] sm:$0xff] }
 0x30e   : > { %5637 = vmatmul.mubr.msk.f32.vlgmr.msra.gmra.mxu1 %vm2846_vm4, %v2745_v16  ;;  %5626 = vmatpush3.msk.msra.mxu0 %vm6391_vm2, %v8428_v54  ;;  %v2485_v39 = vadd.f32 %v2483_v44, %v2355_v15  ;;  %v275_v44 = vmul.f32 %v8450_v35, %v274_v43  ;;  %v8451_v16 = vld [vmem:[#allocation17_spill] sm:$0xff]  ;;  %v8456_v35 = vld [vmem:[#allocation19_spill] sm:$0xff] }
 0x30f   : > { %5629 = vmatprep.mubr.msk.f32.mxu0 %vm2846_vm4, %v7849_v60  ;;  %5627 = vmatprep.subr.msk.mxu0 %vm6406_vm3, %v8428_v54  ;;  %v2671_v55 = vpop.permute.xlu1 %2670  ;;  %v276_v38 = vmul.f32 %v8451_v16, %v274_v43  ;;  %v8457_v16 = vld [vmem:[#allocation20_spill] sm:$0xff] }
 0x310   : > { %5628 = vmatpush3.msk.msra.mxu0 %vm6406_vm3, %v8428_v54  ;;  %4388 = vrot.lane.b32.xlu0 %v2620_v4, %s5947_s28  ;;  %v2617_v56 = vpop.permute.xlu0 %2616  ;;  %v2676_v10 = vadd.f32 %v2671_v55, %v2564_v14  ;;  %v277_v15 = vadd.f32 %v275_v44, %v8452_v19  ;;  %v436_v14 = vstv %s5034_s6  ;;  %v8453_v4 = vld [vmem:[#allocation18_spill] sm:$0xff] }
 0x311   : > { %5630 = vmatmul.mubr.msk.f32.vlgmr.msra.gmra.mxu0 %vm2846_vm4, %v7873_v40  ;;  %v2621_v60 = vadd.f32 %v2617_v56, %v2485_v39  ;;  %5653 = vmatprep.mubr.msk.f32.mxu1 %vm2846_vm4, %v8448_v23  ;;  %v461_v2 = vmul.f32 %v8453_v4, %v460_v45  ;;  %v278_v39 = vadd.f32 %v276_v38, %v8452_v19  ;;  %v8454_v56 = vld [vmem:[#allocation13_spill] sm:$0xff] }
 0x312   : > { %v2782_v51 = vadd.f32 %v2780_v0, %v2676_v10  ;;  %5643 = vmatprep.mubr.msk.f32.mxu0 %vm2846_vm4, %v8449_v49  ;;  %v437_v55 = vmul.f32 %v8453_v4, %v436_v14  ;;  %v8458_v4 = vld [vmem:[#allocation21_spill] sm:$0xff] }
 0x313   : > { %4390 = vrot.lane.b32.xlu1 %v2621_v60, %s5947_s28  ;;  %v2673_v29 = vpop.permute.xlu1 %2672 }
 0x314   : > { %2752 = vrot.lane.b32.xlu0 %v2748_v13, %s5947_s28  ;;  %v2677_v27 = vadd.f32 %v2673_v29, %v2565_v46  ;;  %v2833_v21 = vpop.permute.xlu0 %2832  ;;  %v462_v13 = vmul.f32 %v8454_v56, %v460_v45  ;;  %v463_v46 = vadd.f32 %v461_v2, %v8452_v19 }
 0x315   : > { %v2838_v40 = vadd.f32 %v2833_v21, %v2782_v51  ;;  %v438_v51 = vmul.f32 %v8454_v56, %v436_v14 }
 0x316   : > { %v2783_v17 = vadd.f32 %v2781_v1, %v2677_v27  ;;  %v464_v27 = vadd.f32 %v462_v13, %v8452_v19  ;;  %v1107_v19 = vstv %s8132_s9  ;;  %s5875_s9 = scalar_lea.vmem %s8310_s5, 2048 }
 0x317   : > { %2754 = vrot.lane.b32.xlu1 %v2749_v18, %s5947_s28  ;;  %v2835_v8 = vpop.permute.xlu1 %2834  ;;  %p5876_p10 = scmp.ne.s32.totalorder %s8310_s5, %s5875_s9 }
 0x318   : > { %4554 = vrot.lane.b32.xlu0 %v2838_v40, %s5947_s28  ;;  %v2839_v30 = vadd.f32 %v2835_v8, %v2783_v17  ;;  %v328_v22 = vpop.permute.xlu0 %327  ;;  %v8455_v40 = vld [vmem:[#allocation16_spill] sm:$0xff]  ;;  %v921_v8 = vstv %s5084_s8  ;;  %s8308_s8 = scalar_lea.hbm %s8361_s3, %s5402_s4 }
 0x319   : > { %v333_v0 = vadd.f32 %v328_v22, %v277_v15  ;;  %v922_v44 = vmul.f32 %v8456_v35, %v921_v8  ;;  %v923_v2 = vmul.f32 %v8458_v4, %v921_v8  ;;  %v1568_v35 = vstv %s8145_s17  ;;  %p5877_p0 = pnand %p5876_p10, %p8462_p12 }
 0x31b   : > { %4556 = vrot.lane.b32.xlu1 %v2839_v30, %s5947_s28  ;;  %v330_v6 = vpop.permute.xlu1 %329  ;;  %s5066_s28 = sld [smem:[#allocation2 + $0xac]]  ;;  %v439_v29 = vadd.f32 %v437_v55, %v333_v0  ;;  %p5878_p7 = pneg %p5877_p0 }
 0x31c   : > { %v514_v57 = vpop.permute.xlu0 %513  ;;  %v334_v60 = vadd.f32 %v330_v6, %v278_v39 }
 0x31d   : > { %v519_v43 = vadd.f32 %v514_v57, %v439_v29  ;;  %v1083_v57 = vstv %s5102_s10  ;;  %s5950_s10 = smov [#allocation7]  }
 0x31e   : > { %v440_v30 = vadd.f32 %v438_v51, %v334_v60 }
 0x31f   : > { %v594_v62 = vpop.permute.xlu1 %593 }
 0x320   : > { %v516_v58 = vpop.permute.xlu0 %515  ;;  %v599_v21 = vadd.f32 %v594_v62, %v463_v46  ;;  %v924_v62 = vadd.f32 %v922_v44, %v519_v43 }
 0x321   : > { %v758_v1 = vstv %s5066_s28  ;;  %v520_v14 = vadd.f32 %v516_v58, %v440_v30 }
 0x322   : > { %v759_v17 = vmul.f32 %v8455_v40, %v758_v1  ;;  %v760_v38 = vmul.f32 %v8457_v16, %v758_v1  ;;  %v5841_v1 = vld [vmem:[%s6061_s25 + $0x21] sm:$0xff] }
 0x323   : > { %v596_v20 = vpop.permute.xlu1 %595  ;;  %v925_v13 = vadd.f32 %v923_v2, %v520_v14  ;;  %v1109_v29 = vmul.f32 %v5841_v1, %v1107_v19  ;;  %v1085_v40 = vmul.f32 %v5841_v1, %v1083_v57  ;;  %v5843_v14 = vld [vmem:[%s6061_s25 + $0x22] sm:$0xff] }
 0x324   : > { %v812_v41 = vpop.permute.xlu0 %811  ;;  %v600_v6 = vadd.f32 %v596_v20, %v464_v27  ;;  %v761_v15 = vadd.f32 %v759_v17, %v599_v21  ;;  %v8459_v20 = vld [vmem:[#allocation22_spill] sm:$0xff] }
 0x325   : > { %v1108_v56 = vmul.f32 %v8459_v20, %v1107_v19  ;;  %v1084_v51 = vmul.f32 %v8459_v20, %v1083_v57 }
 0x326   : > { %v762_v39 = vadd.f32 %v760_v38, %v600_v6  ;;  %v817_v55 = vadd.f32 %v812_v41, %v761_v15  ;;  %v1405_v41 = vstv %s8142_s11  ;;  %v8460_v6 = vld [vmem:[#allocation23_spill] sm:$0xff]  ;;  %v5842_v38 = vld [vmem:[%s6061_s25 + $0x30] sm:$0xff]  ;;  %s5879_s11 = sshll.u32 %s5950_s10, 4  ;;  %s5880_s11 = int_to_ptr.vmem [resolvable:$false] %s5879_s11 }
 0x327   : > { %v975_v12 = vpop.permute.xlu1 %974  ;;  %v1569_v15 = vmul.f32 %v5842_v38, %v1568_v35  ;;  %v1407_v4 = vmul.f32 %v5843_v14, %v1405_v41  ;;  %s5881_s17 = scalar_lea.vmem %s5880_s11, 4096  ;;  %p5882_p8 = scmp.lt.s32.totalorder %s8310_s5, %s5880_s11 }
 0x328   : > { %v814_v3 = vpop.permute.xlu0 %813  ;;  %v980_v58 = vadd.f32 %v975_v12, %v924_v62  ;;  %v1110_v27 = vadd.f32 %v1108_v56, %v817_v55  ;;  %v1754_v55 = vstv %s8152_s19  ;;  %p5883_p11 = scmp.lt.s32.totalorder %s5881_s17, %s5875_s9 }
 0x329   : > { %v818_v60 = vadd.f32 %v814_v3, %v762_v39  ;;  %v1406_v3 = vmul.f32 %v8460_v6, %v1405_v41 }
 0x32a   : > { %v1086_v8 = vadd.f32 %v1084_v51, %v980_v58  ;;  %p5884_p13 = por %p5883_p11, %p5882_p8 }
 0x32b   : > { %v977_v59 = vpop.permute.xlu1 %976  ;;  %v1111_v30 = vadd.f32 %v1109_v29, %v818_v60 }
 0x32c   : > { %v8119_v24 = vpop.permute.xlu0 %1160  ;;  %v981_v21 = vadd.f32 %v977_v59, %v925_v13  ;;  %v8461_v13 = vld [vmem:[#allocation24_spill] sm:$0xff]  ;;  %p5885_p1 = pnand %p5884_p13, %p5878_p7 }
 0x32d   : > { %v1166_v59 = vadd.f32 %v8119_v24, %v1086_v8  ;;  %v1755_v58 = vmul.f32 %v8461_v13, %v1754_v55 }
 0x32e   : > { %v1087_v44 = vadd.f32 %v1085_v40, %v981_v21 }
 0x32f   : > { %v1241_v28 = vpop.permute.xlu1 %1240  ;;  %v1571_v20 = vadd.f32 %v1569_v15, %v1166_v59 }
 0x330   : > { %v8124_v26 = vpop.permute.xlu0 %1162  ;;  %v1246_v12 = vadd.f32 %v1241_v28, %v1110_v27  ;;  %v5844_v28 = vld [vmem:[%s6061_s25 + $0x38] sm:$0xff]  ;;  %v1756_v27 = vmul.f32 %v7803_v33, %v1754_v55  ;;  %s8175_s25 = sld [smem:[#allocation2 + $0x8f]] }
 0x331   : > { %v1167_v62 = vadd.f32 %v8124_v26, %v1087_v44  ;;  %v1570_v39 = vmul.f32 %v5844_v28, %v1568_v35  ;;  %v2215_v44 = vstv %s8169_s27 }
 0x332   : > { %v1408_v19 = vadd.f32 %v1406_v3, %v1246_v12 }
 0x333   : > { %v1243_v10 = vpop.permute.xlu1 %1242  ;;  %v1572_v60 = vadd.f32 %v1570_v39, %v1167_v62 }
 0x334   : > { %v8134_v18 = vpop.permute.xlu0 %1458  ;;  %v1247_v16 = vadd.f32 %v1243_v10, %v1111_v30  ;;  %v1730_v10 = vstv %s8156_s24  ;;  %v2052_v30 = vstv %s8164_s26 }
 0x335   : > { %v1464_v24 = vadd.f32 %v8134_v18, %v1408_v19  ;;  %v1731_v29 = vmul.f32 %v8461_v13, %v1730_v10  ;;  %v1732_v18 = vmul.f32 %v7803_v33, %v1730_v10  ;;  %v2054_v15 = vmul.f32 %v7843_v53, %v2052_v30 }
 0x336   : > { %v1409_v56 = vadd.f32 %v1407_v4, %v1247_v16  ;;  %v2377_v13 = vstv %s8177_s29 }
 0x337   : > { %v1622_v22 = vpop.permute.xlu1 %1621  ;;  %v1757_v40 = vadd.f32 %v1755_v58, %v1464_v24 }
 0x338   : > { %v1461_v45 = vpop.permute.xlu0 %1460  ;;  %v1627_v1 = vadd.f32 %v1622_v22, %v1571_v20  ;;  %v2217_v20 = vmul.f32 %v7865_v36, %v2215_v44 }
 0x339   : > { %v1465_v26 = vadd.f32 %v1461_v45, %v1409_v56  ;;  %v2053_v45 = vmul.f32 %v7820_v63, %v2052_v30  ;;  %v2401_v56 = vstv %s8175_s25 }
 0x33a   : > { %v1733_v6 = vadd.f32 %v1731_v29, %v1627_v1  ;;  %v2402_v36 = vmul.f32 %v7869_v32, %v2401_v56  ;;  %v2403_v30 = vmul.f32 %v7885_v47, %v2401_v56 }
 0x33b   : > { %v1624_v0 = vpop.permute.xlu1 %1623  ;;  %v1758_v3 = vadd.f32 %v1756_v27, %v1465_v26 }
 0x33c   : > { %v8147_v46 = vpop.permute.xlu0 %1807  ;;  %v1628_v8 = vadd.f32 %v1624_v0, %v1572_v60 }
 0x33d   : > { %v1813_v19 = vadd.f32 %v8147_v46, %v1733_v6 }
 0x33e   : > { %v1734_v0 = vadd.f32 %v1732_v18, %v1628_v8 }
 0x33f   : > { %v1888_v17 = vpop.permute.xlu1 %1887 }
 0x340   : > { %v1810_v43 = vpop.permute.xlu0 %1809  ;;  %v1893_v22 = vadd.f32 %v1888_v17, %v1757_v40  ;;  %v2216_v17 = vmul.f32 %v7839_v42, %v2215_v44  ;;  %v2378_v40 = vmul.f32 %v7869_v32, %v2377_v13  ;;  %v2699_v44 = vstv %s8190_s30 }
 0x341   : > { %v1814_v55 = vadd.f32 %v1810_v43, %v1734_v0 }
 0x342   : > { %v2055_v28 = vadd.f32 %v2053_v45, %v1893_v22  ;;  %v2218_v24 = vadd.f32 %v2216_v17, %v1813_v19  ;;  %v2379_v45 = vmul.f32 %v7885_v47, %v2377_v13  ;;  %v2700_v47 = vmul.f32 %v8009_v34, %v2699_v44 }
 0x343   : > { %v1890_v2 = vpop.permute.xlu1 %1889  ;;  %v2219_v29 = vadd.f32 %v2217_v20, %v1814_v55 }
 0x344   : > { %v2106_v57 = vpop.permute.xlu0 %2105  ;;  %v1894_v62 = vadd.f32 %v1890_v2, %v1758_v3 }
 0x345   : > { %v2111_v43 = vadd.f32 %v2106_v57, %v2055_v28 }
 0x346   : > { %v2056_v10 = vadd.f32 %v2054_v15, %v1894_v62  ;;  %v2701_v62 = vmul.f32 %v8013_v48, %v2699_v44 }
 0x347   : > { %v2269_v51 = vpop.permute.xlu1 %2268  ;;  %v2404_v57 = vadd.f32 %v2402_v36, %v2111_v43 }
 0x348   : > { %v2108_v21 = vpop.permute.xlu0 %2107  ;;  %v2274_v8 = vadd.f32 %v2269_v51, %v2218_v24 }
 0x349   : > { %v2112_v18 = vadd.f32 %v2108_v21, %v2056_v10 }
 0x34a   : > { %v2380_v32 = vadd.f32 %v2378_v40, %v2274_v8 }
 0x34b   : > { %v2271_v35 = vpop.permute.xlu1 %2270  ;;  %v2405_v51 = vadd.f32 %v2403_v30, %v2112_v18 }
 0x34c   : > { %v8181_v38 = vpop.permute.xlu0 %2454  ;;  %v2275_v22 = vadd.f32 %v2271_v35, %v2219_v29 }
 0x34d   : > { %v2460_v19 = vadd.f32 %v8181_v38, %v2380_v32 }
 0x34f   : > { %v2535_v2 = vpop.permute.xlu1 %2534 }
 0x350   : > { %v2457_v1 = vpop.permute.xlu0 %2456  ;;  %v2540_v35 = vadd.f32 %v2535_v2, %v2404_v57 }
 0x352   : > { %v2702_v17 = vadd.f32 %v2700_v47, %v2540_v35 }
 0x353   : > { %v2537_v3 = vpop.permute.xlu1 %2536 }
 0x354   : > { %v2541_v34 = vadd.f32 %v2537_v3, %v2405_v51 }
 0x356   : > { %v2703_v48 = vadd.f32 %v2701_v62, %v2541_v34 }
 0x3c0   : > { %v5607_v41 = vpop.f32.mrf.mxu1 }
 0x3c2   : > { %v3855_v12 = vpop.f32.mrf.mxu1 }
 0x3c4   : > { %v5597_v59 = vpop.f32.mrf.mxu0  ;;  %v5610_v16 = vpop.f32.mrf.mxu1 }
 0x3c5   : > { %v3861_v33 = vadd.f32 %v5607_v41, %v5597_v59 }
 0x3c6   : > { %v3770_v14 = vpop.f32.mrf.mxu0  ;;  %v3865_v4 = vpop.f32.mrf.mxu1 }
 0x3c7   : > { %5338 = vst.msk [vmem:[%s7964_s20 + $0x28] sm:$0xff] %vm3367_vm13, %v3861_v33  ;;  %v3856_v63 = vadd.f32 %v3855_v12, %v3770_v14  ;;  %v2381_v14 = vadd.f32 %v2379_v45, %v2275_v22 }
 0x3c8   : > { %v5600_v39 = vpop.f32.mrf.mxu0 }
 0x3c9   : > { %5337 = vst.msk [vmem:[%s7964_s20 + $0x20] sm:$0xff] %vm3367_vm13, %v3856_v63  ;;  %v3871_v53 = vadd.f32 %v5610_v16, %v5600_v39  ;;  %v5624_v46 = vpop.f32.mrf.mxu1  ;;  %v4389_v16 = vpop.permute.xlu0 %4388  ;;  %v2461_v63 = vadd.f32 %v2457_v1, %v2381_v14 }
 0x3ca   : > { %v3780_v42 = vpop.f32.mrf.mxu0 }
 0x3cb   : > { %5340 = vst.msk [vmem:[%s7964_s20 + $0x38] sm:$0xff] %vm3367_vm13, %v3871_v53  ;;  %v3866_v58 = vadd.f32 %v3865_v4, %v3780_v42  ;;  %v4036_v60 = vpop.f32.mrf.mxu1  ;;  %v4391_v4 = vpop.permute.xlu1 %4390 }
 0x3cc   : > { %v5617_v26 = vpop.f32.mrf.mxu0 }
 0x3cd   : > { %5339 = vst.msk [vmem:[%s7964_s20 + $0x30] sm:$0xff] %vm3367_vm13, %v3866_v58  ;;  %v4042_v27 = vadd.f32 %v5624_v46, %v5617_v26  ;;  %v2753_v28 = vpop.permute.xlu0 %2752 }
 0x3ce   : > { %v3955_v41 = vpop.f32.mrf.mxu0  ;;  %v5638_v12 = vpop.f32.mrf.mxu1  ;;  %v2758_v38 = vadd.f32 %v2753_v28, %v2702_v17 }
 0x3cf   : > { %v4037_v6 = vadd.f32 %v4036_v60, %v3955_v41  ;;  %5649 = vmatprep.subr.mxu1 %v4042_v27  ;;  %v2755_v39 = vpop.permute.xlu1 %2754 }
 0x3d0   : > { %5650 = vmatpush3.msra.mxu1 %v4042_v27  ;;  %v4202_v21 = vpop.f32.mrf.mxu1  ;;  %v2759_v55 = vadd.f32 %v2755_v39, %v2703_v48 }
 0x3d1   : > { %v5631_v59 = vpop.f32.mrf.mxu0  ;;  %5651 = vmatprep.subr.mxu1 %v4037_v6  ;;  %v4555_v20 = vpop.permute.xlu0 %4554 }
 0x3d2   : > { %v4208_v0 = vadd.f32 %v5638_v12, %v5631_v59  ;;  %5652 = vmatpush3.msra.mxu1 %v4037_v6 }
 0x3d3   : > { %v4121_v33 = vpop.f32.mrf.mxu0  ;;  %5654 = vmatmul.mubr.msk.f32.vlgmr.msra.gmra.mxu1 %vm2846_vm4, %v6922_v7  ;;  %5666 = vmatprep.subr.msk.mxu1 %vm6302_vm0, %v8428_v54  ;;  %v4557_v50 = vpop.permute.xlu1 %4556 }
 0x3d4   : > { %v4203_v15 = vadd.f32 %v4202_v21, %v4121_v33  ;;  %5639 = vmatprep.subr.mxu0 %v4208_v0  ;;  %5656 = vmatprep.mubr.msk.f32.mxu1 %vm2846_vm4, %v6931_v5 }
 0x3d5   : > { %5640 = vmatpush3.msra.mxu0 %v4208_v0  ;;  %5667 = vmatpush3.msk.msra.mxu1 %vm6302_vm0, %v8428_v54 }
 0x3d6   : > { %5641 = vmatprep.subr.mxu0 %v4203_v15  ;;  %5668 = vmatprep.subr.msk.mxu1 %vm6309_vm1, %v8428_v54 }
 0x3d7   : > { %5642 = vmatpush3.msra.mxu0 %v4203_v15  ;;  %5657 = vmatmul.mubr.msk.f32.gmra.mxu1 %vm2846_vm4, %v6940_v9 }
 0x3d8   : > { %5644 = vmatmul.mubr.msk.f32.vlgmr.msra.gmra.mxu0 %vm2846_vm4, %v6946_v25  ;;  %5659 = vmatprep.subr.msk.mxu0 %vm6391_vm2, %v8428_v54 }
 0x3d9   : > { %5660 = vmatpush3.msk.msra.mxu0 %vm6391_vm2, %v8428_v54  ;;  %5670 = vmatprep.mubr.msk.f32.mxu1 %vm2846_vm4, %v2460_v19 }
 0x3da   : > { %5646 = vmatprep.mubr.msk.f32.mxu0 %vm2846_vm4, %v6953_v11  ;;  %5669 = vmatpush3.msk.msra.mxu1 %vm6309_vm1, %v8428_v54 }
 0x3db   : > { %5661 = vmatprep.subr.msk.mxu0 %vm6406_vm3, %v8428_v54  ;;  %5671 = vmatmul.mubr.msk.f32.vlgmr.msra.gmra.mxu1 %vm2846_vm4, %v2461_v63 }
 0x3dc   : > { %5647 = vmatmul.mubr.msk.f32.gmra.mxu0 %vm2846_vm4, %v6955_v31  ;;  %5680 = vmatprep.subr.msk.mxu1 %vm6302_vm0, %v8428_v54 }
 0x3dd   : > { %5662 = vmatpush3.msk.msra.mxu0 %vm6406_vm3, %v8428_v54  ;;  %5663 = vmatprep.mubr.msk.f32.mxu0 %vm2846_vm4, %v4389_v16 }
 0x3de   : > { %5681 = vmatpush3.msk.msra.mxu1 %vm6302_vm0, %v8428_v54  ;;  %5684 = vmatprep.mubr.msk.f32.mxu1 %vm2846_vm4, %v2758_v38 }
 0x3df   : > { %5682 = vmatprep.subr.msk.mxu1 %vm6309_vm1, %v8428_v54  ;;  %5673 = vmatprep.subr.msk.mxu0 %vm6391_vm2, %v8428_v54 }
 0x3e0   : > { %5683 = vmatpush3.msk.msra.mxu1 %vm6309_vm1, %v8428_v54  ;;  %5664 = vmatmul.mubr.msk.f32.vlgmr.msra.gmra.mxu0 %vm2846_vm4, %v4391_v4 }
 0x3e1   : > { %5685 = vmatmul.mubr.msk.f32.vlgmr.msra.gmra.mxu1 %vm2846_vm4, %v2759_v55  ;;  %5674 = vmatpush3.msk.msra.mxu0 %vm6391_vm2, %v8428_v54 }
 0x3e2   : > { %5677 = vmatprep.mubr.msk.f32.mxu0 %vm2846_vm4, %v4555_v20  ;;  %5675 = vmatprep.subr.msk.mxu0 %vm6406_vm3, %v8428_v54 }
 0x3e3   : > { %5676 = vmatpush3.msk.msra.mxu0 %vm6406_vm3, %v8428_v54  ;;  %5701 = vmatprep.mubr.msk.f32.mxu1 %vm2846_vm4, %v8448_v23 }
 0x3e4   : > { %5678 = vmatmul.mubr.msk.f32.vlgmr.msra.gmra.mxu0 %vm2846_vm4, %v4557_v50 }
 0x3e5   : > { %5691 = vmatprep.mubr.msk.f32.mxu0 %vm2846_vm4, %v8449_v49 }
 0x493   : > { %v5655_v52 = vpop.f32.mrf.mxu1 }
 0x495   : > { %v4362_v61 = vpop.f32.mrf.mxu1 }
 0x497   : > { %v5658_v56 = vpop.f32.mrf.mxu1 }
 0x498   : > { %v5645_v53 = vpop.f32.mrf.mxu0 }
 0x499   : > { %v4368_v46 = vadd.f32 %v5655_v52, %v5645_v53  ;;  %v4372_v2 = vpop.f32.mrf.mxu1 }
 0x49a   : > { %v4277_v42 = vpop.f32.mrf.mxu0 }
 0x49b   : > { %5366 = vst.msk [vmem:[%s7964_s20 + $0x48] sm:$0xff] %vm3367_vm13, %v4368_v46  ;;  %v4363_v37 = vadd.f32 %v4362_v61, %v4277_v42  ;;  %v5672_v54 = vpop.f32.mrf.mxu1 }
 0x49c   : > { %v5648_v24 = vpop.f32.mrf.mxu0 }
 0x49d   : > { %5365 = vst.msk [vmem:[%s7964_s20 + $0x40] sm:$0xff] %vm3367_vm13, %v4363_v37  ;;  %v4378_v23 = vadd.f32 %v5658_v56, %v5648_v24  ;;  %v4543_v13 = vpop.f32.mrf.mxu1 }
 0x49e   : > { %v4287_v10 = vpop.f32.mrf.mxu0 }
 0x49f   : > { %5368 = vst.msk [vmem:[%s7964_s20 + $0x58] sm:$0xff] %vm3367_vm13, %v4378_v23  ;;  %v4373_v49 = vadd.f32 %v4372_v2, %v4287_v10 }
 0x4a0   : > { %v5665_v58 = vpop.f32.mrf.mxu0 }
 0x4a1   : > { %5367 = vst.msk [vmem:[%s7964_s20 + $0x50] sm:$0xff] %vm3367_vm13, %v4373_v49  ;;  %v4549_v60 = vadd.f32 %v5672_v54, %v5665_v58  ;;  %v5686_v43 = vpop.f32.mrf.mxu1 }
 0x4a2   : > { %v4462_v36 = vpop.f32.mrf.mxu0 }
 0x4a3   : > { %v4544_v1 = vadd.f32 %v4543_v13, %v4462_v36  ;;  %5697 = vmatprep.subr.mxu1 %v4549_v60  ;;  %v4709_v27 = vpop.f32.mrf.mxu1 }
 0x4a4   : > { %v5679_v26 = vpop.f32.mrf.mxu0  ;;  %5698 = vmatpush3.msra.mxu1 %v4549_v60 }
 0x4a5   : > { %v4715_v29 = vadd.f32 %v5686_v43, %v5679_v26  ;;  %5699 = vmatprep.subr.mxu1 %v4544_v1 }
 0x4a6   : > { %v4628_v40 = vpop.f32.mrf.mxu0  ;;  %5700 = vmatpush3.msra.mxu1 %v4544_v1 }
 0x4a7   : > { %v4710_v41 = vadd.f32 %v4709_v27, %v4628_v40  ;;  %5687 = vmatprep.subr.mxu0 %v4715_v29  ;;  %5702 = vmatmul.mubr.msk.f32.vlgmr.msra.gmra.mxu1 %vm2846_vm4, %v6922_v7 }
 0x4a8   : > { %5688 = vmatpush3.msra.mxu0 %v4715_v29  ;;  %5704 = vmatprep.mubr.msk.f32.mxu1 %vm2846_vm4, %v6931_v5 }
 0x4a9   : > { %5689 = vmatprep.subr.mxu0 %v4710_v41 }
 0x4aa   : > { %5690 = vmatpush3.msra.mxu0 %v4710_v41 }
 0x4ab   : > { %5692 = vmatmul.mubr.msk.f32.vlgmr.msra.gmra.mxu0 %vm2846_vm4, %v6946_v25  ;;  %5705 = vmatmul.mubr.msk.f32.gmra.mxu1 %vm2846_vm4, %v6940_v9 }
 0x4ac   : > { %5694 = vmatprep.mubr.msk.f32.mxu0 %vm2846_vm4, %v6953_v11 }
 0x4af   : > { %5695 = vmatmul.mubr.msk.f32.gmra.mxu0 %vm2846_vm4, %v6955_v31 }
 0x567   : > { %v5703_v7 = vpop.f32.mrf.mxu1 }
 0x569   : > { %v4869_v8 = vpop.f32.mrf.mxu1 }
 0x56b   : > { %v5693_v5 = vpop.f32.mrf.mxu0  ;;  %v5706_v12 = vpop.f32.mrf.mxu1 }
 0x56c   : > { %v4875_v18 = vadd.f32 %v5703_v7, %v5693_v5 }
 0x56d   : > { %v4784_v30 = vpop.f32.mrf.mxu0  ;;  %v4879_v31 = vpop.f32.mrf.mxu1 }
 0x56e   : > { %5394 = vst.msk [vmem:[%s7964_s20 + $0x68] sm:$0xff] %vm3367_vm13, %v4875_v18  ;;  %v4870_v25 = vadd.f32 %v4869_v8, %v4784_v30 }
 0x56f   : > { %v5696_v9 = vpop.f32.mrf.mxu0 }
 0x570   : > { %5393 = vst.msk [vmem:[%s7964_s20 + $0x60] sm:$0xff] %vm3367_vm13, %v4870_v25  ;;  %v4885_v11 = vadd.f32 %v5706_v12, %v5696_v9 }
 0x571   : > { %v4794_v6 = vpop.f32.mrf.mxu0 }
 0x572   : > { %5396 = vst.msk [vmem:[%s7964_s20 + $0x78] sm:$0xff] %vm3367_vm13, %v4885_v11  ;;  %v4880_v57 = vadd.f32 %v4879_v31, %v4794_v6 }
 0x574   : > { %5395 = vst.msk [vmem:[%s7964_s20 + $0x70] sm:$0xff] %vm3367_vm13, %v4880_v57 }
 0x575   : > { %5888 = shalt.err (!%p5885_p1)
}
 0x576   : > { %s5889_s7 = scalar_lea.hbm %s8308_s8, 2048  ;;  %s5893_s24 = scalar_lea.hbm %s8361_s3, 4096 }
 0x577   : > { %p5890_p2 = scmp.ne.s32.totalorder %s8308_s8, %s5889_s7  ;;  %p5894_p9 = scmp.lt.s32.totalorder %s8308_s8, %s8361_s3 }
 0x578   : > { %p5895_p5 = scmp.lt.s32.totalorder %s5893_s24, %s5889_s7 }
 0x579   : > { %p5891_p3 = pnand %p5890_p2, %p8462_p12 }
 0x57a   : > { %p5896_p6 = por %p5895_p5, %p5894_p9 }
 0x57b   : > { %p5892_p4 = pneg %p5891_p3 }
 0x57d   : > { %p5897_p10 = pnand %p5896_p6, %p5892_p4 }
 0x57f   : > { %5900 = shalt.err (!%p5897_p10)
}
 0x580   : > { %s5951_s25 = smov 128   ;;  %s5952_s29 = smov 8  }
 0x581   : > { %5716 = dma.vmem_to_hbm [thread:$0]  (%p8462_p12), %s8310_s5, 2048, %s8308_s8, %s8318_s16, %s5951_s25, %s5951_s25, %s5952_s29  }
 0x582 PF: > { %p5733_p0 = scmp.ge.s32.totalorder %s5943_s15, 2  ;;  %s4922_s30 = sand.u32 1, %s5931_s12  }
 0x583   : > { %p8463_p7 = scmp.ne.s32.totalorder %s8403_s23, 0  ;;  %s4923_s4 = scalar_lea.sflag [#allocation3], %s4922_s30 }
 0x585   : > { %p5726_p8 = pnand %p5733_p0, %p8463_p7 }
 0x587   : > { %p5727_p11 = pneg %p5726_p8 }
 0x589   : > { %5926 = dma.done.wait (%p5727_p11), %s4923_s4, 2048  }
 0x58a   : > { %5928 = vsyncadd (%p5727_p11), %s4923_s4, 4294965248  ;;  %p15_p13 = scmp.ge.s32.totalorder %s5998_s18, 4   ;;  %s8464_s12 = smov %s5935_s13 }
 0x58b   : > { %s8465_s13 = smov %s5939_s14  ;;  %s8466_s14 = smov %s6009_s21 }
 0x58c   : > { %s8467_s15 = smov %s5998_s18  ;;  %17 = sbr.rel (!%p15_p13) target bundleno = 5 (0x5), region = 82 }
 0x591   :  { %4928 = vsyncpa [#allocation3], 1 }
 0x592   :  { %4930 = vsyncpa [#allocation3 + $0x1], 1 }
 0x593   :  { %4931 = vsyncpa [#allocation4], 1 }
 0x594   :  { %4933 = vsyncpa [#allocation4 + $0x1], 1 }
 0x595   :  { %4934 = vsyncpa [#allocation6], 1 }

</bundles_post_ra>
